<compile_context>
chip_gen: v7x
topology: tpu7x:2x2x1
jax: 0.10.0
libtpu: 0.0.40
codegen_flags: <defaults>
</compile_context>

<pallas_src>
import math

import jax
import jax.numpy as jnp
from jax import lax
from jax.experimental import pallas as pl
from jax.experimental.pallas import tpu as pltpu

_BF16_PARAMS = ("w_att_cat", "w_lang_cat", "w_h2att")


def _topdown_kernel(
    ef_ref, af1_ref, af2_ref, mask_ref,        # per-batch-tile features
    sh_ref, sc_ref, drop_ref,                  # state (2,Bb,R) + dropout scale (Bb,R)
    w_att_ref, b_att_ref,                      # fused att-LSTM weights (bf16 / f32 bias)
    w_lang_ref, b_lang_ref,                    # fused lang-LSTM weights
    w_h2a_ref, b_h2a_ref, w_alpha_ref,         # attention weights
    out_ref, nh_ref, nc_ref,                   # outputs
):
    f32 = jnp.float32
    bf16 = jnp.bfloat16
    R = nh_ref.shape[-1]
    L = af1_ref.shape[1]

    prev_h = sh_ref[1]                 # state[0][-1]  (lang-LSTM previous hidden), f32
    h0, c0 = sh_ref[0], sc_ref[0]      # att-LSTM previous (h, c), f32

    # ---------------- att LSTM cell (one wide-K bf16 matmul, f32 accumulate) ----------
    # torch.cat([prev_h, fc_feats, embed], 1) + hidden term; [fc, embed] arrives
    # pre-concatenated (and already bf16) from the wrapper.
    x_att = jnp.concatenate([prev_h.astype(bf16), ef_ref[...], h0.astype(bf16)], axis=-1)
    gates = jnp.dot(x_att, w_att_ref[...], preferred_element_type=f32) + b_att_ref[...]
    i = jax.nn.sigmoid(gates[:, 0 * R:1 * R])
    f = jax.nn.sigmoid(gates[:, 1 * R:2 * R])
    g = jnp.tanh(gates[:, 2 * R:3 * R])
    o = jax.nn.sigmoid(gates[:, 3 * R:4 * R])
    c_att = f * c0 + i * g
    h_att = o * jnp.tanh(c_att)

    # ---------------- attention ----------------
    att_h = (jnp.dot(h_att.astype(bf16), w_h2a_ref[...], preferred_element_type=f32)
             + b_h2a_ref[...])                                                    # (Bb, A)
    # tanh kept in f32 so the kernel is also safe on v5e (no bf16 VPU/EUP).
    dot = jnp.tanh(af2_ref[...].astype(f32) + att_h[:, None, :])                  # (Bb, L, A)
    # alpha_net = Linear(A, 1); its bias is constant across L and cancels in the softmax.
    logits = jnp.sum(dot * w_alpha_ref[...][None, :, :], axis=-1)                 # (Bb, L)
    # softmax -> mask -> renormalize: the first normalization cancels algebraically, so
    # compute exp(logits - max) * mask and divide once (EUP reciprocal, off the VALU).
    m = jnp.max(logits, axis=-1, keepdims=True)
    e = jnp.exp(logits - m) * mask_ref[...]
    w = e * pl.reciprocal(jnp.sum(e, axis=-1, keepdims=True), approx=True)        # (Bb, L)

    if L >= 64:
        # Production L: contract on the MXU as a batched (Bb,1,L) @ (Bb,L,R) matmul so
        # the Bb*L*R work does not land on the VALU/XLU slots.
        att_res = lax.dot_general(
            w.astype(af1_ref.dtype)[:, None, :], af1_ref[...],
            dimension_numbers=(((2,), (1,)), ((0,), (0,))),
            preferred_element_type=f32)[:, 0, :]                                  # (Bb, R)
    else:
        # Small L (test shapes): elementwise multiply + sublane reduce is neutral.
        att_res = jnp.sum(w[:, :, None] * af1_ref[...].astype(f32), axis=1)       # (Bb, R)

    # ---------------- lang LSTM cell (one bf16 matmul) ----------------
    # torch.cat([att_res, h_att], 1) + hidden term (state[0][1]) fused the same way.
    x_lang = jnp.concatenate(
        [att_res.astype(bf16), h_att.astype(bf16), prev_h.astype(bf16)], axis=-1)
    gates2 = jnp.dot(x_lang, w_lang_ref[...], preferred_element_type=f32) + b_lang_ref[...]
    i2 = jax.nn.sigmoid(gates2[:, 0 * R:1 * R])
    f2 = jax.nn.sigmoid(gates2[:, 1 * R:2 * R])
    g2 = jnp.tanh(gates2[:, 2 * R:3 * R])
    o2 = jax.nn.sigmoid(gates2[:, 3 * R:4 * R])
    c_lang = f2 * sc_ref[1] + i2 * g2
    h_lang = o2 * jnp.tanh(c_lang)

    # ---------------- dropout(p=0.5) ----------------
    # drop_ref holds keep_mask / (1-p) (bf16: exactly 0.0 / 2.0) in training, 1.0 in eval.
    out_ref[...] = h_lang * drop_ref[...].astype(f32)

    nh_ref[0] = h_att
    nh_ref[1] = h_lang
    nc_ref[0] = c_att
    nc_ref[1] = c_lang


def _vmem_limit_bytes():
    """Physical-VMEM-aware scoped limit (v5e/v6e: 128 MiB, v7x: 64 MiB per TensorCore)."""
    cap = None
    try:
        cap = pltpu.get_tpu_info().vmem_capacity_bytes
    except Exception:
        cap = None
    if not cap:
        cap = 64 * 1024 * 1024                  # conservative fallback: v7x per-core VMEM
    return int(min(96 * 1024 * 1024, (cap * 3) // 4))


def _tile_vmem_bytes(bb, E, R, A, L):
    """Rough per-batch-tile VMEM footprint: double-buffered I/O + weights + live temps."""
    f32, bf16 = 4, 2
    io = (bb * (E + R) * bf16            # [fc_feats, embed] concat
          + bb * L * R * bf16            # att_feats1
          + bb * L * A * bf16            # att_feats2
          + bb * L * f32                 # att_masks
          + 2 * 2 * bb * R * f32         # state_h, state_c
          + bb * R * bf16                # dropout scale
          + bb * R * f32                 # output
          + 2 * 2 * bb * R * f32)        # new h / c state
    weights = (((E + 3 * R) * 4 * R + 3 * R * 4 * R + R * A) * bf16
               + (8 * R + 2 * A) * f32)
    temps = (bb * L * A * f32            # tanh(att_feats2 + att_h)
             + bb * L * R * f32          # attention context product (small-L path)
             + 3 * bb * L * f32          # logits / exp / weights
             + bb * (E + 3 * R) * bf16   # x_att
             + bb * 3 * R * bf16         # x_lang
             + 16 * bb * R * f32)        # gate pre-activations, h/c intermediates
    return 2 * (io + weights) + temps    # x2: BlockSpec double-buffering


def _pick_b_blk(B, E, R, A, L, vmem_limit):
    """Largest batch tile (multiple of 8, divides B) whose footprint fits in VMEM.

    MXU M saturates around 256 rows; for large B keep >= 2 grid steps so both v7x
    TensorCores get work under dimension_semantics=("parallel",).
    """
    budget = int(vmem_limit * 0.7)       # headroom for compiler scratch / spills
    cap = min(B, 256)
    if B >= 256:
        cap = min(cap, max(128, B // 2))
    for cand in range(cap, 7, -1):
        if B % cand != 0:
            continue
        if cand % 8 != 0 and cand != B:
            continue
        if _tile_vmem_bytes(cand, E, R, A, L) <= budget:
            return cand
    return B if (B < 8 or B % 8 != 0) else 8


def topdown_forward(params, embed, fc_feats, att_feats1, att_feats2, att_masks,
                    state, *, rng=None, training=True, b_blk=None):
    B, R = fc_feats.shape
    E = embed.shape[-1]
    L = att_feats1.shape[1]
    A = att_feats2.shape[-1]
    state_h, state_c = state
    f32, bf16 = jnp.float32, jnp.bfloat16

    vmem_limit = _vmem_limit_bytes()
    if b_blk is None:
        b_blk = _pick_b_blk(B, E, R, A, L, vmem_limit)
    if B % b_blk != 0:
        b_blk = B
    grid = (B // b_blk,)

    # bf16 the heavy HBM operands (att features, fused weights); MXU accumulates in f32.
    ef = jnp.concatenate([fc_feats, embed], axis=-1).astype(bf16)   # [fc, embed] order
    af1 = att_feats1.astype(bf16)
    af2 = att_feats2.astype(bf16)
    mask = att_masks.astype(f32)

    # Dropout scale built host-side with jax.random (identity / no RNG work in eval).
    # TODO(synk): on hardware this could use the in-kernel pltpu.prng_* PRNG and drop the
    # (B, R) HBM stream entirely; kept host-side so interpret-mode tests also work.
    if training:
        if rng is None:
            rng = jax.random.PRNGKey(0)
        keep = jax.random.bernoulli(rng, 0.5, (B, R))
        drop = (keep.astype(f32) * 2.0).astype(bf16)   # keep / (1 - p), p = 0.5 (exact)
    else:
        drop = jnp.ones((B, R), bf16)

    args = (
        ef, af1, af2, mask,
        state_h.astype(f32), state_c.astype(f32), drop,
        params["w_att_cat"].astype(bf16), params["b_att"].astype(f32),
        params["w_lang_cat"].astype(bf16), params["b_lang"].astype(f32),
        params["w_h2att"].astype(bf16), params["b_h2att"].astype(f32),
        params["w_alpha"].astype(f32),
    )

    bmap = lambda b: (b, 0)
    bmap3 = lambda b: (b, 0, 0)
    smap = lambda b: (0, b, 0)     # state tensors are (2, B, R); tile the batch axis
    wmap = lambda b: (0, 0)        # weights: same block every step -> stays VMEM resident

    in_specs = [
        pl.BlockSpec((b_blk, E + R), bmap),         # [fc, embed] (bf16)
        pl.BlockSpec((b_blk, L, R), bmap3),         # att_feats1 (bf16)
        pl.BlockSpec((b_blk, L, A), bmap3),         # att_feats2 (bf16)
        pl.BlockSpec((b_blk, L), bmap),             # att_masks
        pl.BlockSpec((2, b_blk, R), smap),          # state_h
        pl.BlockSpec((2, b_blk, R), smap),          # state_c
        pl.BlockSpec((b_blk, R), bmap),             # dropout scale (bf16)
        pl.BlockSpec((E + 3 * R, 4 * R), wmap),     # w_att_cat (bf16)
        pl.BlockSpec((1, 4 * R), wmap),             # b_att
        pl.BlockSpec((3 * R, 4 * R), wmap),         # w_lang_cat (bf16)
        pl.BlockSpec((1, 4 * R), wmap),             # b_lang
        pl.BlockSpec((R, A), wmap),                 # w_h2att (bf16)
        pl.BlockSpec((1, A), wmap),                 # b_h2att
        pl.BlockSpec((1, A), wmap),                 # w_alpha
    ]
    out_specs = (
        pl.BlockSpec((b_blk, R), bmap),
        pl.BlockSpec((2, b_blk, R), smap),
        pl.BlockSpec((2, b_blk, R), smap),
    )
    out_shapes = (
        jax.ShapeDtypeStruct((B, R), f32),       # output (dropped h_lang)
        jax.ShapeDtypeStruct((2, B, R), f32),    # stacked h state
        jax.ShapeDtypeStruct((2, B, R), f32),    # stacked c state
    )

    flops = 2 * B * ((E + 3 * R) * 4 * R + 3 * R * 4 * R + R * A + L * A + L * R)
    transcendentals = B * (10 * R + L * A + L)
    bytes_accessed = (
        B * ((E + R) * 2 + L * R * 2 + L * A * 2 + L * 4 + R * 2)   # bf16 feats + f32 mask
        + 2 * 2 * B * R * 4                                         # state in
        + ((E + 3 * R) * 4 * R + 3 * R * 4 * R + R * A) * 2         # bf16 weights
        + (8 * R + 2 * A) * 4                                       # f32 biases + alpha
        + B * R * 4 + 2 * 2 * B * R * 4                             # outputs
    )

    output, nh, nc = pl.pallas_call(
        _topdown_kernel,
        grid=grid,
        in_specs=in_specs,
        out_specs=out_specs,
        out_shape=out_shapes,
        compiler_params=pltpu.CompilerParams(
            dimension_semantics=("parallel",),      # independent batch tiles (2 TCs on v7x)
            vmem_limit_bytes=int(vmem_limit),
        ),
        cost_estimate=pl.CostEstimate(
            flops=int(flops),
            transcendentals=int(transcendentals),
            bytes_accessed=int(bytes_accessed),
        ),
    )(*args)
    return output, (nh, nc)


def init_params(key, E, R, A):
    """Deterministic init mirroring nn.LSTMCell / nn.Linear shapes, packed for the kernel."""
    ks = jax.random.split(key, 11)
    br = 1.0 / math.sqrt(R)
    ba = 1.0 / math.sqrt(A)

    def u(k, shape, b):
        return jax.random.uniform(k, shape, jnp.float32, -b, b)

    # att_lstm = LSTMCell(E + 2R, R); lang_lstm = LSTMCell(2R, R)
    w_ih_att = u(ks[0], (4 * R, E + 2 * R), br)
    w_hh_att = u(ks[1], (4 * R, R), br)
    b_ih_att = u(ks[2], (4 * R,), br)
    b_hh_att = u(ks[3], (4 * R,), br)
    w_ih_lang = u(ks[4], (4 * R, 2 * R), br)
    w_hh_lang = u(ks[5], (4 * R, R), br)
    b_ih_lang = u(ks[6], (4 * R,), br)
    b_hh_lang = u(ks[7], (4 * R,), br)
    # attention: h2att = Linear(R, A), alpha_net = Linear(A, 1)
    w_h2att = u(ks[8], (A, R), br)
    b_h2att = u(ks[9], (A,), br)
    w_alpha = u(ks[10], (1, A), ba)
    # alpha_net bias omitted on purpose: a per-batch constant cancels in the softmax.

    wia_t = w_ih_att.T    # (R + R + E, 4R), rows ordered [prev_h, fc_feats, embed]
    wil_t = w_ih_lang.T   # (R + R, 4R),     rows ordered [att_res, h_att]
    # Fused weights: input rows [prev_h, fc, embed, h0] and [att_res, h_att, prev_h]
    w_att_cat = jnp.concatenate([wia_t, w_hh_att.T], axis=0)     # (E + 3R, 4R)
    w_lang_cat = jnp.concatenate([wil_t, w_hh_lang.T], axis=0)   # (3R, 4R)
    return dict(
        w_att_cat=w_att_cat,
        b_att=(b_ih_att + b_hh_att)[None, :],
        w_lang_cat=w_lang_cat,
        b_lang=(b_ih_lang + b_hh_lang)[None, :],
        w_h2att=w_h2att.T,
        b_h2att=b_h2att[None, :],
        w_alpha=w_alpha,
    )


def ref_forward(params, embed, fc, af1, af2, mask, state):
    """Pure-JAX f32 reference (eval mode, no dropout), using the original
    softmax -> mask -> renormalize attention ordering."""
    sh, sc = state
    R = sh.shape[-1]
    prev_h, h0, c0 = sh[1], sh[0], sc[0]

    x_att = jnp.concatenate([prev_h, fc, embed, h0], axis=-1)
    gates = x_att @ params["w_att_cat"] + params["b_att"]
    i, f, g, o = [gates[:, k * R:(k + 1) * R] for k in range(4)]
    c_att = jax.nn.sigmoid(f) * c0 + jax.nn.sigmoid(i) * jnp.tanh(g)
    h_att = jax.nn.sigmoid(o) * jnp.tanh(c_att)

    att_h = h_att @ params["w_h2att"] + params["b_h2att"]
    dot = jnp.tanh(af2 + att_h[:, None, :])
    logits = jnp.sum(dot * params["w_alpha"][None, :, :], axis=-1)
    w = jax.nn.softmax(logits, axis=-1)
    w = w * mask
    w = w / jnp.sum(w, axis=-1, keepdims=True)
    att_res = jnp.sum(w[:, :, None] * af1, axis=1)

    x_lang = jnp.concatenate([att_res, h_att, prev_h], axis=-1)
    gates2 = x_lang @ params["w_lang_cat"] + params["b_lang"]
    i2, f2, g2, o2 = [gates2[:, k * R:(k + 1) * R] for k in range(4)]
    c_lang = jax.nn.sigmoid(f2) * sc[1] + jax.nn.sigmoid(i2) * jnp.tanh(g2)
    h_lang = jax.nn.sigmoid(o2) * jnp.tanh(c_lang)
    return h_lang, (jnp.stack([h_att, h_lang]), jnp.stack([c_att, c_lang]))


if __name__ == "__main__":
    # Small but MXU/lane-friendly shapes: R = A = E = 128, L and B multiples of 8, so
    # gate slices and all stores are (8,128)-aligned / lane dense.
    B, E, R, A, L = 16, 128, 128, 128, 16
    key = jax.random.PRNGKey(0)
    kp, kd = jax.random.split(key)
    params = init_params(kp, E, R, A)

    ks = jax.random.split(kd, 8)
    embed = jax.random.normal(ks[0], (B, E), jnp.float32)
    fc_feats = jax.random.normal(ks[1], (B, R), jnp.float32)
    att_feats1 = jax.random.normal(ks[2], (B, L, R), jnp.float32)
    att_feats2 = jax.random.normal(ks[3], (B, L, A), jnp.float32)
    att_masks = (jax.random.uniform(ks[4], (B, L)) > 0.2).astype(jnp.float32)
    att_masks = att_masks.at[:, 0].set(1.0)     # at least one valid region per batch row
    state_h = jax.random.normal(ks[5], (2, B, R), jnp.float32) * 0.1
    state_c = jax.random.normal(ks[6], (2, B, R), jnp.float32) * 0.1
    state = (state_h, state_c)

    # Eval-mode correctness check. The reference sees the same bf16-rounded heavy
    # operands the kernel consumes (weights + features), so the comparison isolates
    # kernel correctness from the intentional bf16 quantization.
    def rt(x):  # bf16 round-trip
        return x.astype(jnp.bfloat16).astype(jnp.float32)

    params_ref = {k: (rt(v) if k in _BF16_PARAMS else v) for k, v in params.items()}
    out_eval, (nh, nc) = topdown_forward(params, embed, fc_feats, att_feats1,
                                         att_feats2, att_masks, state, training=False)
    ref_out, (ref_nh, ref_nc) = ref_forward(params_ref, rt(embed), rt(fc_feats),
                                            rt(att_feats1), rt(att_feats2),
                                            att_masks, state)
    # Tolerance covers bf16 activation casts, the approximate reciprocal and MXU
    # accumulation-order differences between Mosaic and XLA.
    assert bool(jnp.allclose(out_eval, ref_out, atol=2e-2, rtol=2e-2)), "output mismatch"
    assert bool(jnp.allclose(nh, ref_nh, atol=2e-2, rtol=2e-2)), "h-state mismatch"
    assert bool(jnp.allclose(nc, ref_nc, atol=2e-2, rtol=2e-2)), "c-state mismatch"

    # Training-mode call (matches nn.Module default self.training=True -> dropout active);
    # forces a smaller tile here only to exercise the multi-step pipelined grid.
    out_train, new_state = topdown_forward(params, embed, fc_feats, att_feats1,
                                           att_feats2, att_masks, state,
                                           rng=ks[7], training=True, b_blk=8)
    jax.block_until_ready((out_eval, nh, nc, out_train, new_state))
    print("KERNEL_OK")
</pallas_src>

<mosaic_0001>
module attributes {stable_mosaic.version = 11 : i64} {
  func.func @_topdown_kernel(%arg0: i32, %arg1: memref<16x256xbf16, #tpu.memory_space<vmem>>, %arg2: memref<16x16x128xbf16, #tpu.memory_space<vmem>>, %arg3: memref<16x16x128xbf16, #tpu.memory_space<vmem>>, %arg4: memref<16x16xf32, #tpu.memory_space<vmem>>, %arg5: memref<2x16x128xf32, #tpu.memory_space<vmem>>, %arg6: memref<2x16x128xf32, #tpu.memory_space<vmem>>, %arg7: memref<16x128xbf16, #tpu.memory_space<vmem>>, %arg8: memref<512x512xbf16, #tpu.memory_space<vmem>>, %arg9: memref<1x512xf32, #tpu.memory_space<vmem>>, %arg10: memref<384x512xbf16, #tpu.memory_space<vmem>>, %arg11: memref<1x512xf32, #tpu.memory_space<vmem>>, %arg12: memref<128x128xbf16, #tpu.memory_space<vmem>>, %arg13: memref<1x128xf32, #tpu.memory_space<vmem>>, %arg14: memref<1x128xf32, #tpu.memory_space<vmem>>, %arg15: memref<16x128xf32, #tpu.memory_space<vmem>>, %arg16: memref<2x16x128xf32, #tpu.memory_space<vmem>>, %arg17: memref<2x16x128xf32, #tpu.memory_space<vmem>>) attributes {dimension_semantics = [#tpu.dimension_semantics<parallel>], iteration_bounds = array<i64: 1>, scalar_prefetch = 0 : i64, scratch_operands = 0 : i64, tpu.core_type = #tpu.core_type<tc>, window_params = [{transform_indices = @transform_0, window_bounds = array<i64: 16, 256>}, {transform_indices = @transform_1, window_bounds = array<i64: 16, 16, 128>}, {transform_indices = @transform_2, window_bounds = array<i64: 16, 16, 128>}, {transform_indices = @transform_3, window_bounds = array<i64: 16, 16>}, {transform_indices = @transform_4, window_bounds = array<i64: 2, 16, 128>}, {transform_indices = @transform_5, window_bounds = array<i64: 2, 16, 128>}, {transform_indices = @transform_6, window_bounds = array<i64: 16, 128>}, {pipeline_mode = #tpu.pipeline_mode<synchronous>, transform_indices = @transform_7, window_bounds = array<i64: 512, 512>}, {pipeline_mode = #tpu.pipeline_mode<synchronous>, transform_indices = @transform_8, window_bounds = array<i64: 1, 512>}, {pipeline_mode = #tpu.pipeline_mode<synchronous>, transform_indices = @transform_9, window_bounds = array<i64: 384, 512>}, {pipeline_mode = #tpu.pipeline_mode<synchronous>, transform_indices = @transform_10, window_bounds = array<i64: 1, 512>}, {pipeline_mode = #tpu.pipeline_mode<synchronous>, transform_indices = @transform_11, window_bounds = array<i64: 128, 128>}, {pipeline_mode = #tpu.pipeline_mode<synchronous>, transform_indices = @transform_12, window_bounds = array<i64: 1, 128>}, {pipeline_mode = #tpu.pipeline_mode<synchronous>, transform_indices = @transform_13, window_bounds = array<i64: 1, 128>}, {transform_indices = @transform_14, window_bounds = array<i64: 16, 128>}, {transform_indices = @transform_15, window_bounds = array<i64: 2, 16, 128>}, {transform_indices = @transform_16, window_bounds = array<i64: 2, 16, 128>}]} {
    %c1 = arith.constant 1 : index
    %c0 = arith.constant 0 : index
    %c0_0 = arith.constant 0 : index
    %0 = vector.load %arg5[%c1, %c0, %c0_0] : memref<2x16x128xf32, #tpu.memory_space<vmem>>, vector<1x16x128xf32>
    %1 = vector.shape_cast %0 : vector<1x16x128xf32> to vector<16x128xf32>
    %c0_1 = arith.constant 0 : index
    %c0_2 = arith.constant 0 : index
    %c0_3 = arith.constant 0 : index
    %2 = vector.load %arg5[%c0_1, %c0_2, %c0_3] : memref<2x16x128xf32, #tpu.memory_space<vmem>>, vector<1x16x128xf32>
    %3 = vector.shape_cast %2 : vector<1x16x128xf32> to vector<16x128xf32>
    %c0_4 = arith.constant 0 : index
    %c0_5 = arith.constant 0 : index
    %c0_6 = arith.constant 0 : index
    %4 = vector.load %arg6[%c0_4, %c0_5, %c0_6] : memref<2x16x128xf32, #tpu.memory_space<vmem>>, vector<1x16x128xf32>
    %5 = vector.shape_cast %4 : vector<1x16x128xf32> to vector<16x128xf32>
    %6 = arith.truncf %1 : vector<16x128xf32> to vector<16x128xbf16>
    %c0_7 = arith.constant 0 : index
    %c0_8 = arith.constant 0 : index
    %7 = vector.load %arg1[%c0_7, %c0_8] : memref<16x256xbf16, #tpu.memory_space<vmem>>, vector<16x256xbf16>
    %8 = arith.truncf %3 : vector<16x128xf32> to vector<16x128xbf16>
    %9 = tpu.concatenate %6, %7, %8 in 1 : vector<16x128xbf16>, vector<16x256xbf16>, vector<16x128xbf16> -> vector<16x512xbf16>
    %c0_9 = arith.constant 0 : index
    %c0_10 = arith.constant 0 : index
    %10 = vector.load %arg8[%c0_9, %c0_10] : memref<512x512xbf16, #tpu.memory_space<vmem>>, vector<512x512xbf16>
    %cst = arith.constant dense<0.000000e+00> : vector<16x512xf32>
    %11 = tpu.matmul %9, %10, %cst {dimension_numbers = #tpu.dot_dimension_numbers<[1], [0], [0], [1], [0, 0, 1, 1], [], []>} : vector<16x512xbf16>, vector<512x512xbf16>, vector<16x512xf32> -> vector<16x512xf32>
    %c0_11 = arith.constant 0 : index
    %c0_12 = arith.constant 0 : index
    %12 = vector.load %arg9[%c0_11, %c0_12] : memref<1x512xf32, #tpu.memory_space<vmem>>, vector<1x512xf32>
    %13 = vector.broadcast %12 : vector<1x512xf32> to vector<16x512xf32>
    %14 = arith.addf %11, %13 : vector<16x512xf32>
    %15 = vector.extract_strided_slice %14 {offsets = [0, 0], sizes = [16, 128], strides = [1, 1]} : vector<16x512xf32> to vector<16x128xf32>
    %16 = arith.negf %15 : vector<16x128xf32>
    %17 = math.exp %16 : vector<16x128xf32>
    %cst_13 = arith.constant 1.000000e+00 : f32
    %18 = vector.broadcast %cst_13 : f32 to vector<16x128xf32>
    %19 = arith.addf %18, %17 : vector<16x128xf32>
    %20 = arith.divf %18, %19 : vector<16x128xf32>
    %21 = vector.extract_strided_slice %14 {offsets = [0, 128], sizes = [16, 128], strides = [1, 1]} : vector<16x512xf32> to vector<16x128xf32>
    %22 = arith.negf %21 : vector<16x128xf32>
    %23 = math.exp %22 : vector<16x128xf32>
    %cst_14 = arith.constant 1.000000e+00 : f32
    %24 = vector.broadcast %cst_14 : f32 to vector<16x128xf32>
    %25 = arith.addf %24, %23 : vector<16x128xf32>
    %26 = arith.divf %24, %25 : vector<16x128xf32>
    %27 = vector.extract_strided_slice %14 {offsets = [0, 256], sizes = [16, 128], strides = [1, 1]} : vector<16x512xf32> to vector<16x128xf32>
    %28 = math.tanh %27 : vector<16x128xf32>
    %29 = vector.extract_strided_slice %14 {offsets = [0, 384], sizes = [16, 128], strides = [1, 1]} : vector<16x512xf32> to vector<16x128xf32>
    %30 = arith.negf %29 : vector<16x128xf32>
    %31 = math.exp %30 : vector<16x128xf32>
    %cst_15 = arith.constant 1.000000e+00 : f32
    %32 = vector.broadcast %cst_15 : f32 to vector<16x128xf32>
    %33 = arith.addf %32, %31 : vector<16x128xf32>
    %34 = arith.divf %32, %33 : vector<16x128xf32>
    %35 = arith.mulf %26, %5 : vector<16x128xf32>
    %36 = arith.mulf %20, %28 : vector<16x128xf32>
    %37 = arith.addf %35, %36 : vector<16x128xf32>
    %38 = math.tanh %37 : vector<16x128xf32>
    %39 = arith.mulf %34, %38 : vector<16x128xf32>
    %40 = arith.truncf %39 : vector<16x128xf32> to vector<16x128xbf16>
    %c0_16 = arith.constant 0 : index
    %c0_17 = arith.constant 0 : index
    %41 = vector.load %arg12[%c0_16, %c0_17] : memref<128x128xbf16, #tpu.memory_space<vmem>>, vector<128x128xbf16>
    %cst_18 = arith.constant dense<0.000000e+00> : vector<16x128xf32>
    %42 = tpu.matmul %40, %41, %cst_18 {dimension_numbers = #tpu.dot_dimension_numbers<[1], [0], [0], [1], [0, 0, 1, 1], [], []>} : vector<16x128xbf16>, vector<128x128xbf16>, vector<16x128xf32> -> vector<16x128xf32>
    %c0_19 = arith.constant 0 : index
    %c0_20 = arith.constant 0 : index
    %43 = vector.load %arg13[%c0_19, %c0_20] : memref<1x128xf32, #tpu.memory_space<vmem>>, vector<1x128xf32>
    %44 = vector.broadcast %43 : vector<1x128xf32> to vector<16x128xf32>
    %45 = arith.addf %42, %44 : vector<16x128xf32>
    %c0_21 = arith.constant 0 : index
    %c0_22 = arith.constant 0 : index
    %c0_23 = arith.constant 0 : index
    %46 = vector.load %arg3[%c0_21, %c0_22, %c0_23] : memref<16x16x128xbf16, #tpu.memory_space<vmem>>, vector<16x16x128xbf16>
    %47 = arith.extf %46 : vector<16x16x128xbf16> to vector<16x16x128xf32>
    %48 = vector.shape_cast %45 : vector<16x128xf32> to vector<16x1x128xf32>
    %49 = vector.broadcast %48 : vector<16x1x128xf32> to vector<16x16x128xf32>
    %50 = arith.addf %47, %49 : vector<16x16x128xf32>
    %51 = math.tanh %50 : vector<16x16x128xf32>
    %c0_24 = arith.constant 0 : index
    %c0_25 = arith.constant 0 : index
    %52 = vector.load %arg14[%c0_24, %c0_25] : memref<1x128xf32, #tpu.memory_space<vmem>>, vector<1x128xf32>
    %53 = vector.shape_cast %52 : vector<1x128xf32> to vector<1x1x128xf32>
    %54 = vector.broadcast %53 : vector<1x1x128xf32> to vector<16x16x128xf32>
    %55 = arith.mulf %51, %54 : vector<16x16x128xf32>
    %cst_26 = arith.constant dense<0.000000e+00> : vector<16x16xf32>
    %56 = vector.multi_reduction <add>, %55, %cst_26 [2] : vector<16x16x128xf32> to vector<16x16xf32>
    %cst_27 = arith.constant dense<0xFF800000> : vector<16xf32>
    %57 = vector.multi_reduction <maximumf>, %56, %cst_27 [1] : vector<16x16xf32> to vector<16xf32>
    %58 = vector.shape_cast %57 : vector<16xf32> to vector<16x1xf32>
    %59 = vector.broadcast %58 : vector<16x1xf32> to vector<16x16xf32>
    %60 = arith.subf %56, %59 : vector<16x16xf32>
    %61 = math.exp %60 : vector<16x16xf32>
    %c0_28 = arith.constant 0 : index
    %c0_29 = arith.constant 0 : index
    %62 = vector.load %arg4[%c0_28, %c0_29] : memref<16x16xf32, #tpu.memory_space<vmem>>, vector<16x16xf32>
    %63 = arith.mulf %61, %62 : vector<16x16xf32>
    %cst_30 = arith.constant dense<0.000000e+00> : vector<16xf32>
    %64 = vector.multi_reduction <add>, %63, %cst_30 [1] : vector<16x16xf32> to vector<16xf32>
    %65 = vector.shape_cast %64 : vector<16xf32> to vector<16x1xf32>
    %66 = tpu.reciprocal %65 {approx = true} : vector<16x1xf32> -> vector<16x1xf32>
    %67 = vector.broadcast %66 : vector<16x1xf32> to vector<16x16xf32>
    %68 = arith.mulf %63, %67 : vector<16x16xf32>
    %69 = vector.shape_cast %68 : vector<16x16xf32> to vector<16x16x1xf32>
    %c0_31 = arith.constant 0 : index
    %c0_32 = arith.constant 0 : index
    %c0_33 = arith.constant 0 : index
    %70 = vector.load %arg2[%c0_31, %c0_32, %c0_33] : memref<16x16x128xbf16, #tpu.memory_space<vmem>>, vector<16x16x128xbf16>
    %71 = arith.extf %70 : vector<16x16x128xbf16> to vector<16x16x128xf32>
    %72 = vector.broadcast %69 : vector<16x16x1xf32> to vector<16x16x128xf32>
    %73 = arith.mulf %72, %71 : vector<16x16x128xf32>
    %cst_34 = arith.constant dense<0.000000e+00> : vector<16x128xf32>
    %74 = vector.multi_reduction <add>, %73, %cst_34 [1] : vector<16x16x128xf32> to vector<16x128xf32>
    %75 = arith.truncf %74 : vector<16x128xf32> to vector<16x128xbf16>
    %76 = arith.truncf %39 : vector<16x128xf32> to vector<16x128xbf16>
    %77 = arith.truncf %1 : vector<16x128xf32> to vector<16x128xbf16>
    %78 = tpu.concatenate %75, %76, %77 in 1 : vector<16x128xbf16>, vector<16x128xbf16>, vector<16x128xbf16> -> vector<16x384xbf16>
    %c0_35 = arith.constant 0 : index
    %c0_36 = arith.constant 0 : index
    %79 = vector.load %arg10[%c0_35, %c0_36] : memref<384x512xbf16, #tpu.memory_space<vmem>>, vector<384x512xbf16>
    %cst_37 = arith.constant dense<0.000000e+00> : vector<16x512xf32>
    %80 = tpu.matmul %78, %79, %cst_37 {dimension_numbers = #tpu.dot_dimension_numbers<[1], [0], [0], [1], [0, 0, 1, 1], [], []>} : vector<16x384xbf16>, vector<384x512xbf16>, vector<16x512xf32> -> vector<16x512xf32>
    %c0_38 = arith.constant 0 : index
    %c0_39 = arith.constant 0 : index
    %81 = vector.load %arg11[%c0_38, %c0_39] : memref<1x512xf32, #tpu.memory_space<vmem>>, vector<1x512xf32>
    %82 = vector.broadcast %81 : vector<1x512xf32> to vector<16x512xf32>
    %83 = arith.addf %80, %82 : vector<16x512xf32>
    %84 = vector.extract_strided_slice %83 {offsets = [0, 0], sizes = [16, 128], strides = [1, 1]} : vector<16x512xf32> to vector<16x128xf32>
    %85 = arith.negf %84 : vector<16x128xf32>
    %86 = math.exp %85 : vector<16x128xf32>
    %cst_40 = arith.constant 1.000000e+00 : f32
    %87 = vector.broadcast %cst_40 : f32 to vector<16x128xf32>
    %88 = arith.addf %87, %86 : vector<16x128xf32>
    %89 = arith.divf %87, %88 : vector<16x128xf32>
    %90 = vector.extract_strided_slice %83 {offsets = [0, 128], sizes = [16, 128], strides = [1, 1]} : vector<16x512xf32> to vector<16x128xf32>
    %91 = arith.negf %90 : vector<16x128xf32>
    %92 = math.exp %91 : vector<16x128xf32>
    %cst_41 = arith.constant 1.000000e+00 : f32
    %93 = vector.broadcast %cst_41 : f32 to vector<16x128xf32>
    %94 = arith.addf %93, %92 : vector<16x128xf32>
    %95 = arith.divf %93, %94 : vector<16x128xf32>
    %96 = vector.extract_strided_slice %83 {offsets = [0, 256], sizes = [16, 128], strides = [1, 1]} : vector<16x512xf32> to vector<16x128xf32>
    %97 = math.tanh %96 : vector<16x128xf32>
    %98 = vector.extract_strided_slice %83 {offsets = [0, 384], sizes = [16, 128], strides = [1, 1]} : vector<16x512xf32> to vector<16x128xf32>
    %99 = arith.negf %98 : vector<16x128xf32>
    %100 = math.exp %99 : vector<16x128xf32>
    %cst_42 = arith.constant 1.000000e+00 : f32
    %101 = vector.broadcast %cst_42 : f32 to vector<16x128xf32>
    %102 = arith.addf %101, %100 : vector<16x128xf32>
    %103 = arith.divf %101, %102 : vector<16x128xf32>
    %c1_43 = arith.constant 1 : index
    %c0_44 = arith.constant 0 : index
    %c0_45 = arith.constant 0 : index
    %104 = vector.load %arg6[%c1_43, %c0_44, %c0_45] : memref<2x16x128xf32, #tpu.memory_space<vmem>>, vector<1x16x128xf32>
    %105 = vector.shape_cast %104 : vector<1x16x128xf32> to vector<16x128xf32>
    %106 = arith.mulf %95, %105 : vector<16x128xf32>
    %107 = arith.mulf %89, %97 : vector<16x128xf32>
    %108 = arith.addf %106, %107 : vector<16x128xf32>
    %109 = math.tanh %108 : vector<16x128xf32>
    %110 = arith.mulf %103, %109 : vector<16x128xf32>
    %c0_46 = arith.constant 0 : index
    %c0_47 = arith.constant 0 : index
    %111 = vector.load %arg7[%c0_46, %c0_47] : memref<16x128xbf16, #tpu.memory_space<vmem>>, vector<16x128xbf16>
    %112 = arith.extf %111 : vector<16x128xbf16> to vector<16x128xf32>
    %113 = arith.mulf %110, %112 : vector<16x128xf32>
    %c0_48 = arith.constant 0 : index
    %c0_49 = arith.constant 0 : index
    %114 = vector.load %arg15[%c0_48, %c0_49] : memref<16x128xf32, #tpu.memory_space<vmem>>, vector<16x128xf32>
    tpu.vector_store %arg15[%c0_48, %c0_49], %113 {strides = array<i32>} : memref<16x128xf32, #tpu.memory_space<vmem>>, vector<16x128xf32>,
    %c0_50 = arith.constant 0 : index
    %c0_51 = arith.constant 0 : index
    %c0_52 = arith.constant 0 : index
    %115 = vector.load %arg16[%c0_50, %c0_51, %c0_52] : memref<2x16x128xf32, #tpu.memory_space<vmem>>, vector<1x16x128xf32>
    %116 = vector.shape_cast %115 : vector<1x16x128xf32> to vector<16x128xf32>
    %117 = vector.shape_cast %39 : vector<16x128xf32> to vector<1x16x128xf32>
    tpu.vector_store %arg16[%c0_50, %c0_51, %c0_52], %117 {strides = array<i32>} : memref<2x16x128xf32, #tpu.memory_space<vmem>>, vector<1x16x128xf32>,
    %c1_53 = arith.constant 1 : index
    %c0_54 = arith.constant 0 : index
    %c0_55 = arith.constant 0 : index
    %118 = vector.load %arg16[%c1_53, %c0_54, %c0_55] : memref<2x16x128xf32, #tpu.memory_space<vmem>>, vector<1x16x128xf32>
    %119 = vector.shape_cast %118 : vector<1x16x128xf32> to vector<16x128xf32>
    %120 = vector.shape_cast %110 : vector<16x128xf32> to vector<1x16x128xf32>
    tpu.vector_store %arg16[%c1_53, %c0_54, %c0_55], %120 {strides = array<i32>} : memref<2x16x128xf32, #tpu.memory_space<vmem>>, vector<1x16x128xf32>,
    %c0_56 = arith.constant 0 : index
    %c0_57 = arith.constant 0 : index
    %c0_58 = arith.constant 0 : index
    %121 = vector.load %arg17[%c0_56, %c0_57, %c0_58] : memref<2x16x128xf32, #tpu.memory_space<vmem>>, vector<1x16x128xf32>
    %122 = vector.shape_cast %121 : vector<1x16x128xf32> to vector<16x128xf32>
    %123 = vector.shape_cast %37 : vector<16x128xf32> to vector<1x16x128xf32>
    tpu.vector_store %arg17[%c0_56, %c0_57, %c0_58], %123 {strides = array<i32>} : memref<2x16x128xf32, #tpu.memory_space<vmem>>, vector<1x16x128xf32>,
    %c1_59 = arith.constant 1 : index
    %c0_60 = arith.constant 0 : index
    %c0_61 = arith.constant 0 : index
    %124 = vector.load %arg17[%c1_59, %c0_60, %c0_61] : memref<2x16x128xf32, #tpu.memory_space<vmem>>, vector<1x16x128xf32>
    %125 = vector.shape_cast %124 : vector<1x16x128xf32> to vector<16x128xf32>
    %126 = vector.shape_cast %108 : vector<16x128xf32> to vector<1x16x128xf32>
    tpu.vector_store %arg17[%c1_59, %c0_60, %c0_61], %126 {strides = array<i32>} : memref<2x16x128xf32, #tpu.memory_space<vmem>>, vector<1x16x128xf32>,
    return
  }
  func.func @transform_0(%arg0: i32) -> (i32, i32) {
    %c0_i32 = arith.constant 0 : i32
    %c0_i32_0 = arith.constant 0 : i32
    return %arg0, %c0_i32 : i32, i32
  }
  func.func @transform_1(%arg0: i32) -> (i32, i32, i32) {
    %c0_i32 = arith.constant 0 : i32
    %c0_i32_0 = arith.constant 0 : i32
    %c0_i32_1 = arith.constant 0 : i32
    return %arg0, %c0_i32, %c0_i32_0 : i32, i32, i32
  }
  func.func @transform_2(%arg0: i32) -> (i32, i32, i32) {
    %c0_i32 = arith.constant 0 : i32
    %c0_i32_0 = arith.constant 0 : i32
    %c0_i32_1 = arith.constant 0 : i32
    return %arg0, %c0_i32, %c0_i32_0 : i32, i32, i32
  }
  func.func @transform_3(%arg0: i32) -> (i32, i32) {
    %c0_i32 = arith.constant 0 : i32
    %c0_i32_0 = arith.constant 0 : i32
    return %arg0, %c0_i32 : i32, i32
  }
  func.func @transform_4(%arg0: i32) -> (i32, i32, i32) {
    %c0_i32 = arith.constant 0 : i32
    %c0_i32_0 = arith.constant 0 : i32
    %c0_i32_1 = arith.constant 0 : i32
    return %c0_i32, %arg0, %c0_i32_0 : i32, i32, i32
  }
  func.func @transform_5(%arg0: i32) -> (i32, i32, i32) {
    %c0_i32 = arith.constant 0 : i32
    %c0_i32_0 = arith.constant 0 : i32
    %c0_i32_1 = arith.constant 0 : i32
    return %c0_i32, %arg0, %c0_i32_0 : i32, i32, i32
  }
  func.func @transform_6(%arg0: i32) -> (i32, i32) {
    %c0_i32 = arith.constant 0 : i32
    %c0_i32_0 = arith.constant 0 : i32
    return %arg0, %c0_i32 : i32, i32
  }
  func.func @transform_7(%arg0: i32) -> (i32, i32) {
    %c0_i32 = arith.constant 0 : i32
    %c0_i32_0 = arith.constant 0 : i32
    %c0_i32_1 = arith.constant 0 : i32
    return %c0_i32, %c0_i32_0 : i32, i32
  }
  func.func @transform_8(%arg0: i32) -> (i32, i32) {
    %c0_i32 = arith.constant 0 : i32
    %c0_i32_0 = arith.constant 0 : i32
    %c0_i32_1 = arith.constant 0 : i32
    return %c0_i32, %c0_i32_0 : i32, i32
  }
  func.func @transform_9(%arg0: i32) -> (i32, i32) {
    %c0_i32 = arith.constant 0 : i32
    %c0_i32_0 = arith.constant 0 : i32
    %c0_i32_1 = arith.constant 0 : i32
    return %c0_i32, %c0_i32_0 : i32, i32
  }
  func.func @transform_10(%arg0: i32) -> (i32, i32) {
    %c0_i32 = arith.constant 0 : i32
    %c0_i32_0 = arith.constant 0 : i32
    %c0_i32_1 = arith.constant 0 : i32
    return %c0_i32, %c0_i32_0 : i32, i32
  }
  func.func @transform_11(%arg0: i32) -> (i32, i32) {
    %c0_i32 = arith.constant 0 : i32
    %c0_i32_0 = arith.constant 0 : i32
    %c0_i32_1 = arith.constant 0 : i32
    return %c0_i32, %c0_i32_0 : i32, i32
  }
  func.func @transform_12(%arg0: i32) -> (i32, i32) {
    %c0_i32 = arith.constant 0 : i32
    %c0_i32_0 = arith.constant 0 : i32
    %c0_i32_1 = arith.constant 0 : i32
    return %c0_i32, %c0_i32_0 : i32, i32
  }
  func.func @transform_13(%arg0: i32) -> (i32, i32) {
    %c0_i32 = arith.constant 0 : i32
    %c0_i32_0 = arith.constant 0 : i32
    %c0_i32_1 = arith.constant 0 : i32
    return %c0_i32, %c0_i32_0 : i32, i32
  }
  func.func @transform_14(%arg0: i32) -> (i32, i32) {
    %c0_i32 = arith.constant 0 : i32
    %c0_i32_0 = arith.constant 0 : i32
    return %arg0, %c0_i32 : i32, i32
  }
  func.func @transform_15(%arg0: i32) -> (i32, i32, i32) {
    %c0_i32 = arith.constant 0 : i32
    %c0_i32_0 = arith.constant 0 : i32
    %c0_i32_1 = arith.constant 0 : i32
    return %c0_i32, %arg0, %c0_i32_0 : i32, i32, i32
  }
  func.func @transform_16(%arg0: i32) -> (i32, i32, i32) {
    %c0_i32 = arith.constant 0 : i32
    %c0_i32_0 = arith.constant 0 : i32
    %c0_i32_1 = arith.constant 0 : i32
    return %c0_i32, %arg0, %c0_i32_0 : i32, i32, i32
  }
}

</mosaic_0001>

<bundles_post_ra>
// kernel: tpu_custom_call.1
= control target key start
LH: loop header
LB: loop body
LE: loop exit
PB: predicated region body
PF: predicated region fallthrough
CT: control target
= control target key end

     0   :  { %s6490_s0 = inlined_call_operand.hbm [shape: bf16[16,256], index: 0, kind: input, shape index: {}]   ;;  %s6491_s1 = inlined_call_operand.hbm [shape: bf16[16,16,128], index: 1, kind: input, shape index: {}]   ;;  %s6492_s2 = inlined_call_operand.hbm [shape: bf16[16,16,128], index: 2, kind: input, shape index: {}]   ;;  %s6493_s3 = inlined_call_operand.hbm [shape: f32[16,16], index: 3, kind: input, shape index: {}]   ;;  %s6494_s4 = inlined_call_operand.hbm [shape: f32[2,16,128], index: 4, kind: input, shape index: {}]   ;;  %s6495_s5 = inlined_call_operand.hbm [shape: f32[2,16,128], index: 5, kind: input, shape index: {}]   ;;  %s6496_s6 = inlined_call_operand.vmem [shape: bf16[16,128], index: 6, kind: input, shape index: {}]   ;;  %s6497_s7 = inlined_call_operand.hbm [shape: bf16[512,512], index: 7, kind: input, shape index: {}]   ;;  %s6498_s8 = inlined_call_operand.vmem [shape: f32[1,512], index: 8, kind: input, shape index: {}]   ;;  %s6499_s9 = inlined_call_operand.hbm [shape: bf16[384,512], index: 9, kind: input, shape index: {}]   ;;  %s6500_s10 = inlined_call_operand.vmem [shape: f32[1,512], index: 10, kind: input, shape index: {}]   ;;  %s6501_s11 = inlined_call_operand.hbm [shape: bf16[128,128], index: 11, kind: input, shape index: {}]   ;;  %s6502_s12 = inlined_call_operand.vmem [shape: f32[1,128], index: 12, kind: input, shape index: {}]   ;;  %s6503_s13 = inlined_call_operand.vmem [shape: f32[1,128], index: 13, kind: input, shape index: {}]   ;;  %s6504_s14 = inlined_call_operand.hbm [shape: f32[16,128], index: 14, kind: output, shape index: {0}]   ;;  %s6505_s15 = inlined_call_operand.hbm [shape: f32[2,16,128], index: 15, kind: output, shape index: {1}]   ;;  %s6506_s16 = inlined_call_operand.hbm [shape: f32[2,16,128], index: 16, kind: output, shape index: {2}]  }
   0x1   :  { %6521 = sst [smem:[#allocation44_spill]] %s6490_s0 }
   0x2   :  { %6522 = sst [smem:[#allocation45_spill]] %s6504_s14 }
   0x3   :  { %22 = vsyncpa [#allocation3], 0 }
   0x4   :  { %23 = vsyncpa [#allocation6], 0 }
   0x5   :  { %24 = vsyncpa [#allocation9], 0 }
   0x6   :  { %25 = vsyncpa [#allocation12], 0 }
   0x7   :  { %26 = vsyncpa [#allocation15], 0 }
   0x8   :  { %27 = vsyncpa [#allocation4], 0 }
   0x9   :  { %28 = vsyncpa [#allocation19], 0  ;;  %s5411_s21 = smov [#allocation5]   ;;  %s5133_s25 = scalar_lea.hbm %s6491_s1, 2048 }
   0xa   :  { %s46_s22 = sshll.u32 %s5411_s21, 4  ;;  %p5134_p0 = scmp.ne.s32.totalorder %s6491_s1, %s5133_s25  ;;  %s47_s22 = int_to_ptr.vmem [resolvable:$true] %s46_s22 }
   0xb   :  { %p5137_p1 = scmp.lt.u32.totalorder %s5133_s25, %s6491_s1 }
   0xd   :  { %p5139_p2 = pnand %p5137_p1, %p5134_p0 }
   0xf   :  { %5142 = shalt.err (!%p5139_p2)
}
  0x10   :  { %s5143_s30 = scalar_lea.vmem %s47_s22, 2048  ;;  %p5148_p4 = scmp.lt.s32.totalorder %s47_s22, %s47_s22 }
  0x11   :  { %p5144_p3 = scmp.ne.s32.totalorder %s47_s22, %s5143_s30  ;;  %p5149_p5 = scmp.lt.s32.totalorder %s5143_s30, %s5143_s30 }
  0x13   :  { %p5150_p6 = por %p5149_p5, %p5148_p4 }
  0x15   :  { %p5151_p7 = pnand %p5150_p6, %p5144_p3 }
  0x17   :  { %5154 = shalt.err (!%p5151_p7)
}
  0x18   :  { %s5412_s0 = smov 64   ;;  %s5413_s17 = smov 4  }
  0x19   :  { %52 = dma.hbm_to_vmem [thread:$0]  %s6491_s1, 2048, %s47_s22, [#allocation6], %s5412_s0, %s5412_s0, %s5413_s17  }
  0x1a   :  { %s5414_s20 = smov [#allocation8]   ;;  %s5415_s23 = smov [#allocation11]  }
  0x1b   :  { %s70_s21 = sshll.u32 %s5414_s20, 4  ;;  %s94_s24 = sshll.u32 %s5415_s23, 4  ;;  %s71_s21 = int_to_ptr.vmem [resolvable:$true] %s70_s21  ;;  %s95_s24 = int_to_ptr.vmem [resolvable:$true] %s94_s24 }
  0x1c   :  { %s5155_s27 = scalar_lea.hbm %s6493_s3, 256 }
  0x1d   :  { %p5156_p8 = scmp.ne.s32.totalorder %s6493_s3, %s5155_s27  ;;  %p5159_p9 = scmp.lt.u32.totalorder %s5155_s27, %s6493_s3 }
  0x1f   :  { %p5161_p10 = pnand %p5159_p9, %p5156_p8 }
  0x21   :  { %5164 = shalt.err (!%p5161_p10)
}
  0x22   :  { %s5165_s1 = scalar_lea.vmem %s71_s21, 256  ;;  %p5170_p12 = scmp.lt.s32.totalorder %s71_s21, %s71_s21 }
  0x23   :  { %p5166_p11 = scmp.ne.s32.totalorder %s71_s21, %s5165_s1  ;;  %p5171_p13 = scmp.lt.s32.totalorder %s5165_s1, %s5165_s1 }
  0x25   :  { %p5172_p0 = por %p5171_p13, %p5170_p12 }
  0x27   :  { %p5173_p1 = pnand %p5172_p0, %p5166_p11 }
  0x29   :  { %5176 = shalt.err (!%p5173_p1)
}
  0x2a   :  { %s5416_s22 = smov 128   ;;  %s5417_s18 = smov 8  }
  0x2b   :  { %76 = dma.hbm_to_vmem [thread:$0]  %s6493_s3, 256, %s71_s21, [#allocation9], %s5416_s22, %s5416_s22, %s5417_s18  }
  0x2c   :  { %s5177_s25 = scalar_lea.hbm %s6495_s5, 512 }
  0x2d   :  { %p5178_p2 = scmp.ne.s32.totalorder %s6495_s5, %s5177_s25  ;;  %p5181_p3 = scmp.lt.u32.totalorder %s5177_s25, %s6495_s5 }
  0x2f   :  { %p5183_p4 = pnand %p5181_p3, %p5178_p2 }
  0x31   :  { %5186 = shalt.err (!%p5183_p4)
}
  0x32   :  { %s5187_s30 = scalar_lea.vmem %s95_s24, 512  ;;  %p5192_p6 = scmp.lt.s32.totalorder %s95_s24, %s95_s24 }
  0x33   :  { %p5188_p5 = scmp.ne.s32.totalorder %s95_s24, %s5187_s30  ;;  %p5193_p7 = scmp.lt.s32.totalorder %s5187_s30, %s5187_s30 }
  0x35   :  { %p5194_p8 = por %p5193_p7, %p5192_p6 }
  0x37   :  { %p5195_p9 = pnand %p5194_p8, %p5188_p5 }
  0x39   :  { %5198 = shalt.err (!%p5195_p9)
}
  0x3a   :  { %100 = dma.hbm_to_vmem [thread:$0]  %s6495_s5, 512, %s95_s24, [#allocation12], %s5416_s22, %s5416_s22, %s5417_s18  }
  0x3b   :  { %s5418_s1 = smov [#allocation14]   ;;  %s5419_s20 = smov [#allocation2]  }
  0x3c   :  { %s122_s19 = sshll.u32 %s5418_s1, 4  ;;  %s34_s14 = sshll.u32 %s5419_s20, 4  ;;  %s123_s19 = int_to_ptr.vmem [resolvable:$true] %s122_s19  ;;  %s35_s14 = int_to_ptr.vmem [resolvable:$true] %s34_s14 }
  0x3d   :  { %s5199_s26 = scalar_lea.hbm %s6499_s9, 12288 }
  0x3e   :  { %p5200_p10 = scmp.ne.s32.totalorder %s6499_s9, %s5199_s26  ;;  %p5203_p11 = scmp.lt.u32.totalorder %s5199_s26, %s6499_s9 }
  0x40   :  { %p5205_p12 = pnand %p5203_p11, %p5200_p10 }
  0x42   :  { %5208 = shalt.err (!%p5205_p12)
}
  0x43   :  { %s5209_s5 = scalar_lea.vmem %s123_s19, 12288  ;;  %p5214_p0 = scmp.lt.s32.totalorder %s123_s19, %s123_s19 }
  0x44   :  { %p5210_p13 = scmp.ne.s32.totalorder %s123_s19, %s5209_s5  ;;  %p5215_p1 = scmp.lt.s32.totalorder %s5209_s5, %s5209_s5 }
  0x46   :  { %p5216_p2 = por %p5215_p1, %p5214_p0 }
  0x48   :  { %p5217_p3 = pnand %p5216_p2, %p5210_p13 }
  0x4a   :  { %5220 = shalt.err (!%p5217_p3)
}
  0x4b   :  { %s6509_s24 = smov 256   ;;  %s5421_s3 = smov 16  }
  0x4c   :  { %128 = dma.hbm_to_vmem [thread:$0]  %s6499_s9, 12288, %s123_s19, [#allocation15], %s6509_s24, %s6509_s24, %s5421_s3  }
  0x4d   :  { %s6523_s25 = sld [smem:[#allocation44_spill]] }
  0x53   :  { %s5221_s26 = scalar_lea.hbm %s6523_s25, 256 }
  0x54   :  { %p5222_p4 = scmp.ne.s32.totalorder %s6523_s25, %s5221_s26  ;;  %p5225_p5 = scmp.lt.u32.totalorder %s5221_s26, %s6523_s25 }
  0x56   :  { %p5227_p6 = pnand %p5225_p5, %p5222_p4 }
  0x58   :  { %5230 = shalt.err (!%p5227_p6)
}
  0x59   :  { %s5231_s5 = scalar_lea.vmem %s35_s14, 256  ;;  %p5236_p8 = scmp.lt.s32.totalorder %s35_s14, %s35_s14 }
  0x5a   :  { %p5232_p7 = scmp.ne.s32.totalorder %s35_s14, %s5231_s5  ;;  %p5237_p9 = scmp.lt.s32.totalorder %s5231_s5, %s5231_s5 }
  0x5c   :  { %p5238_p10 = por %p5237_p9, %p5236_p8 }
  0x5e   :  { %p5239_p11 = pnand %p5238_p10, %p5232_p7 }
  0x60   :  { %5242 = shalt.err (!%p5239_p11)
}
  0x61   :  { %40 = dma.hbm_to_vmem [thread:$0]  %s6523_s25, 256, %s35_s14, [#allocation3], %s5416_s22, %s5416_s22, %s5417_s18  }
  0x62   :  { %s5422_s21 = smov [#allocation7]   ;;  %s5423_s20 = smov [#allocation10]  }
  0x63   :  { %s58_s1 = sshll.u32 %s5422_s21, 4  ;;  %s82_s23 = sshll.u32 %s5423_s20, 4  ;;  %s59_s1 = int_to_ptr.vmem [resolvable:$true] %s58_s1  ;;  %s83_s23 = int_to_ptr.vmem [resolvable:$true] %s82_s23 }
  0x64   :  { %s5243_s28 = scalar_lea.hbm %s6492_s2, 2048 }
  0x65   :  { %p5244_p12 = scmp.ne.s32.totalorder %s6492_s2, %s5243_s28  ;;  %p5247_p13 = scmp.lt.u32.totalorder %s5243_s28, %s6492_s2 }
  0x67   :  { %p5249_p0 = pnand %p5247_p13, %p5244_p12 }
  0x69   :  { %5252 = shalt.err (!%p5249_p0)
}
  0x6a   :  { %s5253_s14 = scalar_lea.vmem %s59_s1, 2048  ;;  %p5258_p2 = scmp.lt.s32.totalorder %s59_s1, %s59_s1 }
  0x6b   :  { %p5254_p1 = scmp.ne.s32.totalorder %s59_s1, %s5253_s14  ;;  %p5259_p3 = scmp.lt.s32.totalorder %s5253_s14, %s5253_s14 }
  0x6d   :  { %p5260_p4 = por %p5259_p3, %p5258_p2 }
  0x6f   :  { %p5261_p5 = pnand %p5260_p4, %p5254_p1 }
  0x71   :  { %5264 = shalt.err (!%p5261_p5)
}
  0x72   :  { %64 = dma.hbm_to_vmem [thread:$0]  %s6492_s2, 2048, %s59_s1, [#allocation6], %s5412_s0, %s5412_s0, %s5413_s17  }
  0x73   :  { %s5265_s21 = scalar_lea.hbm %s6494_s4, 512 }
  0x74   :  { %p5266_p6 = scmp.ne.s32.totalorder %s6494_s4, %s5265_s21  ;;  %p5269_p7 = scmp.lt.u32.totalorder %s5265_s21, %s6494_s4 }
  0x76   :  { %p5271_p8 = pnand %p5269_p7, %p5266_p6 }
  0x78   :  { %5274 = shalt.err (!%p5271_p8)
}
  0x79   :  { %s5275_s29 = scalar_lea.vmem %s83_s23, 512  ;;  %p5280_p10 = scmp.lt.s32.totalorder %s83_s23, %s83_s23 }
  0x7a   :  { %p5276_p9 = scmp.ne.s32.totalorder %s83_s23, %s5275_s29  ;;  %p5281_p11 = scmp.lt.s32.totalorder %s5275_s29, %s5275_s29 }
  0x7c   :  { %p5282_p12 = por %p5281_p11, %p5280_p10 }
  0x7e   :  { %p5283_p13 = pnand %p5282_p12, %p5276_p9 }
  0x80   :  { %5286 = shalt.err (!%p5283_p13)
}
  0x81   :  { %88 = dma.hbm_to_vmem [thread:$0]  %s6494_s4, 512, %s83_s23, [#allocation9], %s5416_s22, %s5416_s22, %s5417_s18  }
  0x82   :  { %s5424_s30 = smov [#allocation13]   ;;  %s5425_s14 = smov [#allocation16]  }
  0x83   :  { %s108_s5 = sshll.u32 %s5424_s30, 4  ;;  %s136_s25 = sshll.u32 %s5425_s14, 4  ;;  %s109_s5 = int_to_ptr.vmem [resolvable:$true] %s108_s5  ;;  %s137_s25 = int_to_ptr.vmem [resolvable:$true] %s136_s25 }
  0x84   :  { %s5287_s24 = scalar_lea.hbm %s6497_s7, 16384 }
  0x85   :  { %p5288_p0 = scmp.ne.s32.totalorder %s6497_s7, %s5287_s24  ;;  %p5291_p1 = scmp.lt.u32.totalorder %s5287_s24, %s6497_s7 }
  0x87   :  { %p5293_p2 = pnand %p5291_p1, %p5288_p0 }
  0x89   :  { %5296 = shalt.err (!%p5293_p2)
}
  0x8a   :  { %s5297_s4 = scalar_lea.vmem %s109_s5, 16384  ;;  %p5302_p4 = scmp.lt.s32.totalorder %s109_s5, %s109_s5 }
  0x8b   :  { %p5298_p3 = scmp.ne.s32.totalorder %s109_s5, %s5297_s4  ;;  %p5303_p5 = scmp.lt.s32.totalorder %s5297_s4, %s5297_s4 }
  0x8d   :  { %p5304_p6 = por %p5303_p5, %p5302_p4 }
  0x8f   :  { %p5305_p7 = pnand %p5304_p6, %p5298_p3 }
  0x91   :  { %5308 = shalt.err (!%p5305_p7)
}
  0x92   :  { %s6524_s23 = smov 256   ;;  %s5309_s30 = scalar_lea.hbm %s6501_s11, 1024 }
  0x93   :  { %114 = dma.hbm_to_vmem [thread:$0]  %s6497_s7, 16384, %s109_s5, [#allocation12], %s6524_s23, %s6524_s23, %s5421_s3  }
  0x94   :  { %p5310_p8 = scmp.ne.s32.totalorder %s6501_s11, %s5309_s30  ;;  %p5313_p9 = scmp.lt.u32.totalorder %s5309_s30, %s6501_s11 }
  0x96   :  { %p5315_p10 = pnand %p5313_p9, %p5310_p8 }
  0x98   :  { %5318 = shalt.err (!%p5315_p10)
}
  0x99   :  { %s5319_s21 = scalar_lea.vmem %s137_s25, 1024  ;;  %p5324_p12 = scmp.lt.s32.totalorder %s137_s25, %s137_s25 }
  0x9a   :  { %p5320_p11 = scmp.ne.s32.totalorder %s137_s25, %s5319_s21  ;;  %p5325_p13 = scmp.lt.s32.totalorder %s5319_s21, %s5319_s21 }
  0x9c   :  { %p5326_p0 = por %p5325_p13, %p5324_p12 }
  0x9e   :  { %p5327_p1 = pnand %p5326_p0, %p5320_p11 }
  0xa0   :  { %5330 = shalt.err (!%p5327_p1)
}
  0xa1   :  { %142 = dma.hbm_to_vmem [thread:$0]  %s6501_s11, 1024, %s137_s25, [#allocation15], %s5412_s0, %s5412_s0, %s5413_s17  }
  0xa2   :  { %5397 = dma.done.wait [#allocation3], 256  }
  0xa3   :  { %5398 = vsyncadd [#allocation3], 4294967040 }
  0xa4   :  { %5399 = dma.done.wait [#allocation6], 4096  }
  0xa5   :  { %5400 = vsyncadd [#allocation6], 4294963200 }
  0xa6   :  { %5401 = dma.done.wait [#allocation9], 768  }
  0xa7   :  { %5402 = vsyncadd [#allocation9], 4294966528 }
  0xa8   :  { %5403 = dma.done.wait [#allocation12], 16896  }
  0xa9   :  { %5404 = vsyncadd [#allocation12], 4294950400 }
  0xaa   :  { %5405 = dma.done.wait [#allocation15], 13312  }
  0xab   :  { %5406 = vsyncadd [#allocation15], 4294953984  ;;  %v4590_v0 = vld [vmem:[#allocation13 + $0x4] ss:$16 sps:$4 sm:$0xff]   ;;  %v4592_v1 = vld [vmem:[#allocation13 + $0xc] ss:$16 sps:$4 sm:$0xff]  }
  0xac   :  { %986 = vmatprep.subr.bf16.mxu0 %v4590_v0  ;;  %v4594_v2 = vld [vmem:[#allocation13] ss:$16 sps:$4 sm:$0xff]   ;;  %v4595_v3 = vld [vmem:[#allocation13 + $0x8] ss:$16 sps:$4 sm:$0xff]   ;;  %1072 = vmatprep.subr.bf16.mxu1 %v4592_v1  ;;  %v4596_v4 = vld [vmem:[#allocation13 + $0x24] ss:$16 sps:$4 sm:$0xff]  }
  0xad   :  { %987 = vmatpush1.bf16.msra.mxu0 %v4594_v2  ;;  %1073 = vmatpush1.bf16.msra.mxu1 %v4595_v3  ;;  %v4598_v5 = vld [vmem:[#allocation13 + $0x2c] ss:$16 sps:$4 sm:$0xff]   ;;  %v4600_v6 = vld [vmem:[#allocation13 + $0x20] ss:$16 sps:$4 sm:$0xff]   ;;  %v4601_v7 = vld [vmem:[#allocation13 + $0x28] ss:$16 sps:$4 sm:$0xff]  }
  0xae   :  { %988 = vmatprep.subr.bf16.mxu0 %v4596_v4  ;;  %1074 = vmatprep.subr.bf16.mxu1 %v4598_v5  ;;  %v4602_v8 = vld [vmem:[#allocation13 + $0x44] ss:$16 sps:$4 sm:$0xff]   ;;  %v4604_v9 = vld [vmem:[#allocation13 + $0x4c] ss:$16 sps:$4 sm:$0xff]   ;;  %v4606_v10 = vld [vmem:[#allocation13 + $0x40] ss:$16 sps:$4 sm:$0xff]  }
  0xaf   :  { %v4607_v11 = vld [vmem:[#allocation13 + $0x48] ss:$16 sps:$4 sm:$0xff]   ;;  %v4608_v12 = vld [vmem:[#allocation13 + $0x64] ss:$16 sps:$4 sm:$0xff]   ;;  %v4610_v13 = vld [vmem:[#allocation13 + $0x6c] ss:$16 sps:$4 sm:$0xff]  }
  0xb0   :  { %v4612_v14 = vld [vmem:[#allocation13 + $0x60] ss:$16 sps:$4 sm:$0xff]   ;;  %v4613_v15 = vld [vmem:[#allocation13 + $0x68] ss:$16 sps:$4 sm:$0xff]   ;;  %v4614_v16 = vld [vmem:[#allocation13 + $0x84] ss:$16 sps:$4 sm:$0xff]  }
  0xb1   :  { %989 = vmatpush1.bf16.msra.mxu0 %v4600_v6  ;;  %1075 = vmatpush1.bf16.msra.mxu1 %v4601_v7  ;;  %v4616_v17 = vld [vmem:[#allocation13 + $0x8c] ss:$16 sps:$4 sm:$0xff]   ;;  %v4618_v18 = vld [vmem:[#allocation13 + $0x80] ss:$16 sps:$4 sm:$0xff]   ;;  %v4619_v19 = vld [vmem:[#allocation13 + $0x88] ss:$16 sps:$4 sm:$0xff]  }
  0xb2   :  { %990 = vmatprep.subr.bf16.mxu0 %v4602_v8  ;;  %1076 = vmatprep.subr.bf16.mxu1 %v4604_v9  ;;  %v4620_v20 = vld [vmem:[#allocation13 + $0xa4] ss:$16 sps:$4 sm:$0xff]   ;;  %v4622_v21 = vld [vmem:[#allocation13 + $0xac] ss:$16 sps:$4 sm:$0xff]   ;;  %v4624_v22 = vld [vmem:[#allocation13 + $0xa0] ss:$16 sps:$4 sm:$0xff]  }
  0xb3   :  { %v4625_v23 = vld [vmem:[#allocation13 + $0xa8] ss:$16 sps:$4 sm:$0xff]   ;;  %v4626_v24 = vld [vmem:[#allocation13 + $0xc4] ss:$16 sps:$4 sm:$0xff]   ;;  %v4628_v25 = vld [vmem:[#allocation13 + $0xcc] ss:$16 sps:$4 sm:$0xff]  }
  0xb4   :  { %v4630_v26 = vld [vmem:[#allocation13 + $0xc0] ss:$16 sps:$4 sm:$0xff]   ;;  %v4631_v27 = vld [vmem:[#allocation13 + $0xc8] ss:$16 sps:$4 sm:$0xff]   ;;  %v4632_v28 = vld [vmem:[#allocation13 + $0xe4] ss:$16 sps:$4 sm:$0xff]  }
  0xb5   :  { %991 = vmatpush1.bf16.msra.mxu0 %v4606_v10  ;;  %1077 = vmatpush1.bf16.msra.mxu1 %v4607_v11  ;;  %v4634_v29 = vld [vmem:[#allocation13 + $0xec] ss:$16 sps:$4 sm:$0xff]   ;;  %v4636_v30 = vld [vmem:[#allocation13 + $0xe0] ss:$16 sps:$4 sm:$0xff]   ;;  %v4637_v31 = vld [vmem:[#allocation13 + $0xe8] ss:$16 sps:$4 sm:$0xff]  }
  0xb6   :  { %992 = vmatprep.subr.bf16.mxu0 %v4608_v12  ;;  %1078 = vmatprep.subr.bf16.mxu1 %v4610_v13  ;;  %v4638_v32 = vld [vmem:[#allocation13 + $0x104] ss:$16 sps:$4 sm:$0xff]   ;;  %v4640_v33 = vld [vmem:[#allocation13 + $0x10c] ss:$16 sps:$4 sm:$0xff]   ;;  %v4642_v34 = vld [vmem:[#allocation13 + $0x100] ss:$16 sps:$4 sm:$0xff]  }
  0xb7   :  { %v4643_v35 = vld [vmem:[#allocation13 + $0x108] ss:$16 sps:$4 sm:$0xff]   ;;  %v4644_v36 = vld [vmem:[#allocation13 + $0x124] ss:$16 sps:$4 sm:$0xff]   ;;  %v4646_v37 = vld [vmem:[#allocation13 + $0x12c] ss:$16 sps:$4 sm:$0xff]  }
  0xb8   :  { %v4648_v38 = vld [vmem:[#allocation13 + $0x120] ss:$16 sps:$4 sm:$0xff]   ;;  %v4649_v39 = vld [vmem:[#allocation13 + $0x128] ss:$16 sps:$4 sm:$0xff]   ;;  %v4650_v40 = vld [vmem:[#allocation13 + $0x144] ss:$16 sps:$4 sm:$0xff]  }
  0xb9   :  { %993 = vmatpush1.bf16.msra.mxu0 %v4612_v14  ;;  %1079 = vmatpush1.bf16.msra.mxu1 %v4613_v15  ;;  %v4652_v41 = vld [vmem:[#allocation13 + $0x14c] ss:$16 sps:$4 sm:$0xff]   ;;  %v4654_v42 = vld [vmem:[#allocation13 + $0x140] ss:$16 sps:$4 sm:$0xff]   ;;  %v4655_v43 = vld [vmem:[#allocation13 + $0x148] ss:$16 sps:$4 sm:$0xff]  }
  0xba   :  { %994 = vmatprep.subr.bf16.mxu0 %v4614_v16  ;;  %1080 = vmatprep.subr.bf16.mxu1 %v4616_v17  ;;  %v4656_v44 = vld [vmem:[#allocation13 + $0x164] ss:$16 sps:$4 sm:$0xff]   ;;  %v4658_v45 = vld [vmem:[#allocation13 + $0x16c] ss:$16 sps:$4 sm:$0xff]   ;;  %v4660_v46 = vld [vmem:[#allocation13 + $0x160] ss:$16 sps:$4 sm:$0xff]  }
  0xbb   :  { %v4661_v47 = vld [vmem:[#allocation13 + $0x168] ss:$16 sps:$4 sm:$0xff]   ;;  %v4662_v49 = vld [vmem:[#allocation13 + $0x184] ss:$16 sps:$4 sm:$0xff]   ;;  %v4664_v50 = vld [vmem:[#allocation13 + $0x18c] ss:$16 sps:$4 sm:$0xff]  }
  0xbc   :  { %v4686_v48 = vld [vmem:[#allocation2] ss:$8 sps:$4 sm:$0xff]   ;;  %v4668_v53 = vld [vmem:[#allocation13 + $0x1a4] ss:$16 sps:$4 sm:$0xff]   ;;  %v4670_v54 = vld [vmem:[#allocation13 + $0x1ac] ss:$16 sps:$4 sm:$0xff]  }
  0xbd   :  { %995 = vmatpush1.bf16.msra.mxu0 %v4618_v18  ;;  %1081 = vmatpush1.bf16.msra.mxu1 %v4619_v19  ;;  %v4666_v51 = vld [vmem:[#allocation13 + $0x180] ss:$16 sps:$4 sm:$0xff]   ;;  %v4667_v52 = vld [vmem:[#allocation13 + $0x188] ss:$16 sps:$4 sm:$0xff]   ;;  %v4674_v57 = vld [vmem:[#allocation13 + $0x1c4] ss:$16 sps:$4 sm:$0xff]  }
  0xbe   :  { %996 = vmatprep.subr.bf16.mxu0 %v4620_v20  ;;  %1082 = vmatprep.subr.bf16.mxu1 %v4622_v21  ;;  %v4672_v55 = vld [vmem:[#allocation13 + $0x1a0] ss:$16 sps:$4 sm:$0xff]   ;;  %v4673_v56 = vld [vmem:[#allocation13 + $0x1a8] ss:$16 sps:$4 sm:$0xff]   ;;  %v4676_v58 = vld [vmem:[#allocation13 + $0x1cc] ss:$16 sps:$4 sm:$0xff]  }
  0xbf   :  { %1018 = vmatprep.mubr.bf16.mxu0 %v4686_v48  ;;  %1104 = vmatprep.mubr.bf16.mxu1 %v4686_v48  ;;  %v4678_v59 = vld [vmem:[#allocation13 + $0x1c0] ss:$16 sps:$4 sm:$0xff]   ;;  %v4679_v60 = vld [vmem:[#allocation13 + $0x1c8] ss:$16 sps:$4 sm:$0xff]   ;;  %v4680_v61 = vld [vmem:[#allocation13 + $0x1e4] ss:$16 sps:$4 sm:$0xff]  }
  0xc0   :  { %v4682_v62 = vld [vmem:[#allocation13 + $0x1ec] ss:$16 sps:$4 sm:$0xff]   ;;  %v4684_v63 = vld [vmem:[#allocation13 + $0x1e0] ss:$16 sps:$4 sm:$0xff]   ;;  %v4685_v0 = vld [vmem:[#allocation13 + $0x1e8] ss:$16 sps:$4 sm:$0xff]  }
  0xc1   :  { %997 = vmatpush1.bf16.msra.mxu0 %v4624_v22  ;;  %1083 = vmatpush1.bf16.msra.mxu1 %v4625_v23  ;;  %v176_v1 = vld [vmem:[#allocation10 + $0x10] sm:$0xff]  ;;  %v177_v2 = vld [vmem:[#allocation10 + $0x18] sm:$0xff]  ;;  %vm5427_vm0 = vmmov 0   ;;  %vm1773_vm1 = vcmask 130112   ;;  %vm1910_vm2 = vcmask 1041409   ;;  %vm1912_vm3 = vcmask 1042434  }
  0xc2   :  { %998 = vmatprep.subr.bf16.mxu0 %v4626_v24  ;;  %1084 = vmatprep.subr.bf16.mxu1 %v4628_v25  ;;  %v4691_v3 = vld [vmem:[#allocation13 + $0x204] ss:$16 sps:$4 sm:$0xff]   ;;  %v4694_v4 = vld [vmem:[#allocation13 + $0x20c] ss:$16 sps:$4 sm:$0xff]   ;;  %v5653_v5 = vpack.c.bf16 %v177_v2, %v176_v1  ;;  %v4689_v6 = vld [vmem:[#allocation13 + $0x200] ss:$16 sps:$4 sm:$0xff]  }
  0xc3   :  { %v4692_v7 = vld [vmem:[#allocation13 + $0x208] ss:$16 sps:$4 sm:$0xff]   ;;  %v4697_v8 = vld [vmem:[#allocation13 + $0x224] ss:$16 sps:$4 sm:$0xff]   ;;  %v4700_v9 = vld [vmem:[#allocation13 + $0x22c] ss:$16 sps:$4 sm:$0xff]  }
  0xc4   :  { %6525 = vst [vmem:[#allocation28_spill] sm:$0xff] %v5653_v5  ;;  %v4695_v10 = vld [vmem:[#allocation13 + $0x220] ss:$16 sps:$4 sm:$0xff]   ;;  %v4698_v11 = vld [vmem:[#allocation13 + $0x228] ss:$16 sps:$4 sm:$0xff]   ;;  %vm1914_vm4 = vcmask 1043459  }
  0xc5   :  { %999 = vmatpush1.bf16.msra.mxu0 %v4630_v26  ;;  %1085 = vmatpush1.bf16.msra.mxu1 %v4631_v27  ;;  %v4703_v12 = vld [vmem:[#allocation13 + $0x244] ss:$16 sps:$4 sm:$0xff]   ;;  %v4706_v13 = vld [vmem:[#allocation13 + $0x24c] ss:$16 sps:$4 sm:$0xff]   ;;  %v4701_v14 = vld [vmem:[#allocation13 + $0x240] ss:$16 sps:$4 sm:$0xff]  }
  0xc6   :  { %1000 = vmatprep.subr.bf16.mxu0 %v4632_v28  ;;  %1086 = vmatprep.subr.bf16.mxu1 %v4634_v29  ;;  %v4704_v15 = vld [vmem:[#allocation13 + $0x248] ss:$16 sps:$4 sm:$0xff]   ;;  %v4709_v16 = vld [vmem:[#allocation13 + $0x264] ss:$16 sps:$4 sm:$0xff]   ;;  %v4712_v17 = vld [vmem:[#allocation13 + $0x26c] ss:$16 sps:$4 sm:$0xff]  }
  0xc7   :  { %v4707_v18 = vld [vmem:[#allocation13 + $0x260] ss:$16 sps:$4 sm:$0xff]   ;;  %v4710_v19 = vld [vmem:[#allocation13 + $0x268] ss:$16 sps:$4 sm:$0xff]   ;;  %v4715_v20 = vld [vmem:[#allocation13 + $0x284] ss:$16 sps:$4 sm:$0xff]  }
  0xc8   :  { %v4718_v21 = vld [vmem:[#allocation13 + $0x28c] ss:$16 sps:$4 sm:$0xff]   ;;  %v4713_v22 = vld [vmem:[#allocation13 + $0x280] ss:$16 sps:$4 sm:$0xff]   ;;  %v4716_v23 = vld [vmem:[#allocation13 + $0x288] ss:$16 sps:$4 sm:$0xff]  }
  0xc9   :  { %1001 = vmatpush1.bf16.msra.mxu0 %v4636_v30  ;;  %1087 = vmatpush1.bf16.msra.mxu1 %v4637_v31  ;;  %v4721_v24 = vld [vmem:[#allocation13 + $0x2a4] ss:$16 sps:$4 sm:$0xff]   ;;  %v4724_v25 = vld [vmem:[#allocation13 + $0x2ac] ss:$16 sps:$4 sm:$0xff]   ;;  %v4719_v26 = vld [vmem:[#allocation13 + $0x2a0] ss:$16 sps:$4 sm:$0xff]  }
  0xca   :  { %1002 = vmatprep.subr.bf16.mxu0 %v4638_v32  ;;  %1088 = vmatprep.subr.bf16.mxu1 %v4640_v33  ;;  %v4722_v27 = vld [vmem:[#allocation13 + $0x2a8] ss:$16 sps:$4 sm:$0xff]   ;;  %v4727_v28 = vld [vmem:[#allocation13 + $0x2c4] ss:$16 sps:$4 sm:$0xff]   ;;  %v4730_v29 = vld [vmem:[#allocation13 + $0x2cc] ss:$16 sps:$4 sm:$0xff]  }
  0xcb   :  { %v4725_v30 = vld [vmem:[#allocation13 + $0x2c0] ss:$16 sps:$4 sm:$0xff]   ;;  %v4728_v31 = vld [vmem:[#allocation13 + $0x2c8] ss:$16 sps:$4 sm:$0xff]   ;;  %v4733_v32 = vld [vmem:[#allocation13 + $0x2e4] ss:$16 sps:$4 sm:$0xff]  }
  0xcc   :  { %v178_v33 = vld [vmem:[#allocation10] sm:$0xff]  ;;  %v4754_v48 = vld [vmem:[#allocation13 + $0x34c] ss:$16 sps:$4 sm:$0xff]   ;;  %v4776_v2 = vld [vmem:[#allocation13 + $0x3c8] ss:$16 sps:$4 sm:$0xff]   ;;  %vm1916_vm5 = vcmask 1044484  }
  0xcd   :  { %1003 = vmatpush1.bf16.msra.mxu0 %v4642_v34  ;;  %1089 = vmatpush1.bf16.msra.mxu1 %v4643_v35  ;;  %v179_v34 = vld [vmem:[#allocation10 + $0x8] sm:$0xff]  ;;  %v4773_v1 = vld [vmem:[#allocation13 + $0x3c0] ss:$16 sps:$4 sm:$0xff]   ;;  %vm1918_vm6 = vcmask 1045509   ;;  %vm1920_vm7 = vcmask 1046534   ;;  %vm1922_vm8 = vcmask 1047559  }
  0xce   :  { %1004 = vmatprep.subr.bf16.mxu0 %v4644_v36  ;;  %1090 = vmatprep.subr.bf16.mxu1 %v4646_v37  ;;  %v4736_v35 = vld [vmem:[#allocation13 + $0x2ec] ss:$16 sps:$4 sm:$0xff]   ;;  %v185_v36 = vpack.c.bf16 %v179_v34, %v178_v33  ;;  %v4731_v37 = vld [vmem:[#allocation13 + $0x2e0] ss:$16 sps:$4 sm:$0xff]   ;;  %vm1933_vm9 = vcmask 130048   ;;  %s5430_s26 = smov [#allocation18]  }
  0xcf   :  { %v324_v33 = vld [vmem:[%s6498_s8] sm:$0xf]  ;;  %s4060_s27 = sshll.u32 %s5430_s26, 4  ;;  %s5431_s4 = smov [#allocation20]   ;;  %s4061_s27 = int_to_ptr.vmem [resolvable:$true] %s4060_s27 }
  0xd0   :  { %s4072_s23 = sshll.u32 %s5431_s4, 4  ;;  %s5432_s28 = smov [#allocation17]   ;;  %s6431_s23 = int_to_ptr.vmem [resolvable:$true] %s4072_s23 }
  0xd1   :  { %1005 = vmatpush1.bf16.msra.mxu0 %v4648_v38  ;;  %1091 = vmatpush1.bf16.msra.mxu1 %v4649_v39  ;;  %v4734_v38 = vld [vmem:[#allocation13 + $0x2e8] ss:$16 sps:$4 sm:$0xff]   ;;  %v4739_v39 = vld [vmem:[#allocation13 + $0x304] ss:$16 sps:$4 sm:$0xff]   ;;  %s4048_s29 = sshll.u32 %s5432_s28, 4  ;;  %p5336_p3 = scmp.lt.s32.totalorder %s4061_s27, %s4061_s27  ;;  %s6433_s29 = int_to_ptr.vmem [resolvable:$true] %s4048_s29 }
  0xd2   :  { %1006 = vmatprep.subr.bf16.mxu0 %v4650_v40  ;;  %1092 = vmatprep.subr.bf16.mxu1 %v4652_v41  ;;  %v4742_v40 = vld [vmem:[#allocation13 + $0x30c] ss:$16 sps:$4 sm:$0xff]   ;;  %v4737_v41 = vld [vmem:[#allocation13 + $0x300] ss:$16 sps:$4 sm:$0xff]  }
  0xd5   :  { %1007 = vmatpush1.bf16.msra.mxu0 %v4654_v42  ;;  %1093 = vmatpush1.bf16.msra.mxu1 %v4655_v43  ;;  %v4740_v42 = vld [vmem:[#allocation13 + $0x308] ss:$16 sps:$4 sm:$0xff]   ;;  %v4745_v43 = vld [vmem:[#allocation13 + $0x324] ss:$16 sps:$4 sm:$0xff]  }
  0xd6   :  { %1008 = vmatprep.subr.bf16.mxu0 %v4656_v44  ;;  %1094 = vmatprep.subr.bf16.mxu1 %v4658_v45  ;;  %v4748_v44 = vld [vmem:[#allocation13 + $0x32c] ss:$16 sps:$4 sm:$0xff]   ;;  %v4743_v45 = vld [vmem:[#allocation13 + $0x320] ss:$16 sps:$4 sm:$0xff]  }
  0xd9   :  { %1009 = vmatpush1.bf16.msra.mxu0 %v4660_v46  ;;  %1095 = vmatpush1.bf16.msra.mxu1 %v4661_v47  ;;  %v4746_v46 = vld [vmem:[#allocation13 + $0x328] ss:$16 sps:$4 sm:$0xff]   ;;  %v4751_v47 = vld [vmem:[#allocation13 + $0x344] ss:$16 sps:$4 sm:$0xff]  }
  0xda   :  { %1010 = vmatprep.subr.bf16.mxu0 %v4662_v49  ;;  %1096 = vmatprep.subr.bf16.mxu1 %v4664_v50  ;;  %v4749_v49 = vld [vmem:[#allocation13 + $0x340] ss:$16 sps:$4 sm:$0xff]   ;;  %v4752_v50 = vld [vmem:[#allocation13 + $0x348] ss:$16 sps:$4 sm:$0xff]  }
  0xdd   :  { %1011 = vmatpush1.bf16.msra.mxu0 %v4666_v51  ;;  %1097 = vmatpush1.bf16.msra.mxu1 %v4667_v52  ;;  %v4757_v51 = vld [vmem:[#allocation13 + $0x364] ss:$16 sps:$4 sm:$0xff]   ;;  %v4760_v52 = vld [vmem:[#allocation13 + $0x36c] ss:$16 sps:$4 sm:$0xff]  }
  0xde   :  { %1012 = vmatprep.subr.bf16.mxu0 %v4668_v53  ;;  %1098 = vmatprep.subr.bf16.mxu1 %v4670_v54  ;;  %v4755_v53 = vld [vmem:[#allocation13 + $0x360] ss:$16 sps:$4 sm:$0xff]   ;;  %v4758_v54 = vld [vmem:[#allocation13 + $0x368] ss:$16 sps:$4 sm:$0xff]  }
  0xe1   :  { %1013 = vmatpush1.bf16.msra.mxu0 %v4672_v55  ;;  %1099 = vmatpush1.bf16.msra.mxu1 %v4673_v56  ;;  %v4763_v55 = vld [vmem:[#allocation13 + $0x384] ss:$16 sps:$4 sm:$0xff]   ;;  %v4766_v56 = vld [vmem:[#allocation13 + $0x38c] ss:$16 sps:$4 sm:$0xff]  }
  0xe2   :  { %1014 = vmatprep.subr.bf16.mxu0 %v4674_v57  ;;  %1100 = vmatprep.subr.bf16.mxu1 %v4676_v58  ;;  %v4761_v57 = vld [vmem:[#allocation13 + $0x380] ss:$16 sps:$4 sm:$0xff]   ;;  %v4764_v58 = vld [vmem:[#allocation13 + $0x388] ss:$16 sps:$4 sm:$0xff]  }
  0xe5   :  { %1015 = vmatpush1.bf16.msra.mxu0 %v4678_v59  ;;  %1101 = vmatpush1.bf16.msra.mxu1 %v4679_v60  ;;  %v4769_v59 = vld [vmem:[#allocation13 + $0x3a4] ss:$16 sps:$4 sm:$0xff]   ;;  %v4772_v60 = vld [vmem:[#allocation13 + $0x3ac] ss:$16 sps:$4 sm:$0xff]  }
  0xe6   :  { %1016 = vmatprep.subr.bf16.mxu0 %v4680_v61  ;;  %1102 = vmatprep.subr.bf16.mxu1 %v4682_v62  ;;  %v4767_v61 = vld [vmem:[#allocation13 + $0x3a0] ss:$16 sps:$4 sm:$0xff]   ;;  %v4770_v62 = vld [vmem:[#allocation13 + $0x3a8] ss:$16 sps:$4 sm:$0xff]  }
  0xe9   :  { %1017 = vmatpush1.bf16.msra.mxu0 %v4684_v63  ;;  %1103 = vmatpush1.bf16.msra.mxu1 %v4685_v0  ;;  %v4775_v63 = vld [vmem:[#allocation13 + $0x3c4] ss:$16 sps:$4 sm:$0xff]   ;;  %v4778_v0 = vld [vmem:[#allocation13 + $0x3cc] ss:$16 sps:$4 sm:$0xff]  }
  0xea   :  { %1029 = vmatprep.subr.bf16.mxu0 %v4691_v3  ;;  %1115 = vmatprep.subr.bf16.mxu1 %v4694_v4  ;;  %v4781_v3 = vld [vmem:[#allocation13 + $0x3e4] ss:$16 sps:$4 sm:$0xff]   ;;  %v4784_v4 = vld [vmem:[#allocation13 + $0x3ec] ss:$16 sps:$4 sm:$0xff]  }
  0xec   :  { %1019 = vmatmul.mubr.bf16.vlgmr.msra.gmra.mrb[0].mxu0 %v5653_v5  ;;  %1105 = vmatmul.mubr.bf16.vlgmr.msra.gmra.mrb[0].mxu1 %v5653_v5 }
  0xed   :  { %1030 = vmatpush1.bf16.msra.mxu0 %v4689_v6  ;;  %1116 = vmatpush1.bf16.msra.mxu1 %v4692_v7  ;;  %v4779_v6 = vld [vmem:[#allocation13 + $0x3e0] ss:$16 sps:$4 sm:$0xff]   ;;  %v4782_v7 = vld [vmem:[#allocation13 + $0x3e8] ss:$16 sps:$4 sm:$0xff]  }
  0xee   :  { %1031 = vmatprep.subr.bf16.mxu0 %v4697_v8  ;;  %1117 = vmatprep.subr.bf16.mxu1 %v4700_v9  ;;  %v4688_v8 = vld [vmem:[#allocation2 + $0x4] ss:$8 sps:$4 sm:$0xff]  }
  0xef   :  { %1061 = vmatprep.mubr.bf16.mxu0 %v185_v36  ;;  %1147 = vmatprep.mubr.bf16.mxu1 %v185_v36  ;;  %v4785_v9 = vld [vmem:[#allocation16] sm:$0xff]  }
  0xf1   :  { %1032 = vmatpush1.bf16.msra.mxu0 %v4695_v10  ;;  %1118 = vmatpush1.bf16.msra.mxu1 %v4698_v11  ;;  %v5426_v10 = vmov 0.0   ;;  %v4786_v11 = vld [vmem:[#allocation16 + $0x8] sm:$0xff]  }
  0xf2   :  { %1033 = vmatprep.subr.bf16.mxu0 %v4703_v12  ;;  %1119 = vmatprep.subr.bf16.mxu1 %v4706_v13  ;;  %v4787_v12 = vld [vmem:[#allocation16 + $0x10] sm:$0xff]   ;;  %v4788_v13 = vld [vmem:[#allocation16 + $0x18] sm:$0xff]  }
  0xf5   :  { %1034 = vmatpush1.bf16.msra.mxu0 %v4701_v14  ;;  %1120 = vmatpush1.bf16.msra.mxu1 %v4704_v15  ;;  %v4789_v14 = vld [vmem:[#allocation16 + $0x20] sm:$0xff]   ;;  %v4790_v15 = vld [vmem:[#allocation16 + $0x28] sm:$0xff]  }
  0xf6   :  { %1035 = vmatprep.subr.bf16.mxu0 %v4709_v16  ;;  %1121 = vmatprep.subr.bf16.mxu1 %v4712_v17  ;;  %v4791_v16 = vld [vmem:[#allocation16 + $0x30] sm:$0xff]   ;;  %v326_v17 = vlaneseq }
  0xf9   :  { %1036 = vmatpush1.bf16.msra.mxu0 %v4707_v18  ;;  %1122 = vmatpush1.bf16.msra.mxu1 %v4710_v19  ;;  %v4792_v18 = vld [vmem:[#allocation16 + $0x38] sm:$0xff]   ;;  %v5658_v19 = vshrl.u32 %v326_v17, 7 }
  0xfa   :  { %1037 = vmatprep.subr.bf16.mxu0 %v4715_v20  ;;  %1123 = vmatprep.subr.bf16.mxu1 %v4718_v21  ;;  %v5663_v21 = vld [vmem:[#allocation8] sm:$0xff] }
  0xfb   :  { %v5661_v20 = vsub.s32 0, %v5658_v19 }
  0xfd   :  { %1038 = vmatpush1.bf16.msra.mxu0 %v4713_v22  ;;  %1124 = vmatpush1.bf16.msra.mxu1 %v4716_v23  ;;  %v5666_v22 = vsub.s32 1, %v5658_v19  ;;  %v2125_v23 = vrot.slane %v5663_v21, %v5661_v20  ;;  %v329_v34 = vrot.slane %v324_v33, %v5661_v20 }
  0xfe   :  { %1039 = vmatprep.subr.bf16.mxu0 %v4721_v24  ;;  %1125 = vmatprep.subr.bf16.mxu1 %v4724_v25  ;;  %v5670_v24 = vld [vmem:[#allocation8 + $0x8] sm:$0xff] }
  0xff   :  { %2131 = vbcast.lane.b32.xlu1 %v2125_v23, 264  ;;  %v2136_v25 = vrot.slane %v5663_v21, %v5666_v22  ;;  %2127 = vbcast.lane.b32.xlu0 %v2125_v23, 256 }
 0x101   :  { %1040 = vmatpush1.bf16.msra.mxu0 %v4719_v26  ;;  %1126 = vmatpush1.bf16.msra.mxu1 %v4722_v27  ;;  %v2213_v26 = vrot.slane %v5670_v24, %v5661_v20  ;;  %v2224_v27 = vrot.slane %v5670_v24, %v5666_v22 }
 0x102   :  { %1041 = vmatprep.subr.bf16.mxu0 %v4727_v28  ;;  %1127 = vmatprep.subr.bf16.mxu1 %v4730_v29  ;;  %v5679_v28 = vsub.s32 2, %v5658_v19 }
 0x103   :  { %2138 = vbcast.lane.b32.xlu1 %v2136_v25, 256  ;;  %2215 = vbcast.lane.b32.xlu0 %v2213_v26, 256 }
 0x104   :  { %v2147_v29 = vrot.slane %v5663_v21, %v5679_v28 }
 0x105   :  { %1042 = vmatpush1.bf16.msra.mxu0 %v4725_v30  ;;  %1128 = vmatpush1.bf16.msra.mxu1 %v4728_v31  ;;  %v2235_v30 = vrot.slane %v5670_v24, %v5679_v28  ;;  %v5686_v31 = vsub.s32 3, %v5658_v19 }
 0x106   :  { %1043 = vmatprep.subr.bf16.mxu0 %v4733_v32  ;;  %1129 = vmatprep.subr.bf16.mxu1 %v4736_v35  ;;  %v333_v35 = vrot.slane %v324_v33, %v5666_v22 }
 0x107   :  { %2142 = vbcast.lane.b32.xlu1 %v2136_v25, 264  ;;  %2226 = vbcast.lane.b32.xlu0 %v2224_v27, 256  ;;  %v2158_v32 = vrot.slane %v5663_v21, %v5686_v31 }
 0x109   :  { %1044 = vmatpush1.bf16.msra.mxu0 %v4731_v37  ;;  %1130 = vmatpush1.bf16.msra.mxu1 %v4734_v38 }
 0x10a   :  { %1045 = vmatprep.subr.bf16.mxu0 %v4739_v39  ;;  %1131 = vmatprep.subr.bf16.mxu1 %v4742_v40 }
 0x10b   :  { %2219 = vbcast.lane.b32.xlu1 %v2213_v26, 264  ;;  %2149 = vbcast.lane.b32.xlu0 %v2147_v29, 256 }
 0x10d   :  { %1046 = vmatpush1.bf16.msra.mxu0 %v4737_v41  ;;  %1132 = vmatpush1.bf16.msra.mxu1 %v4740_v42 }
 0x10e   :  { %1047 = vmatprep.subr.bf16.mxu0 %v4745_v43  ;;  %1133 = vmatprep.subr.bf16.mxu1 %v4748_v44 }
 0x10f   :  { %2230 = vbcast.lane.b32.xlu1 %v2224_v27, 264  ;;  %2237 = vbcast.lane.b32.xlu0 %v2235_v30, 256 }
 0x111   :  { %1048 = vmatpush1.bf16.msra.mxu0 %v4743_v45  ;;  %1134 = vmatpush1.bf16.msra.mxu1 %v4746_v46 }
 0x112   :  { %1049 = vmatprep.subr.bf16.mxu0 %v4751_v47  ;;  %1135 = vmatprep.subr.bf16.mxu1 %v4754_v48 }
 0x113   :  { %2153 = vbcast.lane.b32.xlu1 %v2147_v29, 264  ;;  %2160 = vbcast.lane.b32.xlu0 %v2158_v32, 256 }
 0x115   :  { %1050 = vmatpush1.bf16.msra.mxu0 %v4749_v49  ;;  %1136 = vmatpush1.bf16.msra.mxu1 %v4752_v50  ;;  %v341_v49 = vrot.slane %v324_v33, %v5686_v31 }
 0x116   :  { %1051 = vmatprep.subr.bf16.mxu0 %v4757_v51  ;;  %1137 = vmatprep.subr.bf16.mxu1 %v4760_v52 }
 0x117   :  { %2241 = vbcast.lane.b32.xlu1 %v2235_v30, 264 }
 0x119   :  { %1052 = vmatpush1.bf16.msra.mxu0 %v4755_v53  ;;  %1138 = vmatpush1.bf16.msra.mxu1 %v4758_v54  ;;  %v337_v53 = vrot.slane %v324_v33, %v5679_v28 }
 0x11a   :  { %1053 = vmatprep.subr.bf16.mxu0 %v4763_v55  ;;  %1139 = vmatprep.subr.bf16.mxu1 %v4766_v56 }
 0x11b   :  { %2164 = vbcast.lane.b32.xlu1 %v2158_v32, 264 }
 0x11d   :  { %1054 = vmatpush1.bf16.msra.mxu0 %v4761_v57  ;;  %1140 = vmatpush1.bf16.msra.mxu1 %v4764_v58 }
 0x11e   :  { %1055 = vmatprep.subr.bf16.mxu0 %v4769_v59  ;;  %1141 = vmatprep.subr.bf16.mxu1 %v4772_v60 }
 0x121   :  { %1056 = vmatpush1.bf16.msra.mxu0 %v4767_v61  ;;  %1142 = vmatpush1.bf16.msra.mxu1 %v4770_v62 }
 0x122   :  { %1057 = vmatprep.subr.bf16.mxu0 %v4775_v63  ;;  %1143 = vmatprep.subr.bf16.mxu1 %v4778_v0 }
 0x125   :  { %1058 = vmatpush1.bf16.msra.mxu0 %v4773_v1  ;;  %1144 = vmatpush1.bf16.msra.mxu1 %v4776_v2 }
 0x126   :  { %1059 = vmatprep.subr.bf16.mxu0 %v4781_v3  ;;  %1145 = vmatprep.subr.bf16.mxu1 %v4784_v4 }
 0x129   :  { %1060 = vmatpush1.bf16.msra.mxu0 %v4779_v6  ;;  %1146 = vmatpush1.bf16.msra.mxu1 %v4782_v7 }
 0x12a   :  { %4514 = vmatprep.subr.bf16.mxu0 %v5426_v10 }
 0x12c   :  { %1062 = vmatmul.mubr.bf16.vlgmr.msra.gmra.mrb[0].mxu0 %v4688_v8  ;;  %1148 = vmatmul.mubr.bf16.vlgmr.msra.gmra.mrb[0].mxu1 %v4688_v8  ;;  %v180_v8 = vld [vmem:[#allocation11] sm:$0xff] }
 0x12d   :  { %4515 = vmatpush3.bf16.msra.mxu0 %v4785_v9  ;;  %4530 = vmatprep.mubr.msk.bf16.mxu0 %vm5427_vm0, %v5426_v10 }
 0x12e   :  { %4516 = vmatprep.subr.bf16.mxu0 %v5426_v10 }
 0x131   :  { %4517 = vmatpush3.bf16.msra.mxu0 %v4786_v11 }
 0x132   :  { %4518 = vmatprep.subr.bf16.mxu0 %v5426_v10 }
 0x135   :  { %4519 = vmatpush3.bf16.msra.mxu0 %v4787_v12 }
 0x136   :  { %4520 = vmatprep.subr.bf16.mxu0 %v5426_v10 }
 0x139   :  { %4521 = vmatpush3.bf16.msra.mxu0 %v4788_v13 }
 0x13a   :  { %4522 = vmatprep.subr.bf16.mxu0 %v5426_v10 }
 0x13d   :  { %4523 = vmatpush3.bf16.msra.mxu0 %v4789_v14 }
 0x13e   :  { %4524 = vmatprep.subr.bf16.mxu0 %v5426_v10 }
 0x141   :  { %4525 = vmatpush3.bf16.msra.mxu0 %v4790_v15 }
 0x142   :  { %4526 = vmatprep.subr.bf16.mxu0 %v5426_v10 }
 0x145   :  { %4527 = vmatpush3.bf16.msra.mxu0 %v4791_v16  ;;  %v181_v16 = vld [vmem:[#allocation11 + $0x8] sm:$0xff] }
 0x146   :  { %4528 = vmatprep.subr.bf16.mxu0 %v5426_v10 }
 0x149   :  { %4529 = vmatpush3.bf16.msra.mxu0 %v4792_v18 }
 0x1ff   :  { %v1063_v36 = vpop.f32.mrb[0].mxu0  ;;  %v1149_v37 = vpop.f32.mrb[0].mxu1 }
 0x200   :  { %v4534_v38 = vadd.f32 %v1063_v36, %v329_v34  ;;  %v1065_v39 = vpop.f32.mrb[1].mxu0  ;;  %v1151_v40 = vpop.f32.mrb[1].mxu1  ;;  %v4538_v55 = vadd.f32 %v1149_v37, %v337_v53 }
 0x201   :  { %v4535_v41 = vadd.f32 %v1065_v39, %v333_v35  ;;  %v1067_v42 = vpop.f32.mrb[2].mxu0  ;;  %v1153_v43 = vpop.f32.mrb[2].mxu1  ;;  %v4539_v54 = vadd.f32 %v1151_v40, %v341_v49 }
 0x202   :  { %v4225_v44 = vmul.f32 -1.442695, %v4534_v38  ;;  %v4536_v45 = vadd.f32 %v1067_v42, %v329_v34  ;;  %v1069_v46 = vpop.f32.mrb[3].mxu0  ;;  %v1155_v47 = vpop.f32.mrb[3].mxu1  ;;  %v4540_v58 = vadd.f32 %v1153_v43, %v337_v53  ;;  %v5428_v38 = vmov 1966171168  }
 0x203   :  { %v4227_v48 = vmul.f32 -1.442695, %v4535_v41  ;;  %v4537_v50 = vadd.f32 %v1069_v46, %v333_v35  ;;  %v4229_v56 = vmul.f32 -1.442695, %v4539_v54  ;;  %v4541_v57 = vadd.f32 %v1155_v47, %v341_v49  ;;  %v4231_v41 = vld [vmem:[%s6502_s12] ss:$0 sm:$0xff] }
 0x204   :  { %4937 = vpow2.f32 %v4225_v44  ;;  %v4226_v51 = vmul.f32 -1.442695, %v4536_v45  ;;  %v1387_v39 = vunpack.c.l.s4 %v5428_v38  ;;  %v4344_v49 = vld [vmem:[#allocation7] sm:$0xff]   ;;  %v4475_v53 = vld [vmem:[#allocation7 + $0x8] sm:$0xff]  }
 0x205   :  { %4939 = vpow2.f32 %v4227_v48  ;;  %v4228_v52 = vmul.f32 -1.442695, %v4537_v50  ;;  %v4230_v62 = vmul.f32 -1.442695, %v4541_v57  ;;  %v4345_v54 = vunpack.c.l.bf16 %v4344_v49 }
 0x206   :  { %4941 = vpow2.f32 %v4226_v51  ;;  %v1388_v40 = vunpack.c.0.s8 %v1387_v39 }
 0x207   :  { %4943 = vpow2.f32 %v4228_v52 }
 0x208   :  { %4945 = vtanh.f32 %v4538_v55  ;;  %v5701_v42 = vsub.s32 %v1388_v40, %v5658_v19 }
 0x209   :  { %4947 = vpow2.f32 %v4229_v56  ;;  %v4346_v56 = vunpack.c.h.bf16 %v4344_v49 }
 0x20a   :  { %4949 = vtanh.f32 %v4540_v58 }
 0x20e   :  { %v4938_v59 = vpop.eup %4937 }
 0x20f   :  { %v4940_v60 = vpop.eup %4939  ;;  %v1164_v61 = vadd.f32 1.0, %v4938_v59  ;;  %v4349_v59 = vunpack.c.l.bf16 %v4475_v53 }
 0x210   :  { %v1176_v63 = vadd.f32 1.0, %v4940_v60  ;;  %v4942_v0 = vpop.eup %4941 }
 0x211   :  { %4951 = vrcp.f32 %v1164_v61  ;;  %v1165_v1 = vadd.f32 1.0, %v4942_v0  ;;  %v4944_v2 = vpop.eup %4943 }
 0x212   :  { %4953 = vrcp.f32 %v1176_v63  ;;  %v1177_v3 = vadd.f32 1.0, %v4944_v2  ;;  %v4946_v4 = vpop.eup %4945 }
 0x213   :  { %4955 = vpow2.f32 %v4230_v62  ;;  %v4948_v6 = vpop.eup %4947  ;;  %v4350_v62 = vunpack.c.h.bf16 %v4475_v53 }
 0x214   :  { %4957 = vrcp.f32 %v1165_v1  ;;  %v4950_v7 = vpop.eup %4949  ;;  %v1190_v12 = vadd.f32 1.0, %v4948_v6 }
 0x215   :  { %4959 = vrcp.f32 %v1177_v3 }
 0x216   :  { %4961 = vrcp.f32 %v1190_v12 }
 0x21b   :  { %v4952_v9 = vpop.eup %4951 }
 0x21c   :  { %v4954_v10 = vpop.eup %4953  ;;  %v1198_v11 = vmul.f32 %v4952_v9, %v4946_v4  ;;  %v4482_v4 = vld [vmem:[#allocation7 + $0x40] sm:$0xff]  }
 0x21d   :  { %v4956_v13 = vpop.eup %4955  ;;  %v1196_v14 = vmul.f32 %v4954_v10, %v180_v8  ;;  %v4377_v9 = vunpack.c.l.bf16 %v4482_v4  ;;  %v4378_v12 = vunpack.c.h.bf16 %v4482_v4 }
 0x21e   :  { %v4958_v15 = vpop.eup %4957  ;;  %v1191_v26 = vadd.f32 1.0, %v4956_v13 }
 0x21f   :  { %v1200_v18 = vadd.f32 %v1198_v11, %v1196_v14  ;;  %v1199_v23 = vmul.f32 %v4958_v15, %v4950_v7  ;;  %v4960_v25 = vpop.eup %4959  ;;  %v4476_v7 = vld [vmem:[#allocation7 + $0x10] sm:$0xff]   ;;  %v4478_v14 = vld [vmem:[#allocation7 + $0x20] sm:$0xff]  }
 0x220   :  { %v1197_v27 = vmul.f32 %v4960_v25, %v181_v16  ;;  %v4962_v30 = vpop.eup %4961  ;;  %v4353_v13 = vunpack.c.l.bf16 %v4476_v7 }
 0x221   :  { %4963 = vtanh.f32 %v1200_v18  ;;  %4038 = vst [vmem:[#allocation20] sm:$0xff] %v1200_v18  ;;  %v4354_v18 = vunpack.c.h.bf16 %v4476_v7  ;;  %v4486_v7 = vld [vmem:[#allocation7 + $0x60] sm:$0xff]  }
 0x222   :  { %v1201_v29 = vadd.f32 %v1199_v23, %v1197_v27  ;;  %4965 = vrcp.f32 %v1191_v26  ;;  %v4361_v26 = vunpack.c.l.bf16 %v4478_v14 }
 0x224   :  { %4967 = vtanh.f32 %v1201_v29  ;;  %4039 = vst [vmem:[#allocation20 + $0x8] sm:$0xff] %v1201_v29 }
 0x22b   :  { %v4964_v32 = vpop.eup %4963 }
 0x22c   :  { %v1204_v33 = vmul.f32 %v4964_v32, %v4962_v30  ;;  %v4966_v34 = vpop.eup %4965  ;;  %v4483_v32 = vld [vmem:[#allocation7 + $0x48] sm:$0xff]  }
 0x22d   :  { %v4381_v40 = vunpack.c.l.bf16 %v4483_v32  ;;  %v4382_v49 = vunpack.c.h.bf16 %v4483_v32 }
 0x22e   :  { %4033 = vst [vmem:[#allocation18] sm:$0xff] %v1204_v33  ;;  %v4968_v35 = vpop.eup %4967 }
 0x22f   :  { %v1205_v36 = vmul.f32 %v4968_v35, %v4966_v34  ;;  %v4362_v34 = vunpack.c.h.bf16 %v4478_v14  ;;  %v5754_v14 = vld [vmem:[#allocation7 + $0x78] sm:$0xff]  }
 0x231   :  { %v1206_v37 = vpack.c.bf16 %v1205_v36, %v1204_v33  ;;  %4034 = vst [vmem:[#allocation18 + $0x8] sm:$0xff] %v1205_v36 }
 0x233   :  { %4531 = vmatmul.mubr.bf16.vlgmr.msra.gmra.mrb[4].mxu0 %v1206_v37  ;;  %3834 = vmatprep.mubr.bf16.mxu1 %v1206_v37 }
 0x234   :  { %3920 = vmatprep.mubr.bf16.mxu0 %v1206_v37  ;;  %v5731_v37 = vld [vmem:[%s6503_s13] ss:$0 sm:$0xff] }
 0x306   :  { %v1312_v43 = vpop.f32.mrb[4].mxu0 }
 0x307   :  { %v1313_v44 = vadd.f32 %v4231_v41, %v1312_v43  ;;  %v4532_v45 = vpop.f32.mrb[5].mxu0  ;;  %v4484_v43 = vld [vmem:[#allocation7 + $0x50] sm:$0xff]  }
 0x308   :  { %v1315_v46 = vpop.f32.mrb[6].mxu0 }
 0x309   :  { %v1392_v47 = vrot.slane %v1313_v44, %v5701_v42  ;;  %v4533_v48 = vpop.f32.mrb[7].mxu0  ;;  %v1316_v50 = vadd.f32 %v4231_v41, %v1315_v46  ;;  %v1385_v60 = vcombine.high %v1313_v44, %v1313_v44 }
 0x30b   :  { %v1400_v51 = vcombine.high %v1392_v47, %v1392_v47  ;;  %v1408_v52 = vrot.slane %v1392_v47, %v5701_v42  ;;  %v1441_v58 = vrot.slane %v1316_v50, %v5701_v42  ;;  %v5714_v2 = vrot.slane %v1385_v60, %v5701_v42 }
 0x30c   :  { %v1434_v23 = vcombine.high %v1316_v50, %v1316_v50  ;;  %v4386_v60 = vunpack.c.h.bf16 %v4484_v43 }
 0x30d   :  { %v5706_v55 = vrot.slane %v1400_v51, %v5701_v42  ;;  %v1486_v57 = vrot.slane %v1408_v52, %v5661_v20  ;;  %v1457_v1 = vrot.slane %v1441_v58, %v5701_v42  ;;  %v1430_v6 = vcombine.high %v1408_v52, %v1408_v52 }
 0x30e   :  { %v5719_v11 = vrot.slane %v5714_v2, %v5701_v42  ;;  %v1449_v16 = vcombine.high %v1441_v58, %v1441_v58  ;;  %v1448_v36 = vrot.slane %v1434_v23, %v5701_v42  ;;  %v1401_v4 = vcombine.high %v5714_v2, %v5714_v2 }
 0x30f   :  { %v1490_v61 = vrot.slane %v5706_v55, %v5661_v20  ;;  %v1563_v63 = vadd.f32 %v4345_v54, %v1486_v57  ;;  %v1564_v0 = vadd.f32 %v4346_v56, %v1486_v57  ;;  %v1518_v10 = vrot.slane %v1457_v1, %v5661_v20  ;;  %v4477_v56 = vld [vmem:[#allocation7 + $0x18] sm:$0xff]  }
 0x310   :  { %v1494_v15 = vrot.slane %v1430_v6, %v5661_v20  ;;  %v1502_v27 = vrot.slane %v5719_v11, %v5661_v20  ;;  %v5725_v33 = vrot.slane %v1449_v16, %v5701_v42  ;;  %v1479_v44 = vcombine.high %v1457_v1, %v1457_v1 }
 0x311   :  { %v1565_v3 = vadd.f32 %v4349_v59, %v1490_v61  ;;  %v1566_v8 = vadd.f32 %v4350_v62, %v1490_v61  ;;  %4969 = vtanh.f32 %v1563_v63  ;;  %v1579_v25 = vadd.f32 %v4377_v9, %v1518_v10 }
 0x312   :  { %4971 = vtanh.f32 %v1564_v0  ;;  %v1580_v29 = vadd.f32 %v4378_v12, %v1518_v10  ;;  %v1567_v30 = vadd.f32 %v4353_v13, %v1494_v15  ;;  %v1568_v35 = vadd.f32 %v4354_v18, %v1494_v15 }
 0x313   :  { %4973 = vtanh.f32 %v1565_v3  ;;  %v1571_v39 = vadd.f32 %v4361_v26, %v1502_v27  ;;  %v1522_v45 = vrot.slane %v5725_v33, %v5661_v20  ;;  %v1572_v48 = vadd.f32 %v4362_v34, %v1502_v27  ;;  %v4479_v26 = vld [vmem:[#allocation7 + $0x28] sm:$0xff]  }
 0x314   :  { %4975 = vtanh.f32 %v1566_v8  ;;  %v1450_v50 = vcombine.high %v1448_v36, %v1448_v36  ;;  %v1432_v53 = vcombine.high %v5706_v55, %v5706_v55  ;;  %v4385_v54 = vunpack.c.l.bf16 %v4484_v43 }
 0x315   :  { %4977 = vtanh.f32 %v1579_v25  ;;  %v1526_v57 = vrot.slane %v1479_v44, %v5661_v20  ;;  %v1581_v58 = vadd.f32 %v4381_v40, %v1522_v45  ;;  %v1582_v62 = vadd.f32 %v4382_v49, %v1522_v45 }
 0x316   :  { %4979 = vtanh.f32 %v1580_v29  ;;  %v5742_v61 = vrot.slane %v1450_v50, %v5701_v42  ;;  %v4357_v0 = vunpack.c.l.bf16 %v4477_v56  ;;  %v4358_v55 = vunpack.c.h.bf16 %v4477_v56 }
 0x317   :  { %4981 = vtanh.f32 %v1567_v30  ;;  %v5746_v1 = vrot.slane %v1448_v36, %v5701_v42  ;;  %v1498_v6 = vrot.slane %v1432_v53, %v5661_v20  ;;  %v1583_v8 = vadd.f32 %v4385_v54, %v1526_v57 }
 0x318   :  { %4983 = vtanh.f32 %v1568_v35  ;;  %v1482_v10 = vcombine.high %v5742_v61, %v5742_v61  ;;  %v1584_v12 = vadd.f32 %v4386_v60, %v1526_v57  ;;  %v4393_v18 = vunpack.c.l.bf16 %v4486_v7 }
 0x319   :  { %4985 = vtanh.f32 %v1571_v39  ;;  %v4394_v23 = vunpack.c.h.bf16 %v4486_v7  ;;  %v1534_v25 = vrot.slane %v5746_v1, %v5661_v20  ;;  %v5760_v27 = vrot.slane %v1401_v4, %v5701_v42  ;;  %v4480_v42 = vld [vmem:[#allocation7 + $0x30] sm:$0xff]  }
 0x31a   :  { %4987 = vtanh.f32 %v1572_v48  ;;  %v1569_v29 = vadd.f32 %v4357_v0, %v1498_v6  ;;  %v4406_v30 = vunpack.c.h.bf16 %v5754_v14  ;;  %v1570_v32 = vadd.f32 %v4358_v55, %v1498_v6 }
 0x31b   :  { %v4970_v38 = vpop.eup %4969  ;;  %4989 = vtanh.f32 %v1581_v58  ;;  %v5764_v34 = vrot.slane %v1482_v10, %v5661_v20  ;;  %v4365_v40 = vunpack.c.l.bf16 %v4479_v26  ;;  %v1431_v43 = vcombine.high %v5719_v11, %v5719_v11  ;;  %v4485_v58 = vld [vmem:[#allocation7 + $0x58] sm:$0xff]  }
 0x31c   :  { %v4972_v41 = vpop.eup %4971  ;;  %v1634_v46 = vmul.f32 %v4970_v38, %v5731_v37  ;;  %4991 = vtanh.f32 %v1582_v62  ;;  %v1506_v44 = vrot.slane %v5760_v27, %v5661_v20  ;;  %v1588_v45 = vadd.f32 %v4394_v23, %v1534_v25 }
 0x31d   :  { %v4974_v47 = vpop.eup %4973  ;;  %v1635_v59 = vmul.f32 %v4972_v41, %v5731_v37  ;;  %4993 = vtanh.f32 %v1583_v8  ;;  %v1587_v41 = vadd.f32 %v4393_v18, %v1534_v25  ;;  %v1594_v48 = vadd.f32 %v4406_v30, %v5764_v34 }
 0x31e   :  { %1666 = vadd.xlane.f32.xlu0 %v1634_v46  ;;  %v1636_v51 = vmul.f32 %v4974_v47, %v5731_v37  ;;  %v4976_v52 = vpop.eup %4975  ;;  %4995 = vtanh.f32 %v1584_v12  ;;  %v4366_v46 = vunpack.c.h.bf16 %v4479_v26  ;;  %v1510_v11 = vrot.slane %v1431_v43, %v5661_v20 }
 0x31f   :  { %v1637_v63 = vmul.f32 %v4976_v52, %v5731_v37  ;;  %v4978_v3 = vpop.eup %4977  ;;  %4997 = vtanh.f32 %v1569_v29  ;;  %v4369_v52 = vunpack.c.l.bf16 %v4480_v42  ;;  %v1573_v53 = vadd.f32 %v4365_v40, %v1506_v44 }
 0x320   :  { %1670 = vadd.xlane.f32.xlu1 %v1636_v51  ;;  %v4980_v9 = vpop.eup %4979  ;;  %v1650_v13 = vmul.f32 %v4978_v3, %v5731_v37  ;;  %4999 = vtanh.f32 %v1570_v32  ;;  %v1481_v54 = vcombine.high %v5725_v33, %v5725_v33  ;;  %v4370_v56 = vunpack.c.h.bf16 %v4480_v42  ;;  %v4487_v3 = vld [vmem:[#allocation7 + $0x68] sm:$0xff]   ;;  %v4481_v42 = vld [vmem:[#allocation7 + $0x38] sm:$0xff]  }
 0x321   :  { %v4982_v15 = vpop.eup %4981  ;;  %v1651_v16 = vmul.f32 %v4980_v9, %v5731_v37  ;;  %5001 = vtanh.f32 %v1587_v41  ;;  %v1574_v57 = vadd.f32 %v4366_v46, %v1506_v44  ;;  %v1575_v0 = vadd.f32 %v4369_v52, %v1510_v11 }
 0x322   :  { %1668 = vadd.xlane.f32.xlu0 %v1635_v59  ;;  %v4984_v2 = vpop.eup %4983  ;;  %v1638_v35 = vmul.f32 %v4982_v15, %v5731_v37  ;;  %5003 = vtanh.f32 %v1588_v45  ;;  %v4389_v55 = vunpack.c.l.bf16 %v4485_v58  ;;  %v1530_v4 = vrot.slane %v1481_v54, %v5661_v20 }
 0x323   :  { %v4986_v36 = vpop.eup %4985  ;;  %v1639_v38 = vmul.f32 %v4984_v2, %v5731_v37  ;;  %5005 = vtanh.f32 %v1594_v48  ;;  %v1576_v33 = vadd.f32 %v4370_v56, %v1510_v11  ;;  %v4390_v6 = vunpack.c.h.bf16 %v4485_v58 }
 0x324   :  { %1672 = vadd.xlane.f32.xlu1 %v1637_v63  ;;  %v4988_v39 = vpop.eup %4987  ;;  %v1642_v47 = vmul.f32 %v4986_v36, %v5731_v37  ;;  %5007 = vtanh.f32 %v1573_v53  ;;  %v4397_v12 = vunpack.c.l.bf16 %v4487_v3  ;;  %v1480_v15 = vcombine.high %v5746_v1, %v5746_v1 }
 0x325   :  { %v4990_v49 = vpop.eup %4989  ;;  %v1643_v50 = vmul.f32 %v4988_v39, %v5731_v37  ;;  %5009 = vtanh.f32 %v1574_v57  ;;  %v1585_v2 = vadd.f32 %v4389_v55, %v1530_v4  ;;  %v4398_v23 = vunpack.c.h.bf16 %v4487_v3 }
 0x326   :  { %1698 = vadd.xlane.f32.xlu0 %v1650_v13  ;;  %v4992_v51 = vpop.eup %4991  ;;  %v1652_v59 = vmul.f32 %v4990_v49, %v5731_v37  ;;  %v4488_v13 = vld [vmem:[#allocation7 + $0x70] sm:$0xff]   ;;  %5011 = vtanh.f32 %v1575_v0  ;;  %v1586_v25 = vadd.f32 %v4390_v6, %v1530_v4  ;;  %v4405_v54 = vunpack.c.l.bf16 %v5754_v14 }
 0x327   :  { %v4994_v60 = vpop.eup %4993  ;;  %v1653_v62 = vmul.f32 %v4992_v51, %v5731_v37  ;;  %5013 = vtanh.f32 %v1576_v33  ;;  %v4401_v1 = vunpack.c.l.bf16 %v4488_v13  ;;  %v4402_v39 = vunpack.c.h.bf16 %v4488_v13 }
 0x328   :  { %1700 = vadd.xlane.f32.xlu1 %v1651_v16  ;;  %v4996_v63 = vpop.eup %4995  ;;  %v1654_v7 = vmul.f32 %v4994_v60, %v5731_v37  ;;  %v1538_v16 = vrot.slane %v5742_v61, %v5661_v20  ;;  %v1542_v61 = vrot.slane %v1480_v15, %v5661_v20  ;;  %5015 = vtanh.f32 %v1585_v2 }
 0x329   :  { %v4998_v8 = vpop.eup %4997  ;;  %v1655_v9 = vmul.f32 %v4996_v63, %v5731_v37  ;;  %5017 = vtanh.f32 %v1586_v25  ;;  %v5816_v2 = vsub.s32 4, %v5658_v19  ;;  %v5823_v25 = vsub.s32 5, %v5658_v19 }
 0x32a   :  { %1674 = vadd.xlane.f32.xlu0 %v1638_v35  ;;  %v5000_v10 = vpop.eup %4999  ;;  %v1640_v26 = vmul.f32 %v4998_v8, %v5731_v37  ;;  %v1433_v35 = vcombine.high %v5760_v27, %v5760_v27  ;;  %v1589_v36 = vadd.f32 %v4397_v12, %v1538_v16  ;;  %v1590_v40 = vadd.f32 %v4398_v23, %v1538_v16 }
 0x32b   :  { %v5002_v18 = vpop.eup %5001  ;;  %v1641_v30 = vmul.f32 %v5000_v10, %v5731_v37  ;;  %v1591_v46 = vadd.f32 %v4401_v1, %v1542_v61  ;;  %v1592_v48 = vadd.f32 %v4402_v39, %v1542_v61  ;;  %v2246_v16 = vrot.slane %v5670_v24, %v5686_v31  ;;  %v5840_v61 = vpop.permute.xlu0 %2127 }
 0x32c   :  { %1676 = vadd.xlane.f32.xlu1 %v1639_v38  ;;  %v5004_v29 = vpop.eup %5003  ;;  %v1658_v41 = vmul.f32 %v5002_v18, %v5731_v37  ;;  %v1514_v45 = vrot.slane %v1433_v35, %v5661_v20  ;;  %5019 = vtanh.f32 %v1589_v36  ;;  %v2169_v18 = vrot.slane %v5663_v21, %v5816_v2 }
 0x32d   :  { %v5006_v32 = vpop.eup %5005  ;;  %v1659_v44 = vmul.f32 %v5004_v29, %v5731_v37  ;;  %5021 = vtanh.f32 %v1590_v40  ;;  %v2257_v23 = vrot.slane %v5670_v24, %v5816_v2  ;;  %v5830_v29 = vsub.s32 6, %v5658_v19 }
 0x32e   :  { %1682 = vadd.xlane.f32.xlu0 %v1642_v47  ;;  %v5793_v38 = vmul.f32 %v5006_v32, %v5731_v37  ;;  %v5008_v43 = vpop.eup %5007  ;;  %v4373_v47 = vunpack.c.l.bf16 %v4481_v42  ;;  %5023 = vtanh.f32 %v1591_v46 }
 0x32f   :  { %v5010_v27 = vpop.eup %5009  ;;  %v1644_v49 = vmul.f32 %v5008_v43, %v5731_v37  ;;  %5025 = vtanh.f32 %v1592_v48  ;;  %v2191_v32 = vrot.slane %v5663_v21, %v5830_v29  ;;  %v2279_v1 = vrot.slane %v5670_v24, %v5830_v29  ;;  %v5845_v39 = vpop.permute.xlu0 %2215 }
 0x330   :  { %1684 = vadd.xlane.f32.xlu1 %v1643_v50  ;;  %v4374_v50 = vunpack.c.h.bf16 %v4481_v42  ;;  %v5012_v51 = vpop.eup %5011  ;;  %v1645_v52 = vmul.f32 %v5010_v27, %v5731_v37  ;;  %v1577_v53 = vadd.f32 %v4373_v47, %v1514_v45  ;;  %6526 = vst [vmem:[#allocation29_spill] sm:$0xff] %v5845_v39 }
 0x331   :  { %v5014_v11 = vpop.eup %5013  ;;  %v1646_v56 = vmul.f32 %v5012_v51, %v5731_v37 }
 0x332   :  { %1702 = vadd.xlane.f32.xlu0 %v1652_v59  ;;  %v1578_v57 = vadd.f32 %v4374_v50, %v1514_v45  ;;  %v5016_v58 = vpop.eup %5015  ;;  %v1647_v59 = vmul.f32 %v5014_v11, %v5731_v37  ;;  %5027 = vtanh.f32 %v1577_v53 }
 0x333   :  { %v5018_v60 = vpop.eup %5017  ;;  %v1656_v63 = vmul.f32 %v5016_v58, %v5731_v37 }
 0x334   :  { %1704 = vadd.xlane.f32.xlu1 %v1653_v62  ;;  %v1593_v62 = vadd.f32 %v4405_v54, %v5764_v34  ;;  %5029 = vtanh.f32 %v1578_v57  ;;  %v1657_v55 = vmul.f32 %v5018_v60, %v5731_v37 }
 0x336   :  { %1706 = vadd.xlane.f32.xlu0 %v1654_v7  ;;  %v5020_v0 = vpop.eup %5019  ;;  %5031 = vtanh.f32 %v1593_v62 }
 0x337   :  { %v5022_v14 = vpop.eup %5021  ;;  %v1660_v3 = vmul.f32 %v5020_v0, %v5731_v37 }
 0x338   :  { %1708 = vadd.xlane.f32.xlu1 %v1655_v9  ;;  %v5024_v4 = vpop.eup %5023  ;;  %v1661_v33 = vmul.f32 %v5022_v14, %v5731_v37 }
 0x339   :  { %v5026_v6 = vpop.eup %5025  ;;  %v1662_v34 = vmul.f32 %v5024_v4, %v5731_v37 }
 0x33a   :  { %1678 = vadd.xlane.f32.xlu0 %v1640_v26  ;;  %v1663_v8 = vmul.f32 %v5026_v6, %v5731_v37  ;;  %v2268_v26 = vrot.slane %v5670_v24, %v5823_v25 }
 0x33c   :  { %1680 = vadd.xlane.f32.xlu1 %v1641_v30  ;;  %v5028_v7 = vpop.eup %5027  ;;  %v5832_v30 = vpop.permute.xlu1 %2131 }
 0x33d   :  { %v1648_v10 = vmul.f32 %v5028_v7, %v5731_v37 }
 0x33e   :  { %1714 = vadd.xlane.f32.xlu0 %v1658_v41  ;;  %v5030_v9 = vpop.eup %5029  ;;  %v5849_v41 = vpop.permute.xlu0 %2226 }
 0x33f   :  { %v1649_v13 = vmul.f32 %v5030_v9, %v5731_v37  ;;  %6528 = vst [vmem:[#allocation31_spill] sm:$0xff] %v5849_v41 }
 0x340   :  { %1716 = vadd.xlane.f32.xlu1 %v1659_v44  ;;  %v5032_v12 = vpop.eup %5031  ;;  %v5836_v35 = vpop.permute.xlu1 %2138 }
 0x341   :  { %v1664_v15 = vmul.f32 %v5032_v12, %v5731_v37  ;;  %v2180_v37 = vrot.slane %v5663_v21, %v5823_v25 }
 0x342   :  { %1686 = vadd.xlane.f32.xlu0 %v1644_v49  ;;  %v5853_v43 = vpop.permute.xlu0 %2149  ;;  %v5870_v49 = vsub.s32 7, %v5658_v19 }
 0x344   :  { %1688 = vadd.xlane.f32.xlu1 %v1645_v52  ;;  %v5842_v36 = vpop.permute.xlu1 %2142  ;;  %v5878_v52 = vrot.slane %v5663_v21, %v5870_v49 }
 0x346   :  { %1690 = vadd.xlane.f32.xlu0 %v1646_v56  ;;  %v5857_v27 = vpop.permute.xlu0 %2237 }
 0x347   :  { %6530 = vst [vmem:[#allocation33_spill] sm:$0xff] %v5857_v27 }
 0x348   :  { %1692 = vadd.xlane.f32.xlu1 %v1647_v59  ;;  %v5847_v40 = vpop.permute.xlu1 %2219 }
 0x349   :  { %6527 = vst [vmem:[#allocation30_spill] sm:$0xff] %v5847_v40 }
 0x34a   :  { %1710 = vadd.xlane.f32.xlu0 %v1656_v63 }
 0x34c   :  { %1712 = vadd.xlane.f32.xlu1 %v1657_v55  ;;  %v5851_v42 = vpop.permute.xlu1 %2230 }
 0x34d   :  { %6529 = vst [vmem:[#allocation32_spill] sm:$0xff] %v5851_v42 }
 0x34e   :  { %1718 = vadd.xlane.f32.xlu0 %v1660_v3 }
 0x350   :  { %1720 = vadd.xlane.f32.xlu1 %v1661_v33  ;;  %v5855_v44 = vpop.permute.xlu1 %2153  ;;  %v1763_v33 = vand.u32 127, %v326_v17 }
 0x352   :  { %1722 = vadd.xlane.f32.xlu0 %v1662_v34  ;;  %v1768_v6 = vadd.s32 4294967288, %v1763_v33  ;;  %v5926_v12 = vsub.s32 %v1763_v33, %v5658_v19 }
 0x354   :  { %1724 = vadd.xlane.f32.xlu1 %v1663_v8  ;;  %v5859_v45 = vpop.permute.xlu1 %2241  ;;  %v5919_v8 = vsub.s32 %v1768_v6, %v5658_v19  ;;  %6534 = vst [vmem:[#allocation37_spill] sm:$0xff] %v5926_v12 }
 0x355   :  { %6531 = vst [vmem:[#allocation34_spill] sm:$0xff] %v5859_v45 }
 0x356   :  { %1694 = vadd.xlane.f32.xlu0 %v1648_v10  ;;  %6532 = vst [vmem:[#allocation35_spill] sm:$0xff] %v5919_v8 }
 0x358   :  { %1696 = vadd.xlane.f32.xlu1 %v1649_v13  ;;  %v5863_v46 = vpop.permute.xlu1 %2164 }
 0x35a   :  { %1726 = vadd.xlane.f32.xlu0 %v1664_v15 }
 0x369   :  { %2252 = vbcast.lane.b32.xlu1 %v2246_v16, 264 }
 0x370   :  { %2248 = vbcast.lane.b32.xlu0 %v2246_v16, 256 }
 0x374   :  { %2171 = vbcast.lane.b32.xlu0 %v2169_v18, 256 }
 0x378   :  { %2259 = vbcast.lane.b32.xlu0 %v2257_v23, 256 }
 0x37c   :  { %2182 = vbcast.lane.b32.xlu0 %v2180_v37, 256 }
 0x380   :  { %2270 = vbcast.lane.b32.xlu0 %v2268_v26, 256 }
 0x384   :  { %2193 = vbcast.lane.b32.xlu0 %v2191_v32, 256 }
 0x388   :  { %2281 = vbcast.lane.b32.xlu0 %v2279_v1, 256 }
 0x38d   :  { %1728 = vadd.xlane.f32.xlu1 %v5793_v38  ;;  %v5861_v38 = vpop.permute.xlu0 %2160 }
 0x39e   :  { %2175 = vbcast.lane.b32.xlu1 %v2169_v18, 264 }
 0x3a2   :  { %2263 = vbcast.lane.b32.xlu1 %v2257_v23, 264 }
 0x3a6   :  { %2186 = vbcast.lane.b32.xlu1 %v2180_v37, 264 }
 0x3aa   :  { %2274 = vbcast.lane.b32.xlu1 %v2268_v26, 264 }
 0x3ab   :  { %v5865_v47 = vpop.xlane.xlu0 %1666 }
 0x3ac   :  { %v1767_v26 = vrot.slane %v5865_v47, %v5926_v12 }
 0x3ad   :  { %v5867_v48 = vpop.xlane.xlu1 %1670 }
 0x3ae   :  { %2197 = vbcast.lane.b32.xlu1 %v2191_v32, 264  ;;  %v1778_v15 = vrot.slane %v5867_v48, %v5926_v12 }
 0x3af   :  { %v5872_v50 = vpop.xlane.xlu0 %1668 }
 0x3b0   :  { %v1772_v16 = vrot.slane %v5872_v50, %v5919_v8 }
 0x3b1   :  { %v5874_v51 = vpop.xlane.xlu1 %1672 }
 0x3b2   :  { %2285 = vbcast.lane.b32.xlu1 %v2279_v1, 264  ;;  %v1782_v13 = vrot.slane %v5874_v51, %v5919_v8  ;;  %v1774_v6 = vsel %vm1773_vm1, %v1772_v16, %v1767_v26 }
 0x3b3   :  { %v5880_v11 = vpop.xlane.xlu0 %1698 }
 0x3b4   :  { %v1783_v32 = vsel %vm1773_vm1, %v1782_v13, %v1778_v15 }
 0x3b5   :  { %v5882_v53 = vpop.xlane.xlu1 %1700  ;;  %v1911_v41 = vsel %vm1910_vm2, %v1783_v32, %v1774_v6 }
 0x3b6   :  { %2208 = vbcast.lane.b32.xlu1 %v5878_v52, 264 }
 0x3b7   :  { %v5885_v54 = vpop.xlane.xlu0 %1674 }
 0x3b8   :  { %v1787_v19 = vrot.slane %v5885_v54, %v5926_v12 }
 0x3b9   :  { %v5887_v56 = vpop.xlane.xlu1 %1676 }
 0x3ba   :  { %v1791_v17 = vrot.slane %v5887_v56, %v5919_v8 }
 0x3bb   :  { %v5889_v57 = vpop.xlane.xlu0 %1682 }
 0x3bc   :  { %v1792_v33 = vsel %vm1773_vm1, %v1791_v17, %v1787_v19 }
 0x3bd   :  { %v5891_v58 = vpop.xlane.xlu1 %1684  ;;  %v1913_v17 = vsel %vm1912_vm3, %v1792_v33, %v1911_v41 }
 0x3be   :  { %v1809_v13 = vrot.slane %v5891_v58, %v5919_v8 }
 0x3bf   :  { %v5893_v59 = vpop.xlane.xlu0 %1702 }
 0x3c1   :  { %v5895_v60 = vpop.xlane.xlu1 %1704 }
 0x3c3   :  { %v5897_v21 = vpop.xlane.xlu0 %1706 }
 0x3c5   :  { %v5899_v62 = vpop.xlane.xlu1 %1708 }
 0x3c7   :  { %v5901_v63 = vpop.xlane.xlu0 %1678 }
 0x3c8   :  { %v1796_v1 = vrot.slane %v5901_v63, %v5926_v12 }
 0x3c9   :  { %v5903_v0 = vpop.xlane.xlu1 %1680 }
 0x3ca   :  { %v1800_v18 = vrot.slane %v5903_v0, %v5919_v8 }
 0x3cb   :  { %v5905_v55 = vpop.xlane.xlu0 %1714 }
 0x3cc   :  { %v1801_v5 = vsel %vm1773_vm1, %v1800_v18, %v1796_v1  ;;  %v1805_v18 = vrot.slane %v5889_v57, %v5926_v12 }
 0x3cd   :  { %v5907_v14 = vpop.xlane.xlu1 %1716  ;;  %v1915_v19 = vsel %vm1914_vm4, %v1801_v5, %v1913_v17 }
 0x3ce   :  { %v1810_v6 = vsel %vm1773_vm1, %v1809_v13, %v1805_v18  ;;  %v1881_v40 = vrot.slane %v5907_v14, %v5919_v8 }
 0x3cf   :  { %v5909_v3 = vpop.xlane.xlu0 %1686  ;;  %v1917_v17 = vsel %vm1916_vm5, %v1810_v6, %v1915_v19  ;;  %v6512_v19 = vmov 0   ;;  %v1845_v6 = vrot.slane %v5882_v53, %v5919_v8 }
 0x3d0   :  { %v1814_v16 = vrot.slane %v5909_v3, %v5926_v12  ;;  %4589 = vset.pattern.permute.xlu1 %v6512_v19  ;;  %4588 = vset.pattern.permute.xlu0 %v6512_v19 }
 0x3d1   :  { %v5911_v4 = vpop.xlane.xlu1 %1688 }
 0x3d2   :  { %v1818_v27 = vrot.slane %v5911_v4, %v5919_v8 }
 0x3d3   :  { %v5914_v34 = vpop.xlane.xlu0 %1690 }
 0x3d4   :  { %v1823_v26 = vrot.slane %v5914_v34, %v5926_v12  ;;  %v1819_v32 = vsel %vm1773_vm1, %v1818_v27, %v1814_v16 }
 0x3d5   :  { %v5916_v7 = vpop.xlane.xlu1 %1692  ;;  %v1919_v27 = vsel %vm1918_vm6, %v1819_v32, %v1917_v17  ;;  %v1863_v32 = vrot.slane %v5899_v62, %v5919_v8 }
 0x3d6   :  { %v1827_v15 = vrot.slane %v5916_v7, %v5919_v8 }
 0x3d7   :  { %v5921_v9 = vpop.xlane.xlu0 %1710 }
 0x3d8   :  { %6533 = vst [vmem:[#allocation36_spill] sm:$0xff] %v5921_v9  ;;  %v1828_v33 = vsel %vm1773_vm1, %v1827_v15, %v1823_v26  ;;  %v2290_v26 = vrot.slane %v5670_v24, %v5870_v49 }
 0x3d9   :  { %v5923_v10 = vpop.xlane.xlu1 %1712  ;;  %v1921_v13 = vsel %vm1920_vm7, %v1828_v33, %v1919_v27  ;;  %v1859_v33 = vrot.slane %v5897_v21, %v5926_v12  ;;  %v1868_v27 = vrot.slane %v5921_v9, %v5926_v12 }
 0x3da   :  { %v1872_v24 = vrot.slane %v5923_v10, %v5919_v8 }
 0x3db   :  { %v5938_v23 = vpop.xlane.xlu0 %1718 }
 0x3dd   :  { %v5942_v37 = vpop.xlane.xlu1 %1720 }
 0x3df   :  { %v5954_v45 = vpop.xlane.xlu0 %1722 }
 0x3e0   :  { %6535 = vst [vmem:[#allocation38_spill] sm:$0xff] %v5954_v45 }
 0x3e1   :  { %v5961_v42 = vpop.xlane.xlu1 %1724 }
 0x3e3   :  { %v5972_v1 = vpop.xlane.xlu0 %1694 }
 0x3e4   :  { %v1832_v39 = vrot.slane %v5972_v1, %v5926_v12 }
 0x3e5   :  { %v5975_v41 = vpop.xlane.xlu1 %1696 }
 0x3e6   :  { %v1836_v5 = vrot.slane %v5975_v41, %v5919_v8 }
 0x3e8   :  { %v1837_v16 = vsel %vm1773_vm1, %v1836_v5, %v1832_v39  ;;  %v1854_v39 = vrot.slane %v5895_v60, %v5919_v8  ;;  %v1841_v5 = vrot.slane %v5880_v11, %v5926_v12 }
 0x3e9   :  { %v1923_v18 = vsel %vm1922_vm8, %v1837_v16, %v1921_v13  ;;  %v1864_v16 = vsel %vm1773_vm1, %v1863_v32, %v1859_v33  ;;  %v1886_v32 = vrot.slane %v5938_v23, %v5926_v12  ;;  %v1895_v33 = vrot.slane %v5954_v45, %v5926_v12 }
 0x3ea   :  { %v1934_v15 = vsel %vm1933_vm9, %v1923_v18, -inf  ;;  %v1846_v13 = vsel %vm1773_vm1, %v1845_v6, %v1841_v5  ;;  %v1873_v18 = vsel %vm1773_vm1, %v1872_v24, %v1868_v27  ;;  %v1877_v6 = vrot.slane %v5905_v55, %v5926_v12  ;;  %v6030_v5 = vpop.xlane.xlu0 %1726 }
 0x3eb   :  { %1935 = vmax.xlane.f32.xlu0 %v1934_v15  ;;  %v1890_v15 = vrot.slane %v5942_v37, %v5919_v8 }
 0x3ec   :  { %v1882_v27 = vsel %vm1773_vm1, %v1881_v40, %v1877_v6 }
 0x401   :  { %2204 = vbcast.lane.b32.xlu0 %v5878_v52, 256  ;;  %v1850_v52 = vrot.slane %v5893_v59, %v5926_v12 }
 0x403   :  { %v1855_v17 = vsel %vm1773_vm1, %v1854_v39, %v1850_v52  ;;  %v1899_v39 = vrot.slane %v5961_v42, %v5919_v8  ;;  %v6020_v52 = vpop.permute.xlu1 %2252 }
 0x404   :  { %v1924_v19 = vsel %vm1910_vm2, %v1855_v17, %v1846_v13  ;;  %6536 = vst [vmem:[#allocation39_spill] sm:$0xff] %v6020_v52  ;;  %v1891_v17 = vsel %vm1773_vm1, %v1890_v15, %v1886_v32 }
 0x405   :  { %2292 = vbcast.lane.b32.xlu0 %v2290_v26, 256  ;;  %v1925_v9 = vsel %vm1912_vm3, %v1864_v16, %v1924_v19  ;;  %v1900_v19 = vsel %vm1773_vm1, %v1899_v39, %v1895_v33  ;;  %v1904_v16 = vrot.slane %v6030_v5, %v5926_v12  ;;  %v6047_v39 = vpop.permute.xlu0 %2248 }
 0x406   :  { %v1926_v24 = vsel %vm1914_vm4, %v1873_v18, %v1925_v9  ;;  %6537 = vst [vmem:[#allocation40_spill] sm:$0xff] %v6047_v39 }
 0x407   :  { %v1927_v9 = vsel %vm1916_vm5, %v1882_v27, %v1926_v24 }
 0x408   :  { %v1928_v18 = vsel %vm1918_vm6, %v1891_v17, %v1927_v9 }
 0x409   :  { %v1929_v15 = vsel %vm1920_vm7, %v1900_v19, %v1928_v18  ;;  %v6049_v6 = vpop.permute.xlu0 %2171 }
 0x40d   :  { %v6051_v33 = vpop.permute.xlu0 %2259 }
 0x40e   :  { %6538 = vst [vmem:[#allocation41_spill] sm:$0xff] %v6051_v33 }
 0x41a   :  { %v6034_v13 = vpop.xlane.xlu1 %1728 }
 0x41b   :  { %v1908_v52 = vrot.slane %v6034_v13, %v5919_v8  ;;  %v6053_v8 = vpop.permute.xlu0 %2182 }
 0x41d   :  { %v1909_v45 = vsel %vm1773_vm1, %v1908_v52, %v1904_v16 }
 0x41e   :  { %v1930_v40 = vsel %vm1922_vm8, %v1909_v45, %v1929_v15 }
 0x41f   :  { %v1937_v32 = vsel %vm1933_vm9, %v1930_v40, -inf  ;;  %v6055_v24 = vpop.permute.xlu0 %2270 }
 0x420   :  { %1938 = vmax.xlane.f32.xlu1 %v1937_v32  ;;  %6539 = vst [vmem:[#allocation42_spill] sm:$0xff] %v6055_v24 }
 0x423   :  { %v6057_v17 = vpop.permute.xlu0 %2193 }
 0x427   :  { %v6059_v52 = vpop.permute.xlu0 %2281 }
 0x428   :  { %6540 = vst [vmem:[#allocation43_spill] sm:$0xff] %v6059_v52 }
 0x431   :  { %2296 = vbcast.lane.b32.xlu1 %v2290_v26, 264 }
 0x478   :  { %v1936_v27 = vpop.xlane.xlu0 %1935 }
 0x479   :  { %v1945_v45 = vrot.slane %v1936_v27, %v5661_v20  ;;  %v1949_v19 = vrot.slane %v1936_v27, %v5666_v22  ;;  %v1953_v26 = vrot.slane %v1936_v27, %v5679_v28  ;;  %v1957_v24 = vrot.slane %v1936_v27, %v5686_v31 }
 0x47b   :  { %v2023_v16 = vsub.f32 %v5872_v50, %v1945_v45  ;;  %v2022_v9 = vsub.f32 %v5865_v47, %v1945_v45  ;;  %v2024_v18 = vsub.f32 %v5867_v48, %v1949_v19  ;;  %v2025_v15 = vsub.f32 %v5874_v51, %v1949_v19  ;;  %v6073_v45 = vpop.permute.xlu1 %2175 }
 0x47c   :  { %v2026_v52 = vsub.f32 %v5885_v54, %v1953_v26  ;;  %v2027_v39 = vsub.f32 %v5887_v56, %v1953_v26  ;;  %v2028_v47 = vsub.f32 %v5901_v63, %v1957_v24  ;;  %v1961_v48 = vrot.slane %v1936_v27, %v5816_v2 }
 0x47d   :  { %v2056_v40 = vmul.f32 1.442695, %v2023_v16  ;;  %v2054_v32 = vmul.f32 1.442695, %v2022_v9  ;;  %v2058_v12 = vmul.f32 1.442695, %v2024_v18  ;;  %v2029_v19 = vsub.f32 %v5903_v0, %v1957_v24 }
 0x47e   :  { %v2060_v33 = vmul.f32 1.442695, %v2025_v15  ;;  %v2062_v50 = vmul.f32 1.442695, %v2026_v52  ;;  %v2064_v51 = vmul.f32 1.442695, %v2027_v39  ;;  %v2030_v16 = vsub.f32 %v5889_v57, %v1961_v48 }
 0x47f   :  { %5033 = vpow2.f32 %v2056_v40  ;;  %v2066_v54 = vmul.f32 1.442695, %v2028_v47  ;;  %v1965_v56 = vrot.slane %v1936_v27, %v5823_v25  ;;  %v2068_v26 = vmul.f32 1.442695, %v2029_v19  ;;  %v6079_v52 = vpop.permute.xlu1 %2263 }
 0x480   :  { %5035 = vpow2.f32 %v2054_v32  ;;  %v2070_v9 = vmul.f32 1.442695, %v2030_v16  ;;  %v1969_v39 = vrot.slane %v1936_v27, %v5830_v29  ;;  %v1973_v32 = vrot.slane %v1936_v27, %v5870_v49 }
 0x481   :  { %5037 = vpow2.f32 %v2058_v12  ;;  %v2031_v12 = vsub.f32 %v5891_v58, %v1961_v48  ;;  %v2033_v18 = vsub.f32 %v5911_v4, %v1965_v56 }
 0x482   :  { %5039 = vpow2.f32 %v2060_v33  ;;  %v2032_v33 = vsub.f32 %v5909_v3, %v1965_v56  ;;  %v2036_v27 = vsub.f32 %v5972_v1, %v1973_v32 }
 0x483   :  { %5041 = vpow2.f32 %v2062_v50  ;;  %v2072_v57 = vmul.f32 1.442695, %v2031_v12  ;;  %v2187_v50 = vpop.permute.xlu1 %2186  ;;  %v2076_v4 = vmul.f32 1.442695, %v2033_v18 }
 0x484   :  { %5043 = vpow2.f32 %v2064_v51  ;;  %v2074_v3 = vmul.f32 1.442695, %v2032_v33  ;;  %v2082_v1 = vmul.f32 1.442695, %v2036_v27 }
 0x485   :  { %5045 = vpow2.f32 %v2066_v54 }
 0x486   :  { %5047 = vpow2.f32 %v2068_v26 }
 0x487   :  { %5049 = vpow2.f32 %v2070_v9  ;;  %v6111_v26 = vpop.permute.xlu1 %2274 }
 0x488   :  { %5051 = vpow2.f32 %v2072_v57 }
 0x489   :  { %v5034_v63 = vpop.eup %5033  ;;  %5053 = vpow2.f32 %v2074_v3 }
 0x48a   :  { %v5036_v0 = vpop.eup %5035  ;;  %v6084_v24 = vmul.f32 %v5034_v63, %v5832_v30  ;;  %v2034_v30 = vsub.f32 %v5914_v34, %v1969_v39  ;;  %5055 = vpow2.f32 %v2076_v4 }
 0x48b   :  { %v5038_v15 = vpop.eup %5037  ;;  %v6088_v58 = vmul.f32 %v5036_v0, %v5840_v61  ;;  %v2035_v61 = vsub.f32 %v5916_v7, %v1969_v39  ;;  %v2037_v7 = vsub.f32 %v5975_v41, %v1973_v32  ;;  %v2198_v9 = vpop.permute.xlu1 %2197 }
 0x48c   :  { %v5040_v40 = vpop.eup %5039  ;;  %2398 = vperm.xlu1 %4589, %v6084_v24   ;;  %v6095_v47 = vmul.f32 %v5038_v15, %v5836_v35  ;;  %v2078_v34 = vmul.f32 1.442695, %v2034_v30  ;;  %v2205_v32 = vpop.permute.xlu0 %2204 }
 0x48d   :  { %2395 = vperm.xlu0 %4588, %v6088_v58   ;;  %v5042_v48 = vpop.eup %5041  ;;  %v6099_v51 = vmul.f32 %v5040_v40, %v5842_v36  ;;  %v2080_v54 = vmul.f32 1.442695, %v2035_v61  ;;  %v2084_v12 = vmul.f32 1.442695, %v2037_v7 }
 0x48e   :  { %v5044_v19 = vpop.eup %5043  ;;  %v6105_v35 = vmul.f32 %v5042_v48, %v5853_v43  ;;  %5057 = vpow2.f32 %v2078_v34 }
 0x48f   :  { %v5046_v16 = vpop.eup %5045  ;;  %v6109_v36 = vmul.f32 %v5044_v19, %v5855_v44  ;;  %5059 = vpow2.f32 %v2080_v54  ;;  %v6136_v40 = vpop.permute.xlu1 %2285 }
 0x490   :  { %2401 = vperm.xlu1 %4589, %v6095_v47   ;;  %v5048_v56 = vpop.eup %5047  ;;  %v6116_v43 = vmul.f32 %v5046_v16, %v5861_v38  ;;  %5061 = vpow2.f32 %v2082_v1 }
 0x491   :  { %2404 = vperm.xlu0 %4588, %v6099_v51   ;;  %v5050_v63 = vpop.eup %5049  ;;  %v6119_v41 = vmul.f32 %v5048_v56, %v5863_v46  ;;  %5063 = vpow2.f32 %v2084_v12 }
 0x492   :  { %v5052_v44 = vpop.eup %5051  ;;  %v6124_v33 = vmul.f32 %v5050_v63, %v6049_v6 }
 0x493   :  { %v5054_v39 = vpop.eup %5053  ;;  %v6127_v38 = vmul.f32 %v5052_v44, %v6073_v45 }
 0x494   :  { %2407 = vperm.xlu1 %4589, %v6105_v35   ;;  %v5056_v0 = vpop.eup %5055  ;;  %v6132_v46 = vmul.f32 %v5054_v39, %v6053_v8  ;;  %v2209_v8 = vpop.permute.xlu1 %2208  ;;  %v6541_v39 = vld [vmem:[#allocation36_spill] sm:$0xff] }
 0x495   :  { %2410 = vperm.xlu0 %4588, %v6109_v36   ;;  %v6134_v18 = vmul.f32 %v5056_v0, %v2187_v50 }
 0x498   :  { %2413 = vperm.xlu1 %4589, %v6116_v43   ;;  %v5058_v57 = vpop.eup %5057 }
 0x499   :  { %2416 = vperm.xlu0 %4588, %v6119_v41   ;;  %v5060_v15 = vpop.eup %5059  ;;  %v6141_v6 = vmul.f32 %v5058_v57, %v6057_v17 }
 0x49a   :  { %v5062_v45 = vpop.eup %5061  ;;  %v6143_v3 = vmul.f32 %v5060_v15, %v2198_v9 }
 0x49b   :  { %v5064_v30 = vpop.eup %5063  ;;  %v6147_v50 = vmul.f32 %v5062_v45, %v2205_v32 }
 0x49c   :  { %2419 = vperm.xlu1 %4589, %v6124_v33   ;;  %v6149_v4 = vmul.f32 %v5064_v30, %v2209_v8 }
 0x49d   :  { %2422 = vperm.xlu0 %4588, %v6127_v38  }
 0x4a0   :  { %2425 = vperm.xlu1 %4589, %v6132_v46  }
 0x4a1   :  { %2428 = vperm.xlu0 %4588, %v6134_v18  }
 0x4a4   :  { %2431 = vperm.xlu1 %4589, %v6141_v6  }
 0x4a5   :  { %2434 = vperm.xlu0 %4588, %v6143_v3  }
 0x4a8   :  { %2437 = vperm.xlu1 %4589, %v6147_v50  }
 0x4a9   :  { %2440 = vperm.xlu0 %4588, %v6149_v4  }
 0x4ad   :  { %v1939_v17 = vpop.xlane.xlu1 %1938 }
 0x4ae   :  { %v1977_v61 = vrot.slane %v1939_v17, %v5661_v20  ;;  %v1981_v48 = vrot.slane %v1939_v17, %v5666_v22  ;;  %v1985_v34 = vrot.slane %v1939_v17, %v5679_v28  ;;  %v1989_v63 = vrot.slane %v1939_v17, %v5686_v31 }
 0x4af   :  { %v1997_v15 = vrot.slane %v1939_v17, %v5823_v25  ;;  %v2001_v8 = vrot.slane %v1939_v17, %v5830_v29 }
 0x4b0   :  { %v2039_v19 = vsub.f32 %v5882_v53, %v1977_v61  ;;  %v2038_v27 = vsub.f32 %v5880_v11, %v1977_v61  ;;  %v2041_v54 = vsub.f32 %v5895_v60, %v1981_v48  ;;  %v2040_v7 = vsub.f32 %v5893_v59, %v1981_v48  ;;  %v6542_v48 = vld [vmem:[#allocation30_spill] sm:$0xff] }
 0x4b1   :  { %v2043_v12 = vsub.f32 %v5899_v62, %v1985_v34  ;;  %v2042_v9 = vsub.f32 %v5897_v21, %v1985_v34  ;;  %v2045_v53 = vsub.f32 %v5923_v10, %v1989_v63  ;;  %v1993_v60 = vrot.slane %v1939_v17, %v5816_v2 }
 0x4b2   :  { %v2088_v16 = vmul.f32 1.442695, %v2039_v19  ;;  %v2086_v56 = vmul.f32 1.442695, %v2038_v27  ;;  %v2092_v1 = vmul.f32 1.442695, %v2041_v54  ;;  %v2044_v0 = vsub.f32 %v6541_v39, %v1989_v63 }
 0x4b3   :  { %v2090_v44 = vmul.f32 1.442695, %v2040_v7  ;;  %v2096_v11 = vmul.f32 1.442695, %v2043_v12  ;;  %v2094_v59 = vmul.f32 1.442695, %v2042_v9  ;;  %v2047_v62 = vsub.f32 %v5907_v14, %v1993_v60 }
 0x4b4   :  { %5065 = vpow2.f32 %v2088_v16  ;;  %v2100_v57 = vmul.f32 1.442695, %v2045_v53  ;;  %v2098_v21 = vmul.f32 1.442695, %v2044_v0  ;;  %v2046_v45 = vsub.f32 %v5905_v55, %v1993_v60  ;;  %v6543_v54 = vld [vmem:[#allocation29_spill] sm:$0xff]  ;;  %v6545_v63 = vld [vmem:[#allocation38_spill] sm:$0xff] }
 0x4b5   :  { %5067 = vpow2.f32 %v2086_v56  ;;  %v2104_v30 = vmul.f32 1.442695, %v2047_v62  ;;  %v2049_v10 = vsub.f32 %v5942_v37, %v1997_v15  ;;  %v2048_v14 = vsub.f32 %v5938_v23, %v1997_v15  ;;  %v6547_v39 = vld [vmem:[#allocation34_spill] sm:$0xff]  ;;  %v6548_v15 = vld [vmem:[#allocation33_spill] sm:$0xff] }
 0x4b6   :  { %5069 = vpow2.f32 %v2092_v1  ;;  %v2102_v27 = vmul.f32 1.442695, %v2046_v45  ;;  %v2005_v16 = vrot.slane %v1939_v17, %v5870_v49  ;;  %v2051_v56 = vsub.f32 %v5961_v42, %v2001_v8  ;;  %v6544_v1 = vld [vmem:[#allocation32_spill] sm:$0xff] }
 0x4b7   :  { %5071 = vpow2.f32 %v2090_v44  ;;  %v2108_v37 = vmul.f32 1.442695, %v2049_v10  ;;  %v2106_v23 = vmul.f32 1.442695, %v2048_v14  ;;  %v2050_v44 = vsub.f32 %v6545_v63, %v2001_v8  ;;  %v6550_v8 = vld [vmem:[#allocation40_spill] sm:$0xff] }
 0x4b8   :  { %5073 = vpow2.f32 %v2096_v11  ;;  %v6546_v11 = vld [vmem:[#allocation31_spill] sm:$0xff]  ;;  %v2053_v17 = vsub.f32 %v6034_v13, %v2005_v16  ;;  %v2112_v42 = vmul.f32 1.442695, %v2051_v56  ;;  %v6552_v56 = vld [vmem:[#allocation42_spill] sm:$0xff] }
 0x4b9   :  { %5075 = vpow2.f32 %v2094_v59  ;;  %v2052_v59 = vsub.f32 %v6030_v5, %v2005_v16 }
 0x4ba   :  { %5077 = vpow2.f32 %v2100_v57  ;;  %v2110_v57 = vmul.f32 1.442695, %v2050_v44  ;;  %v2297_v44 = vpop.permute.xlu1 %2296 }
 0x4bb   :  { %5079 = vpow2.f32 %v2098_v21  ;;  %v2114_v13 = vmul.f32 1.442695, %v2052_v59 }
 0x4bc   :  { %5081 = vpow2.f32 %v2104_v30  ;;  %v6549_v30 = vld [vmem:[#allocation39_spill] sm:$0xff] }
 0x4bd   :  { %5083 = vpow2.f32 %v2102_v27 }
 0x4be   :  { %v5066_v32 = vpop.eup %5065  ;;  %5085 = vpow2.f32 %v2108_v37 }
 0x4bf   :  { %v5068_v61 = vpop.eup %5067  ;;  %v6172_v19 = vmul.f32 %v5066_v32, %v6542_v48  ;;  %5087 = vpow2.f32 %v2106_v23  ;;  %v2116_v32 = vmul.f32 1.442695, %v2053_v17 }
 0x4c0   :  { %v5070_v34 = vpop.eup %5069  ;;  %v6176_v7 = vmul.f32 %v5068_v61, %v6543_v54  ;;  %5089 = vpow2.f32 %v2112_v42 }
 0x4c1   :  { %v5072_v55 = vpop.eup %5071  ;;  %2446 = vperm.xlu0 %4588, %v6172_v19   ;;  %v6183_v12 = vmul.f32 %v5070_v34, %v6544_v1  ;;  %5091 = vpow2.f32 %v2110_v57  ;;  %v6551_v34 = vld [vmem:[#allocation41_spill] sm:$0xff] }
 0x4c2   :  { %2443 = vperm.xlu1 %4589, %v6176_v7   ;;  %v5074_v9 = vpop.eup %5073  ;;  %v6187_v53 = vmul.f32 %v5072_v55, %v6546_v11  ;;  %5093 = vpow2.f32 %v2116_v32 }
 0x4c3   :  { %v5076_v60 = vpop.eup %5075  ;;  %v6194_v0 = vmul.f32 %v5074_v9, %v6547_v39  ;;  %5095 = vpow2.f32 %v2114_v13  ;;  %v6553_v9 = vld [vmem:[#allocation43_spill] sm:$0xff] }
 0x4c4   :  { %v5078_v62 = vpop.eup %5077  ;;  %v6197_v21 = vmul.f32 %v5076_v60, %v6548_v15 }
 0x4c5   :  { %2452 = vperm.xlu0 %4588, %v6183_v12   ;;  %v5080_v45 = vpop.eup %5079  ;;  %v6202_v10 = vmul.f32 %v5078_v62, %v6549_v30 }
 0x4c6   :  { %2449 = vperm.xlu1 %4589, %v6187_v53   ;;  %v5082_v5 = vpop.eup %5081  ;;  %v6205_v61 = vmul.f32 %v5080_v45, %v6550_v8 }
 0x4c7   :  { %v5084_v48 = vpop.eup %5083  ;;  %v6210_v27 = vmul.f32 %v5082_v5, %v6079_v52  ;;  %v6555_v5 = vld [vmem:[#allocation37_spill] sm:$0xff] }
 0x4c8   :  { %v5086_v14 = vpop.eup %5085  ;;  %v6213_v54 = vmul.f32 %v5084_v48, %v6551_v34  ;;  %v6556_v48 = vld [vmem:[#allocation35_spill] sm:$0xff] }
 0x4c9   :  { %2458 = vperm.xlu0 %4588, %v6194_v0   ;;  %v5088_v55 = vpop.eup %5087  ;;  %v6218_v16 = vmul.f32 %v5086_v14, %v6111_v26  ;;  %v2293_v26 = vpop.permute.xlu0 %2292 }
 0x4ca   :  { %2455 = vperm.xlu1 %4589, %v6197_v21   ;;  %v5090_v37 = vpop.eup %5089  ;;  %v6221_v1 = vmul.f32 %v5088_v55, %v6552_v56 }
 0x4cb   :  { %v5092_v23 = vpop.eup %5091  ;;  %v6226_v52 = vmul.f32 %v5090_v37, %v6136_v40 }
 0x4cc   :  { %v5094_v63 = vpop.eup %5093  ;;  %v6229_v11 = vmul.f32 %v5092_v23, %v6553_v9 }
 0x4cd   :  { %2464 = vperm.xlu0 %4588, %v6202_v10   ;;  %v5096_v60 = vpop.eup %5095  ;;  %v6233_v17 = vmul.f32 %v5094_v63, %v2297_v44 }
 0x4ce   :  { %2461 = vperm.xlu1 %4589, %v6205_v61   ;;  %v6235_v42 = vmul.f32 %v5096_v60, %v2293_v26 }
 0x4d0   :  { %6554 = vst [vmem:[#allocation36_spill] sm:$0xff] %v6235_v42 }
 0x4d1   :  { %2470 = vperm.xlu0 %4588, %v6210_v27  }
 0x4d2   :  { %2467 = vperm.xlu1 %4589, %v6213_v54  }
 0x4d5   :  { %2476 = vperm.xlu0 %4588, %v6218_v16  }
 0x4d6   :  { %2473 = vperm.xlu1 %4589, %v6221_v1  }
 0x4d9   :  { %2482 = vperm.xlu0 %4588, %v6226_v52  }
 0x4da   :  { %2479 = vperm.xlu1 %4589, %v6229_v11  }
 0x4dd   :  { %2488 = vperm.xlu0 %4588, %v6233_v17  }
 0x4de   :  { %2485 = vperm.xlu1 %4589, %v6235_v42  }
 0x50b   :  { %v2399_v40 = vpop.permute.xlu1 %2398 }
 0x50c   :  { %v2396_v59 = vpop.permute.xlu0 %2395  ;;  %v2497_v23 = vrot.slane %v2399_v40, %v6556_v48 }
 0x50d   :  { %v2493_v63 = vrot.slane %v2396_v59, %v6555_v5 }
 0x50f   :  { %v2402_v39 = vpop.permute.xlu1 %2401 }
 0x510   :  { %v2405_v57 = vpop.permute.xlu0 %2404  ;;  %v2502_v8 = vrot.slane %v2402_v39, %v6555_v5 }
 0x511   :  { %v2506_v14 = vrot.slane %v2405_v57, %v6556_v48 }
 0x513   :  { %v2408_v62 = vpop.permute.xlu1 %2407  ;;  %v2507_v39 = vsel %vm1773_vm1, %v2506_v14, %v2502_v8 }
 0x514   :  { %v2411_v15 = vpop.permute.xlu0 %2410  ;;  %v2511_v55 = vrot.slane %v2408_v62, %v6555_v5 }
 0x515   :  { %v2515_v37 = vrot.slane %v2411_v15, %v6556_v48 }
 0x517   :  { %v2414_v45 = vpop.permute.xlu1 %2413  ;;  %v2516_v42 = vsel %vm1773_vm1, %v2515_v37, %v2511_v55 }
 0x518   :  { %v2417_v32 = vpop.permute.xlu0 %2416  ;;  %v2520_v44 = vrot.slane %v2414_v45, %v6555_v5  ;;  %v2498_v45 = vsel %vm1773_vm1, %v2497_v23, %v2493_v63 }
 0x519   :  { %v2524_v9 = vrot.slane %v2417_v32, %v6556_v48 }
 0x51b   :  { %v2420_v13 = vpop.permute.xlu1 %2419  ;;  %v2525_v32 = vsel %vm1773_vm1, %v2524_v9, %v2520_v44 }
 0x51c   :  { %v2423_v30 = vpop.permute.xlu0 %2422  ;;  %v2529_v60 = vrot.slane %v2420_v13, %v6555_v5 }
 0x51d   :  { %v2533_v26 = vrot.slane %v2423_v30, %v6556_v48  ;;  %v2634_v30 = vsel %vm1910_vm2, %v2507_v39, %v2498_v45 }
 0x51e   :  { %v2635_v14 = vsel %vm1912_vm3, %v2516_v42, %v2634_v30 }
 0x51f   :  { %v2426_v34 = vpop.permute.xlu1 %2425  ;;  %v2534_v8 = vsel %vm1773_vm1, %v2533_v26, %v2529_v60  ;;  %v2636_v55 = vsel %vm1914_vm4, %v2525_v32, %v2635_v14 }
 0x520   :  { %v2429_v56 = vpop.permute.xlu0 %2428  ;;  %v2538_v57 = vrot.slane %v2426_v34, %v6555_v5  ;;  %v2637_v63 = vsel %vm1916_vm5, %v2534_v8, %v2636_v55 }
 0x521   :  { %v2542_v62 = vrot.slane %v2429_v56, %v6556_v48 }
 0x523   :  { %v2432_v15 = vpop.permute.xlu1 %2431  ;;  %v2543_v34 = vsel %vm1773_vm1, %v2542_v62, %v2538_v57 }
 0x524   :  { %v2547_v40 = vrot.slane %v2432_v15, %v6555_v5  ;;  %v2435_v59 = vpop.permute.xlu0 %2434  ;;  %v2638_v9 = vsel %vm1918_vm6, %v2543_v34, %v2637_v63 }
 0x525   :  { %v2551_v13 = vrot.slane %v2435_v59, %v6556_v48 }
 0x527   :  { %v2438_v56 = vpop.permute.xlu1 %2437  ;;  %v2552_v37 = vsel %vm1773_vm1, %v2551_v13, %v2547_v40 }
 0x528   :  { %v2556_v15 = vrot.slane %v2438_v56, %v6555_v5  ;;  %v2441_v23 = vpop.permute.xlu0 %2440  ;;  %v2639_v42 = vsel %vm1920_vm7, %v2552_v37, %v2638_v9 }
 0x529   :  { %v2560_v44 = vrot.slane %v2441_v23, %v6556_v48 }
 0x52b   :  { %v2561_v60 = vsel %vm1773_vm1, %v2560_v44, %v2556_v15 }
 0x52c   :  { %v2640_v26 = vsel %vm1922_vm8, %v2561_v60, %v2639_v42 }
 0x52d   :  { %v2650_v39 = vsel %vm1933_vm9, %v2640_v26, 0.0 }
 0x52e   :  { %2651 = vadd.xlane.f32.xlu1 %v2650_v39 }
 0x540   :  { %v2447_v57 = vpop.permute.xlu0 %2446 }
 0x541   :  { %v2444_v62 = vpop.permute.xlu1 %2443  ;;  %v2569_v44 = vrot.slane %v2447_v57, %v6556_v48 }
 0x542   :  { %v2565_v63 = vrot.slane %v2444_v62, %v6555_v5 }
 0x544   :  { %v2453_v40 = vpop.permute.xlu0 %2452 }
 0x545   :  { %v2450_v59 = vpop.permute.xlu1 %2449  ;;  %v2578_v56 = vrot.slane %v2453_v40, %v6556_v48 }
 0x546   :  { %v2574_v34 = vrot.slane %v2450_v59, %v6555_v5 }
 0x548   :  { %v2459_v45 = vpop.permute.xlu0 %2458  ;;  %v2579_v39 = vsel %vm1773_vm1, %v2578_v56, %v2574_v34 }
 0x549   :  { %v2456_v32 = vpop.permute.xlu1 %2455  ;;  %v2587_v15 = vrot.slane %v2459_v45, %v6556_v48 }
 0x54a   :  { %v2583_v37 = vrot.slane %v2456_v32, %v6555_v5 }
 0x54c   :  { %v2465_v13 = vpop.permute.xlu0 %2464  ;;  %v2588_v32 = vsel %vm1773_vm1, %v2587_v15, %v2583_v37 }
 0x54d   :  { %v2462_v30 = vpop.permute.xlu1 %2461  ;;  %v2596_v60 = vrot.slane %v2465_v13, %v6556_v48 }
 0x54e   :  { %v2592_v9 = vrot.slane %v2462_v30, %v6555_v5  ;;  %v2570_v30 = vsel %vm1773_vm1, %v2569_v44, %v2565_v63 }
 0x550   :  { %v2471_v8 = vpop.permute.xlu0 %2470  ;;  %v2597_v13 = vsel %vm1773_vm1, %v2596_v60, %v2592_v9 }
 0x551   :  { %v2468_v14 = vpop.permute.xlu1 %2467  ;;  %v2605_v26 = vrot.slane %v2471_v8, %v6556_v48  ;;  %v2641_v8 = vsel %vm1910_vm2, %v2579_v39, %v2570_v30 }
 0x552   :  { %v2601_v42 = vrot.slane %v2468_v14, %v6555_v5  ;;  %v2642_v56 = vsel %vm1912_vm3, %v2588_v32, %v2641_v8 }
 0x553   :  { %v2643_v37 = vsel %vm1914_vm4, %v2597_v13, %v2642_v56 }
 0x554   :  { %v2477_v55 = vpop.permute.xlu0 %2476  ;;  %v2606_v34 = vsel %vm1773_vm1, %v2605_v26, %v2601_v42 }
 0x555   :  { %v2474_v23 = vpop.permute.xlu1 %2473  ;;  %v2614_v59 = vrot.slane %v2477_v55, %v6556_v48  ;;  %v2644_v44 = vsel %vm1916_vm5, %v2606_v34, %v2643_v37 }
 0x556   :  { %v2610_v40 = vrot.slane %v2474_v23, %v6555_v5 }
 0x558   :  { %v2483_v45 = vpop.permute.xlu0 %2482  ;;  %v2615_v55 = vsel %vm1773_vm1, %v2614_v59, %v2610_v40 }
 0x559   :  { %v2480_v62 = vpop.permute.xlu1 %2479  ;;  %v2623_v57 = vrot.slane %v2483_v45, %v6556_v48  ;;  %v2645_v60 = vsel %vm1918_vm6, %v2615_v55, %v2644_v44  ;;  %v4798_v44 = vld [vmem:[#allocation14 + $0xc] ss:$16 sps:$4 sm:$0xff]  }
 0x55a   :  { %v2619_v14 = vrot.slane %v2480_v62, %v6555_v5  ;;  %3888 = vmatprep.subr.bf16.mxu0 %v4798_v44  ;;  %v4852_v44 = vld [vmem:[#allocation14 + $0x12c] ss:$16 sps:$4 sm:$0xff]  }
 0x55c   :  { %v2489_v23 = vpop.permute.xlu0 %2488  ;;  %v2624_v15 = vsel %vm1773_vm1, %v2623_v57, %v2619_v14 }
 0x55d   :  { %v2486_v45 = vpop.permute.xlu1 %2485  ;;  %v2632_v63 = vrot.slane %v2489_v23, %v6556_v48  ;;  %v2646_v26 = vsel %vm1920_vm7, %v2624_v15, %v2645_v60  ;;  %v4799_v60 = vld [vmem:[#allocation14 + $0x20] ss:$16 sps:$4 sm:$0xff]  }
 0x55e   :  { %v2628_v9 = vrot.slane %v2486_v45, %v6555_v5  ;;  %v4795_v45 = vld [vmem:[#allocation14 + $0x4] ss:$16 sps:$4 sm:$0xff]  }
 0x55f   :  { %3802 = vmatprep.subr.bf16.mxu1 %v4795_v45  ;;  %v4846_v45 = vld [vmem:[#allocation14 + $0x10c] ss:$16 sps:$4 sm:$0xff]  }
 0x560   :  { %v2633_v42 = vsel %vm1773_vm1, %v2632_v63, %v2628_v9  ;;  %v4796_v63 = vld [vmem:[#allocation14 + $0x8] ss:$16 sps:$4 sm:$0xff]   ;;  %v4801_v9 = vld [vmem:[#allocation14 + $0x24] ss:$16 sps:$4 sm:$0xff]  }
 0x561   :  { %v2647_v39 = vsel %vm1922_vm8, %v2633_v42, %v2646_v26  ;;  %3889 = vmatpush1.bf16.msra.mxu0 %v4796_v63  ;;  %v4849_v63 = vld [vmem:[#allocation14 + $0x124] ss:$16 sps:$4 sm:$0xff]  }
 0x562   :  { %v2653_v40 = vsel %vm1933_vm9, %v2647_v39, 0.0 }
 0x563   :  { %2654 = vadd.xlane.f32.xlu0 %v2653_v40  ;;  %v4807_v40 = vld [vmem:[#allocation14 + $0x44] ss:$16 sps:$4 sm:$0xff]  }
 0x5bb   :  { %v2652_v59 = vpop.xlane.xlu1 %2651 }
 0x5bc   :  { %5097 = vrcp.f32 %v2652_v59  ;;  %v4810_v59 = vld [vmem:[#allocation14 + $0x4c] ss:$16 sps:$4 sm:$0xff]  }
 0x5c6   :  { %v5098_v32 = vpop.eup %5097 }
 0x5c7   :  { %v2663_v48 = vrot.slane %v5098_v32, %v5661_v20  ;;  %v2667_v57 = vrot.slane %v5098_v32, %v5666_v22  ;;  %v2671_v14 = vrot.slane %v5098_v32, %v5679_v28 }
 0x5c9   :  { %v2741_v62 = vmul.f32 %v2663_v48, %v6084_v24  ;;  %v2740_v5 = vmul.f32 %v2663_v48, %v6088_v58  ;;  %v2742_v30 = vmul.f32 %v2667_v57, %v6095_v47  ;;  %v2743_v13 = vmul.f32 %v2667_v57, %v6099_v51  ;;  %v4808_v48 = vld [vmem:[#allocation14 + $0x48] ss:$16 sps:$4 sm:$0xff]  }
 0x5ca   :  { %v2744_v8 = vmul.f32 %v2671_v14, %v6105_v35  ;;  %v2745_v34 = vmul.f32 %v2671_v14, %v6109_v36  ;;  %v2675_v24 = vrot.slane %v5098_v32, %v5686_v31  ;;  %v2679_v47 = vrot.slane %v5098_v32, %v5816_v2 }
 0x5cb   :  { %2843 = vperm.xlu1 %4589, %v2741_v62   ;;  %2838 = vperm.xlu0 %4588, %v2740_v5   ;;  %v2683_v35 = vrot.slane %v5098_v32, %v5823_v25  ;;  %v4813_v62 = vld [vmem:[#allocation14 + $0x64] ss:$16 sps:$4 sm:$0xff]  }
 0x5cc   :  { %v2746_v58 = vmul.f32 %v2675_v24, %v6116_v43  ;;  %v2747_v56 = vmul.f32 %v2675_v24, %v6119_v41  ;;  %v2748_v51 = vmul.f32 %v2679_v47, %v6124_v33  ;;  %v2749_v55 = vmul.f32 %v2679_v47, %v6127_v38  ;;  %v4817_v47 = vld [vmem:[#allocation14 + $0x80] ss:$16 sps:$4 sm:$0xff]  }
 0x5cd   :  { %v2750_v36 = vmul.f32 %v2683_v35, %v6132_v46  ;;  %v2751_v23 = vmul.f32 %v2683_v35, %v6134_v18  ;;  %v2687_v43 = vrot.slane %v5098_v32, %v5830_v29  ;;  %v2691_v33 = vrot.slane %v5098_v32, %v5870_v49  ;;  %v4793_v18 = vld [vmem:[#allocation14] ss:$16 sps:$4 sm:$0xff]   ;;  %v4828_v35 = vld [vmem:[#allocation14 + $0xac] ss:$16 sps:$4 sm:$0xff]  }
 0x5ce   :  { %3803 = vmatpush1.bf16.msra.mxu1 %v4793_v18  ;;  %v4805_v32 = vld [vmem:[#allocation14 + $0x40] ss:$16 sps:$4 sm:$0xff]   ;;  %v4844_v18 = vld [vmem:[#allocation14 + $0x108] ss:$16 sps:$4 sm:$0xff]  }
 0x5cf   :  { %2848 = vperm.xlu1 %4589, %v2742_v30   ;;  %2853 = vperm.xlu0 %4588, %v2743_v13   ;;  %v2752_v41 = vmul.f32 %v2687_v43, %v6141_v6  ;;  %v2753_v37 = vmul.f32 %v2687_v43, %v6143_v3  ;;  %v2754_v38 = vmul.f32 %v2691_v33, %v6147_v50  ;;  %v4804_v6 = vld [vmem:[#allocation14 + $0x2c] ss:$16 sps:$4 sm:$0xff]   ;;  %v4811_v30 = vld [vmem:[#allocation14 + $0x60] ss:$16 sps:$4 sm:$0xff]   ;;  %v4814_v13 = vld [vmem:[#allocation14 + $0x68] ss:$16 sps:$4 sm:$0xff]  }
 0x5d0   :  { %v2755_v15 = vmul.f32 %v2691_v33, %v6149_v4  ;;  %3804 = vmatprep.subr.bf16.mxu1 %v4801_v9  ;;  %v4802_v4 = vld [vmem:[#allocation14 + $0x28] ss:$16 sps:$4 sm:$0xff]   ;;  %3890 = vmatprep.subr.bf16.mxu0 %v4804_v6  ;;  %v4837_v33 = vld [vmem:[#allocation14 + $0xe4] ss:$16 sps:$4 sm:$0xff]   ;;  %v4847_v9 = vld [vmem:[#allocation14 + $0x120] ss:$16 sps:$4 sm:$0xff]  }
 0x5d1   :  { %3891 = vmatpush1.bf16.msra.mxu0 %v4802_v4  ;;  %v4850_v6 = vld [vmem:[#allocation14 + $0x128] ss:$16 sps:$4 sm:$0xff]  }
 0x5d2   :  { %3805 = vmatpush1.bf16.msra.mxu1 %v4799_v60  ;;  %3892 = vmatprep.subr.bf16.mxu0 %v4810_v59  ;;  %v4853_v60 = vld [vmem:[#allocation14 + $0x140] ss:$16 sps:$4 sm:$0xff]   ;;  %v4856_v4 = vld [vmem:[#allocation14 + $0x148] ss:$16 sps:$4 sm:$0xff]   ;;  %v4867_v59 = vld [vmem:[#allocation14 + $0x184] ss:$16 sps:$4 sm:$0xff]  }
 0x5d3   :  { %2858 = vperm.xlu1 %4589, %v2744_v8   ;;  %2863 = vperm.xlu0 %4588, %v2745_v34  }
 0x5d4   :  { %3806 = vmatprep.subr.bf16.mxu1 %v4807_v40  ;;  %v4862_v40 = vld [vmem:[#allocation14 + $0x168] ss:$16 sps:$4 sm:$0xff]  }
 0x5d5   :  { %3893 = vmatpush1.bf16.msra.mxu0 %v4808_v48  ;;  %v4865_v48 = vld [vmem:[#allocation14 + $0x180] ss:$16 sps:$4 sm:$0xff]  }
 0x5d6   :  { %3807 = vmatpush1.bf16.msra.mxu1 %v4805_v32  ;;  %v4870_v32 = vld [vmem:[#allocation14 + $0x18c] ss:$16 sps:$4 sm:$0xff]  }
 0x5d7   :  { %2868 = vperm.xlu1 %4589, %v2746_v58   ;;  %2873 = vperm.xlu0 %4588, %v2747_v56  }
 0x5d8   :  { %3808 = vmatprep.subr.bf16.mxu1 %v4813_v62  ;;  %v4868_v62 = vld [vmem:[#allocation14 + $0x188] ss:$16 sps:$4 sm:$0xff]  }
 0x5da   :  { %3809 = vmatpush1.bf16.msra.mxu1 %v4811_v30  ;;  %v4879_v30 = vld [vmem:[#allocation14 + $0x1c4] ss:$16 sps:$4 sm:$0xff]  }
 0x5db   :  { %2878 = vperm.xlu1 %4589, %v2748_v51   ;;  %2883 = vperm.xlu0 %4588, %v2749_v55   ;;  %v4820_v51 = vld [vmem:[#allocation14 + $0x88] ss:$16 sps:$4 sm:$0xff]   ;;  %v4822_v55 = vld [vmem:[#allocation14 + $0x8c] ss:$16 sps:$4 sm:$0xff]  }
 0x5df   :  { %2888 = vperm.xlu1 %4589, %v2750_v36   ;;  %2893 = vperm.xlu0 %4588, %v2751_v23   ;;  %v6557_v23 = vld [vmem:[#allocation36_spill] sm:$0xff] }
 0x5e3   :  { %2898 = vperm.xlu1 %4589, %v2752_v41   ;;  %2903 = vperm.xlu0 %4588, %v2753_v37   ;;  %v4834_v41 = vld [vmem:[#allocation14 + $0xcc] ss:$16 sps:$4 sm:$0xff]   ;;  %v4835_v37 = vld [vmem:[#allocation14 + $0xe0] ss:$16 sps:$4 sm:$0xff]  }
 0x5e7   :  { %2908 = vperm.xlu1 %4589, %v2754_v38   ;;  %2913 = vperm.xlu0 %4588, %v2755_v15   ;;  %v4838_v38 = vld [vmem:[#allocation14 + $0xe8] ss:$16 sps:$4 sm:$0xff]   ;;  %v4841_v15 = vld [vmem:[#allocation14 + $0x100] ss:$16 sps:$4 sm:$0xff]  }
 0x5f0   :  { %v2655_v46 = vpop.xlane.xlu0 %2654 }
 0x5f1   :  { %5099 = vrcp.f32 %v2655_v46  ;;  %v4843_v46 = vld [vmem:[#allocation14 + $0x104] ss:$16 sps:$4 sm:$0xff]  }
 0x5fb   :  { %v6327_v3 = vpop.eup %5099 }
 0x5fc   :  { %v2695_v50 = vrot.slane %v6327_v3, %v5661_v20  ;;  %v2699_v39 = vrot.slane %v6327_v3, %v5666_v22  ;;  %v2711_v24 = vrot.slane %v6327_v3, %v5816_v2  ;;  %v2715_v58 = vrot.slane %v6327_v3, %v5823_v25  ;;  %v4819_v2 = vld [vmem:[#allocation14 + $0x84] ss:$16 sps:$4 sm:$0xff]  }
 0x5fd   :  { %3810 = vmatprep.subr.bf16.mxu1 %v4819_v2 }
 0x5fe   :  { %v2757_v42 = vmul.f32 %v2695_v50, %v6172_v19  ;;  %v2756_v26 = vmul.f32 %v2695_v50, %v6176_v7  ;;  %v2759_v5 = vmul.f32 %v2699_v39, %v6183_v12  ;;  %v2758_v57 = vmul.f32 %v2699_v39, %v6187_v53  ;;  %v4816_v7 = vld [vmem:[#allocation14 + $0x6c] ss:$16 sps:$4 sm:$0xff]   ;;  %3811 = vmatpush1.bf16.msra.mxu1 %v4817_v47  ;;  %v4859_v39 = vld [vmem:[#allocation14 + $0x160] ss:$16 sps:$4 sm:$0xff]  }
 0x5ff   :  { %v2703_v19 = vrot.slane %v6327_v3, %v5679_v28  ;;  %v2707_v12 = vrot.slane %v6327_v3, %v5686_v31  ;;  %3894 = vmatprep.subr.bf16.mxu0 %v4816_v7  ;;  %v2767_v56 = vmul.f32 %v2715_v58, %v6218_v16  ;;  %v4825_v16 = vld [vmem:[#allocation14 + $0xa4] ss:$16 sps:$4 sm:$0xff]   ;;  %v4858_v50 = vld [vmem:[#allocation14 + $0x14c] ss:$16 sps:$4 sm:$0xff]   ;;  %v4874_v7 = vld [vmem:[#allocation14 + $0x1a8] ss:$16 sps:$4 sm:$0xff]  }
 0x600   :  { %2923 = vperm.xlu0 %4588, %v2757_v42   ;;  %2918 = vperm.xlu1 %4589, %v2756_v26   ;;  %v4861_v42 = vld [vmem:[#allocation14 + $0x164] ss:$16 sps:$4 sm:$0xff]   ;;  %v4864_v26 = vld [vmem:[#allocation14 + $0x16c] ss:$16 sps:$4 sm:$0xff]  }
 0x601   :  { %v2761_v14 = vmul.f32 %v2703_v19, %v6194_v0  ;;  %v2760_v8 = vmul.f32 %v2703_v19, %v6197_v21  ;;  %3895 = vmatpush1.bf16.msra.mxu0 %v4814_v13  ;;  %v2763_v53 = vmul.f32 %v2707_v12, %v6202_v10  ;;  %v2762_v34 = vmul.f32 %v2707_v12, %v6205_v61  ;;  %v4871_v19 = vld [vmem:[#allocation14 + $0x1a0] ss:$16 sps:$4 sm:$0xff]   ;;  %v4882_v13 = vld [vmem:[#allocation14 + $0x1cc] ss:$16 sps:$4 sm:$0xff]   ;;  %v4885_v12 = vld [vmem:[#allocation14 + $0x1e4] ss:$16 sps:$4 sm:$0xff]  }
 0x602   :  { %v2765_v0 = vmul.f32 %v2711_v24, %v6210_v27  ;;  %v2764_v21 = vmul.f32 %v2711_v24, %v6213_v54  ;;  %v2766_v10 = vmul.f32 %v2715_v58, %v6221_v1  ;;  %v2719_v61 = vrot.slane %v6327_v3, %v5830_v29  ;;  %3896 = vmatprep.subr.bf16.mxu0 %v4822_v55  ;;  %v4823_v29 = vld [vmem:[#allocation14 + $0xa0] ss:$16 sps:$4 sm:$0xff]   ;;  %v4826_v1 = vld [vmem:[#allocation14 + $0xa8] ss:$16 sps:$4 sm:$0xff]  }
 0x603   :  { %v2723_v54 = vrot.slane %v6327_v3, %v5870_v49  ;;  %3812 = vmatprep.subr.bf16.mxu1 %v4825_v16  ;;  %v4832_v49 = vld [vmem:[#allocation14 + $0xc8] ss:$16 sps:$4 sm:$0xff]   ;;  %v4855_v3 = vld [vmem:[#allocation14 + $0x144] ss:$16 sps:$4 sm:$0xff]  }
 0x604   :  { %2933 = vperm.xlu0 %4588, %v2759_v5   ;;  %2928 = vperm.xlu1 %4589, %v2758_v57   ;;  %v2769_v27 = vmul.f32 %v2719_v61, %v6226_v52  ;;  %v2768_v25 = vmul.f32 %v2719_v61, %v6229_v11  ;;  %v4829_v52 = vld [vmem:[#allocation14 + $0xc0] ss:$16 sps:$4 sm:$0xff]   ;;  %v4831_v11 = vld [vmem:[#allocation14 + $0xc4] ss:$16 sps:$4 sm:$0xff]   ;;  %v4876_v57 = vld [vmem:[#allocation14 + $0x1ac] ss:$16 sps:$4 sm:$0xff]  }
 0x605   :  { %3897 = vmatpush1.bf16.msra.mxu0 %v4820_v51  ;;  %v2771_v36 = vmul.f32 %v2723_v54, %v6233_v17  ;;  %v2770_v43 = vmul.f32 %v2723_v54, %v6557_v23  ;;  %3813 = vmatpush1.bf16.msra.mxu1 %v4823_v29  ;;  %v4840_v17 = vld [vmem:[#allocation14 + $0xec] ss:$16 sps:$4 sm:$0xff]   ;;  %v4873_v5 = vld [vmem:[#allocation14 + $0x1a4] ss:$16 sps:$4 sm:$0xff]   ;;  %v4886_v24 = vld [vmem:[#allocation14 + $0x1e8] ss:$16 sps:$4 sm:$0xff]  }
 0x606   :  { %3898 = vmatprep.subr.bf16.mxu0 %v4828_v35  ;;  %3814 = vmatprep.subr.bf16.mxu1 %v4831_v11  ;;  %v4408_v51 = vld [vmem:[#allocation5] sm:$0xff]   ;;  %v4490_v29 = vld [vmem:[#allocation5 + $0x8] sm:$0xff]  }
 0x607   :  { %v4409_v54 = vunpack.c.l.bf16 %v4408_v51  ;;  %v4413_v23 = vunpack.c.l.bf16 %v4490_v29 }
 0x608   :  { %2943 = vperm.xlu0 %4588, %v2761_v14   ;;  %2938 = vperm.xlu1 %4589, %v2760_v8   ;;  %v4877_v14 = vld [vmem:[#allocation14 + $0x1c0] ss:$16 sps:$4 sm:$0xff]   ;;  %v4880_v8 = vld [vmem:[#allocation14 + $0x1c8] ss:$16 sps:$4 sm:$0xff]  }
 0x609   :  { %3899 = vmatpush1.bf16.msra.mxu0 %v4826_v1  ;;  %3815 = vmatpush1.bf16.msra.mxu1 %v4829_v52 }
 0x60a   :  { %3900 = vmatprep.subr.bf16.mxu0 %v4834_v41  ;;  %3816 = vmatprep.subr.bf16.mxu1 %v4837_v33  ;;  %v4491_v33 = vld [vmem:[#allocation5 + $0x10] sm:$0xff]  }
 0x60c   :  { %2953 = vperm.xlu0 %4588, %v2763_v53   ;;  %2948 = vperm.xlu1 %4589, %v2762_v34   ;;  %v4888_v53 = vld [vmem:[#allocation14 + $0x1ec] ss:$16 sps:$4 sm:$0xff]   ;;  %v4883_v34 = vld [vmem:[#allocation14 + $0x1e0] ss:$16 sps:$4 sm:$0xff]  }
 0x60d   :  { %3901 = vmatpush1.bf16.msra.mxu0 %v4832_v49  ;;  %3817 = vmatpush1.bf16.msra.mxu1 %v4835_v37 }
 0x60e   :  { %3902 = vmatprep.subr.bf16.mxu0 %v4840_v17  ;;  %3818 = vmatprep.subr.bf16.mxu1 %v4843_v46  ;;  %v4418_v46 = vunpack.c.h.bf16 %v4491_v33 }
 0x610   :  { %2963 = vperm.xlu0 %4588, %v2765_v0   ;;  %2958 = vperm.xlu1 %4589, %v2764_v21   ;;  %v4891_v0 = vld [vmem:[#allocation14 + $0x204] ss:$16 sps:$4 sm:$0xff]   ;;  %v4894_v21 = vld [vmem:[#allocation14 + $0x20c] ss:$16 sps:$4 sm:$0xff]  }
 0x611   :  { %3903 = vmatpush1.bf16.msra.mxu0 %v4838_v38  ;;  %3819 = vmatpush1.bf16.msra.mxu1 %v4841_v15  ;;  %v4417_v15 = vunpack.c.l.bf16 %v4491_v33 }
 0x612   :  { %3904 = vmatprep.subr.bf16.mxu0 %v4846_v45  ;;  %3820 = vmatprep.subr.bf16.mxu1 %v4849_v63 }
 0x614   :  { %2973 = vperm.xlu0 %4588, %v2767_v56   ;;  %2968 = vperm.xlu1 %4589, %v2766_v10  }
 0x615   :  { %3905 = vmatpush1.bf16.msra.mxu0 %v4844_v18  ;;  %3821 = vmatpush1.bf16.msra.mxu1 %v4847_v9 }
 0x616   :  { %3906 = vmatprep.subr.bf16.mxu0 %v4852_v44  ;;  %3822 = vmatprep.subr.bf16.mxu1 %v4855_v3  ;;  %v4492_v3 = vld [vmem:[#allocation5 + $0x18] sm:$0xff]  }
 0x618   :  { %2983 = vperm.xlu0 %4588, %v2769_v27   ;;  %2978 = vperm.xlu1 %4589, %v2768_v25   ;;  %v4410_v25 = vunpack.c.h.bf16 %v4408_v51 }
 0x619   :  { %3907 = vmatpush1.bf16.msra.mxu0 %v4850_v6  ;;  %3823 = vmatpush1.bf16.msra.mxu1 %v4853_v60 }
 0x61a   :  { %3908 = vmatprep.subr.bf16.mxu0 %v4858_v50  ;;  %3824 = vmatprep.subr.bf16.mxu1 %v4861_v42  ;;  %v4493_v50 = vld [vmem:[#allocation5 + $0x20] sm:$0xff]  }
 0x61c   :  { %2993 = vperm.xlu0 %4588, %v2771_v36   ;;  %2988 = vperm.xlu1 %4589, %v2770_v43   ;;  %v4414_v43 = vunpack.c.h.bf16 %v4490_v29 }
 0x61d   :  { %3909 = vmatpush1.bf16.msra.mxu0 %v4856_v4  ;;  %3825 = vmatpush1.bf16.msra.mxu1 %v4859_v39  ;;  %v4494_v4 = vld [vmem:[#allocation5 + $0x28] sm:$0xff]   ;;  %v4495_v39 = vld [vmem:[#allocation5 + $0x30] sm:$0xff]  }
 0x61e   :  { %3910 = vmatprep.subr.bf16.mxu0 %v4864_v26  ;;  %3826 = vmatprep.subr.bf16.mxu1 %v4867_v59 }
 0x621   :  { %3911 = vmatpush1.bf16.msra.mxu0 %v4862_v40  ;;  %3827 = vmatpush1.bf16.msra.mxu1 %v4865_v48  ;;  %v4422_v48 = vunpack.c.h.bf16 %v4492_v3 }
 0x622   :  { %3912 = vmatprep.subr.bf16.mxu0 %v4870_v32  ;;  %3828 = vmatprep.subr.bf16.mxu1 %v4873_v5  ;;  %v4421_v32 = vunpack.c.l.bf16 %v4492_v3  ;;  %v4425_v5 = vunpack.c.l.bf16 %v4493_v50 }
 0x625   :  { %3913 = vmatpush1.bf16.msra.mxu0 %v4868_v62  ;;  %3829 = vmatpush1.bf16.msra.mxu1 %v4871_v19  ;;  %v4497_v62 = vld [vmem:[#allocation5 + $0x40] sm:$0xff]   ;;  %v4429_v19 = vunpack.c.l.bf16 %v4494_v4 }
 0x626   :  { %3914 = vmatprep.subr.bf16.mxu0 %v4876_v57  ;;  %3830 = vmatprep.subr.bf16.mxu1 %v4879_v30  ;;  %v4426_v57 = vunpack.c.h.bf16 %v4493_v50 }
 0x629   :  { %3915 = vmatpush1.bf16.msra.mxu0 %v4874_v7  ;;  %3831 = vmatpush1.bf16.msra.mxu1 %v4877_v14  ;;  %v4498_v7 = vld [vmem:[#allocation5 + $0x48] sm:$0xff]   ;;  %v4433_v14 = vunpack.c.l.bf16 %v4495_v39 }
 0x62a   :  { %3916 = vmatprep.subr.bf16.mxu0 %v4882_v13  ;;  %3832 = vmatprep.subr.bf16.mxu1 %v4885_v12  ;;  %v4430_v13 = vunpack.c.h.bf16 %v4494_v4  ;;  %v4496_v12 = vld [vmem:[#allocation5 + $0x38] sm:$0xff]   ;;  %v4445_v51 = vunpack.c.l.bf16 %v4498_v7 }
 0x62b   :  { %v4438_v29 = vunpack.c.h.bf16 %v4496_v12 }
 0x62d   :  { %3917 = vmatpush1.bf16.msra.mxu0 %v4880_v8  ;;  %3833 = vmatpush1.bf16.msra.mxu1 %v4883_v34  ;;  %v4434_v8 = vunpack.c.h.bf16 %v4495_v39 }
 0x62e   :  { %3918 = vmatprep.subr.bf16.mxu0 %v4888_v53  ;;  %3845 = vmatprep.subr.bf16.mxu1 %v4891_v0  ;;  %v4499_v53 = vld [vmem:[#allocation5 + $0x50] sm:$0xff]   ;;  %v4441_v0 = vunpack.c.l.bf16 %v4497_v62 }
 0x631   :  { %3919 = vmatpush1.bf16.msra.mxu0 %v4886_v24 }
 0x632   :  { %3931 = vmatprep.subr.bf16.mxu0 %v4894_v21 }
 0x64a   :  { %v2844_v58 = vpop.permute.xlu1 %2843  ;;  %v2839_v56 = vpop.permute.xlu0 %2838 }
 0x64b   :  { %v2997_v35 = vmul.f32 %v4410_v25, %v2844_v58  ;;  %v2996_v36 = vmul.f32 %v4409_v54, %v2839_v56  ;;  %v4442_v58 = vunpack.c.h.bf16 %v4497_v62  ;;  %v4446_v25 = vunpack.c.h.bf16 %v4498_v7 }
 0x64c   :  { %v4437_v54 = vunpack.c.l.bf16 %v4496_v12 }
 0x64d   :  { %v3028_v52 = vadd.f32 %v2997_v35, %v2996_v36  ;;  %v4449_v35 = vunpack.c.l.bf16 %v4499_v53  ;;  %v4450_v36 = vunpack.c.h.bf16 %v4499_v53 }
 0x64e   :  { %v2849_v10 = vpop.permute.xlu1 %2848  ;;  %v2854_v61 = vpop.permute.xlu0 %2853 }
 0x64f   :  { %v2998_v11 = vmul.f32 %v4413_v23, %v2849_v10  ;;  %v2999_v49 = vmul.f32 %v4414_v43, %v2854_v61  ;;  %v3029_v38 = vrot.slane %v3028_v52, 4  ;;  %v6369_v10 = vld [vmem:[#allocation5 + $0x58] sm:$0xff]   ;;  %v6371_v61 = vld [vmem:[#allocation5 + $0x60] sm:$0xff]  }
 0x650   :  { %v4453_v43 = vunpack.c.l.bf16 %v6369_v10 }
 0x651   :  { %v3035_v17 = vadd.f32 %v2999_v49, %v2998_v11  ;;  %v3030_v63 = vadd.f32 %v3029_v38, %v3028_v52  ;;  %v4454_v52 = vunpack.c.h.bf16 %v6369_v10  ;;  %v4457_v11 = vunpack.c.l.bf16 %v6371_v61 }
 0x652   :  { %v2859_v47 = vpop.permute.xlu1 %2858  ;;  %v2864_v2 = vpop.permute.xlu0 %2863 }
 0x653   :  { %v3036_v44 = vrot.slane %v3035_v17, 4  ;;  %v3000_v9 = vmul.f32 %v4417_v15, %v2859_v47  ;;  %v3001_v6 = vmul.f32 %v4418_v46, %v2864_v2  ;;  %v3031_v60 = vrot.slane %v3030_v63, 2 }
 0x655   :  { %v3037_v42 = vadd.f32 %v3036_v44, %v3035_v17  ;;  %v3042_v26 = vadd.f32 %v3001_v6, %v3000_v9  ;;  %v3032_v30 = vadd.f32 %v3031_v60, %v3030_v63  ;;  %v6377_v9 = vld [vmem:[#allocation5 + $0x68] sm:$0xff]  }
 0x656   :  { %v2869_v55 = vpop.permute.xlu1 %2868  ;;  %v2874_v27 = vpop.permute.xlu0 %2873 }
 0x657   :  { %v3038_v34 = vrot.slane %v3037_v42, 2  ;;  %v3043_v24 = vrot.slane %v3042_v26, 4  ;;  %v3002_v47 = vmul.f32 %v4421_v32, %v2869_v55  ;;  %v3003_v2 = vmul.f32 %v4422_v48, %v2874_v27 }
 0x658   :  { %v3033_v23 = vrot.slane %v3032_v30, 1 }
 0x659   :  { %v3039_v49 = vadd.f32 %v3038_v34, %v3037_v42  ;;  %v3044_v33 = vadd.f32 %v3043_v24, %v3042_v26  ;;  %v3049_v27 = vadd.f32 %v3003_v2, %v3002_v47 }
 0x65a   :  { %v6361_v16 = vpop.permute.xlu1 %2878  ;;  %v6363_v1 = vpop.permute.xlu0 %2883  ;;  %v3034_v32 = vadd.f32 %v3033_v23, %v3032_v30 }
 0x65b   :  { %v3004_v46 = vmul.f32 %v4425_v5, %v6361_v16  ;;  %v3005_v6 = vmul.f32 %v4426_v57, %v6363_v1  ;;  %v4458_v16 = vunpack.c.h.bf16 %v6371_v61  ;;  %v4461_v5 = vunpack.c.l.bf16 %v6377_v9 }
 0x65c   :  { %v3040_v12 = vrot.slane %v3039_v49, 1  ;;  %v3050_v53 = vrot.slane %v3049_v27, 4 }
 0x65e   :  { %v6365_v41 = vpop.permute.xlu1 %2888  ;;  %v6367_v37 = vpop.permute.xlu0 %2893  ;;  %v3051_v10 = vadd.f32 %v3050_v53, %v3049_v27 }
 0x65f   :  { %v3006_v3 = vmul.f32 %v4429_v19, %v6365_v41  ;;  %v3007_v60 = vmul.f32 %v4430_v13, %v6367_v37  ;;  %v6384_v41 = vld [vmem:[#allocation5 + $0x70] sm:$0xff]   ;;  %v3045_v37 = vrot.slane %v3044_v33, 2 }
 0x662   :  { %v2899_v18 = vpop.permute.xlu1 %2898  ;;  %v2904_v45 = vpop.permute.xlu0 %2903 }
 0x663   :  { %v3008_v50 = vmul.f32 %v4433_v14, %v2899_v18  ;;  %v3009_v4 = vmul.f32 %v4434_v8, %v2904_v45  ;;  %v3056_v18 = vadd.f32 %v3005_v6, %v3004_v46  ;;  %v3063_v45 = vadd.f32 %v3007_v60, %v3006_v3  ;;  %v6387_v14 = vld [vmem:[#allocation5 + $0x78] sm:$0xff]  }
 0x664   :  { %v3140_v8 = vpack.c.bf16 %v3034_v32, %v3034_v32 }
 0x666   :  { %v2909_v40 = vpop.permute.xlu1 %2908  ;;  %v2914_v59 = vpop.permute.xlu0 %2913 }
 0x667   :  { %v3010_v42 = vmul.f32 %v4437_v54, %v2909_v40  ;;  %v3011_v26 = vmul.f32 %v4438_v29, %v2914_v59  ;;  %v4462_v40 = vunpack.c.h.bf16 %v6377_v9  ;;  %v3070_v59 = vadd.f32 %v3009_v4, %v3008_v50 }
 0x668   :  { %v4469_v29 = vunpack.c.l.bf16 %v6387_v14 }
 0x669   :  { %v3077_v19 = vadd.f32 %v3011_v26, %v3010_v42 }
 0x66b   :  { %v3078_v23 = vrot.slane %v3077_v19, 4 }
 0x66d   :  { %v3079_v4 = vadd.f32 %v3078_v23, %v3077_v19 }
 0x67f   :  { %v2919_v21 = vpop.permute.xlu1 %2918  ;;  %v2924_v56 = vpop.permute.xlu0 %2923 }
 0x680   :  { %v3012_v38 = vmul.f32 %v4441_v0, %v2919_v21  ;;  %v3013_v17 = vmul.f32 %v4442_v58, %v2924_v56  ;;  %v4465_v21 = vunpack.c.l.bf16 %v6384_v41  ;;  %v4466_v58 = vunpack.c.h.bf16 %v6384_v41 }
 0x681   :  { %v3041_v56 = vadd.f32 %v3040_v12, %v3039_v49  ;;  %v6393_v49 = vunpack.c.l.b16 %v3140_v8 }
 0x682   :  { %v3084_v48 = vadd.f32 %v3013_v17, %v3012_v38 }
 0x683   :  { %v2929_v15 = vpop.permute.xlu1 %2928  ;;  %v2934_v55 = vpop.permute.xlu0 %2933  ;;  %v3141_v27 = vpack.c.bf16 %v3041_v56, %v3041_v56 }
 0x684   :  { %v3014_v63 = vmul.f32 %v4445_v51, %v2929_v15  ;;  %v3015_v44 = vmul.f32 %v4446_v25, %v2934_v55  ;;  %v3085_v34 = vrot.slane %v3084_v48, 4  ;;  %v3057_v51 = vrot.slane %v3056_v18, 4 }
 0x685   :  { %v3064_v25 = vrot.slane %v3063_v45, 4  ;;  %v6397_v12 = vunpack.c.l.b16 %v3141_v27 }
 0x686   :  { %v3091_v39 = vadd.f32 %v3015_v44, %v3014_v63  ;;  %v3086_v17 = vadd.f32 %v3085_v34, %v3084_v48  ;;  %v4470_v44 = vunpack.c.h.bf16 %v6387_v14  ;;  %v3058_v9 = vadd.f32 %v3057_v51, %v3056_v18 }
 0x687   :  { %v2939_v62 = vpop.permute.xlu1 %2938  ;;  %v2944_v7 = vpop.permute.xlu0 %2943  ;;  %v3065_v6 = vadd.f32 %v3064_v25, %v3063_v45  ;;  %v3080_v18 = vrot.slane %v3079_v4, 2 }
 0x688   :  { %v3016_v1 = vmul.f32 %v4449_v35, %v2939_v62  ;;  %v3017_v57 = vmul.f32 %v4450_v36, %v2944_v7  ;;  %v3092_v30 = vrot.slane %v3091_v39, 4  ;;  %v3046_v35 = vadd.f32 %v3045_v37, %v3044_v33 }
 0x689   :  { %v3071_v36 = vrot.slane %v3070_v59, 4  ;;  %v3087_v26 = vrot.slane %v3086_v17, 2 }
 0x68a   :  { %v3098_v13 = vadd.f32 %v3017_v57, %v3016_v1  ;;  %v3093_v38 = vadd.f32 %v3092_v30, %v3091_v39  ;;  %v3047_v60 = vrot.slane %v3046_v35, 1  ;;  %v3066_v57 = vrot.slane %v3065_v6, 2 }
 0x68b   :  { %v2949_v24 = vpop.permute.xlu1 %2948  ;;  %v2954_v0 = vpop.permute.xlu0 %2953  ;;  %v3072_v50 = vadd.f32 %v3071_v36, %v3070_v59  ;;  %v3088_v30 = vadd.f32 %v3087_v26, %v3086_v17 }
 0x68c   :  { %v3099_v47 = vrot.slane %v3098_v13, 4  ;;  %v3018_v2 = vmul.f32 %v4453_v43, %v2949_v24  ;;  %v3019_v54 = vmul.f32 %v4454_v52, %v2954_v0  ;;  %v3052_v43 = vrot.slane %v3051_v10, 2 }
 0x68d   :  { %v3094_v42 = vrot.slane %v3093_v38, 2  ;;  %v3048_v19 = vadd.f32 %v3047_v60, %v3046_v35 }
 0x68e   :  { %v3100_v15 = vadd.f32 %v3099_v47, %v3098_v13  ;;  %v3105_v55 = vadd.f32 %v3019_v54, %v3018_v2  ;;  %v3053_v53 = vadd.f32 %v3052_v43, %v3051_v10  ;;  %v3081_v54 = vadd.f32 %v3080_v18, %v3079_v4 }
 0x68f   :  { %v2959_v46 = vpop.permute.xlu1 %2958  ;;  %v2964_v63 = vpop.permute.xlu0 %2963  ;;  %v3095_v45 = vadd.f32 %v3094_v42, %v3093_v38  ;;  %v3089_v38 = vrot.slane %v3088_v30, 1 }
 0x690   :  { %v3020_v52 = vmul.f32 %v4457_v11, %v2959_v46  ;;  %v3106_v33 = vrot.slane %v3105_v55, 4  ;;  %v3021_v3 = vmul.f32 %v4458_v16, %v2964_v63  ;;  %v3101_v39 = vrot.slane %v3100_v15, 2 }
 0x691   :  { %v3059_v11 = vrot.slane %v3058_v9, 2  ;;  %v3073_v16 = vrot.slane %v3072_v50, 2  ;;  %v3054_v0 = vrot.slane %v3053_v53, 1  ;;  %v3096_v36 = vrot.slane %v3095_v45, 1 }
 0x692   :  { %v3107_v32 = vadd.f32 %v3106_v33, %v3105_v55  ;;  %v3112_v48 = vadd.f32 %v3021_v3, %v3020_v52  ;;  %v3102_v13 = vadd.f32 %v3101_v39, %v3100_v15  ;;  %v3082_v42 = vrot.slane %v3081_v54, 1 }
 0x693   :  { %v2969_v62 = vpop.permute.xlu1 %2968  ;;  %v2974_v7 = vpop.permute.xlu0 %2973  ;;  %v3074_v25 = vadd.f32 %v3073_v16, %v3072_v50  ;;  %v3055_v52 = vadd.f32 %v3054_v0, %v3053_v53  ;;  %v3097_v3 = vadd.f32 %v3096_v36, %v3095_v45 }
 0x694   :  { %v3022_v1 = vmul.f32 %v4461_v5, %v2969_v62  ;;  %v3023_v61 = vmul.f32 %v4462_v40, %v2974_v7  ;;  %v3108_v41 = vrot.slane %v3107_v32, 2  ;;  %v3113_v37 = vrot.slane %v3112_v48, 4 }
 0x695   :  { %v3060_v5 = vadd.f32 %v3059_v11, %v3058_v9  ;;  %v3067_v40 = vadd.f32 %v3066_v57, %v3065_v6  ;;  %v3103_v55 = vrot.slane %v3102_v13, 1  ;;  %v3075_v4 = vrot.slane %v3074_v25, 1 }
 0x696   :  { %v3119_v59 = vadd.f32 %v3023_v61, %v3022_v1  ;;  %v3114_v8 = vadd.f32 %v3113_v37, %v3112_v48  ;;  %v3109_v56 = vadd.f32 %v3108_v41, %v3107_v32  ;;  %v3090_v32 = vadd.f32 %v3089_v38, %v3088_v30 }
 0x697   :  { %v2979_v34 = vpop.permute.xlu1 %2978  ;;  %v2984_v24 = vpop.permute.xlu0 %2983  ;;  %v3061_v9 = vrot.slane %v3060_v5, 1  ;;  %v3068_v33 = vrot.slane %v3067_v40, 1  ;;  %v3104_v26 = vadd.f32 %v3103_v55, %v3102_v13  ;;  %v3142_v1 = vpack.c.bf16 %v3048_v19, %v3048_v19 }
 0x698   :  { %v3120_v47 = vrot.slane %v3119_v59, 4  ;;  %v3024_v10 = vmul.f32 %v4465_v21, %v2979_v34  ;;  %v3115_v2 = vrot.slane %v3114_v8, 2  ;;  %v3025_v51 = vmul.f32 %v4466_v58, %v2984_v24 }
 0x699   :  { %v3110_v63 = vrot.slane %v3109_v56, 1  ;;  %v3062_v14 = vadd.f32 %v3061_v9, %v3060_v5  ;;  %v3069_v53 = vadd.f32 %v3068_v33, %v3067_v40  ;;  %v3149_v61 = vpack.c.bf16 %v3097_v3, %v3097_v3 }
 0x69a   :  { %v3121_v23 = vadd.f32 %v3120_v47, %v3119_v59  ;;  %v3116_v35 = vadd.f32 %v3115_v2, %v3114_v8  ;;  %v3126_v17 = vadd.f32 %v3025_v51, %v3024_v10  ;;  %v3143_v41 = vpack.c.bf16 %v3055_v52, %v3055_v52 }
 0x69b   :  { %v2989_v15 = vpop.permute.xlu1 %2988  ;;  %v2994_v46 = vpop.permute.xlu0 %2993  ;;  %v3111_v48 = vadd.f32 %v3110_v63, %v3109_v56  ;;  %v3076_v37 = vadd.f32 %v3075_v4, %v3074_v25  ;;  %v3150_v16 = vpack.c.bf16 %v3104_v26, %v3104_v26  ;;  %v3083_v45 = vadd.f32 %v3082_v42, %v3081_v54 }
 0x69c   :  { %v3122_v27 = vrot.slane %v3121_v23, 2  ;;  %v3026_v43 = vmul.f32 %v4469_v29, %v2989_v15  ;;  %v3027_v21 = vmul.f32 %v4470_v44, %v2994_v46  ;;  %v3117_v6 = vrot.slane %v3116_v35, 1 }
 0x69d   :  { %v3127_v58 = vrot.slane %v3126_v17, 4  ;;  %v3148_v59 = vpack.c.bf16 %v3090_v32, %v3090_v32  ;;  %v3151_v13 = vpack.c.bf16 %v3111_v48, %v3111_v48  ;;  %v3174_v30 = vunpack.c.l.b16 %v3142_v1  ;;  %v4892_v32 = vld [vmem:[#allocation14 + $0x208] ss:$16 sps:$4 sm:$0xff]   ;;  %v4897_v1 = vld [vmem:[#allocation14 + $0x224] ss:$16 sps:$4 sm:$0xff]  }
 0x69e   :  { %v3123_v60 = vadd.f32 %v3122_v27, %v3121_v23  ;;  %v3133_v50 = vadd.f32 %v3027_v21, %v3026_v43  ;;  %v3118_v29 = vadd.f32 %v3117_v6, %v3116_v35  ;;  %v3144_v34 = vpack.c.bf16 %v3062_v14, %v3062_v14  ;;  %v4900_v14 = vld [vmem:[#allocation14 + $0x22c] ss:$16 sps:$4 sm:$0xff]  }
 0x69f   :  { %v3128_v39 = vadd.f32 %v3127_v58, %v3126_v17  ;;  %v3145_v19 = vpack.c.bf16 %v3069_v53, %v3069_v53  ;;  %v3181_v56 = vunpack.c.l.b16 %v3149_v61  ;;  %v3175_v5 = vunpack.c.l.b16 %v3143_v41  ;;  %v4903_v53 = vld [vmem:[#allocation14 + $0x244] ss:$16 sps:$4 sm:$0xff]   ;;  %v4906_v61 = vld [vmem:[#allocation14 + $0x24c] ss:$16 sps:$4 sm:$0xff]   ;;  %v4904_v41 = vld [vmem:[#allocation14 + $0x248] ss:$16 sps:$4 sm:$0xff]  }
 0x6a0   :  { %v3124_v62 = vrot.slane %v3123_v60, 1  ;;  %v3134_v7 = vrot.slane %v3133_v50, 4  ;;  %v3152_v24 = vpack.c.bf16 %v3118_v29, %v3118_v29  ;;  %v3146_v40 = vpack.c.bf16 %v3076_v37, %v3076_v37  ;;  %v4895_v29 = vld [vmem:[#allocation14 + $0x220] ss:$16 sps:$4 sm:$0xff]   ;;  %v4909_v37 = vld [vmem:[#allocation14 + $0x264] ss:$16 sps:$4 sm:$0xff]  }
 0x6a1   :  { %v3129_v44 = vrot.slane %v3128_v39, 2  ;;  %v3182_v2 = vunpack.c.l.b16 %v3150_v16  ;;  %v3147_v36 = vpack.c.bf16 %v3083_v45, %v3083_v45  ;;  %v3180_v25 = vunpack.c.l.b16 %v3148_v59  ;;  %v4912_v16 = vld [vmem:[#allocation14 + $0x26c] ss:$16 sps:$4 sm:$0xff]   ;;  %v4910_v45 = vld [vmem:[#allocation14 + $0x268] ss:$16 sps:$4 sm:$0xff]  }
 0x6a2   :  { %v3125_v11 = vadd.f32 %v3124_v62, %v3123_v60  ;;  %v3135_v57 = vadd.f32 %v3134_v7, %v3133_v50  ;;  %v3183_v23 = vunpack.c.l.b16 %v3151_v13  ;;  %v3188_v54 = vsel %vm1910_vm2, %v6397_v12, %v6393_v49  ;;  %v4915_v59 = vld [vmem:[#allocation14 + $0x284] ss:$16 sps:$4 sm:$0xff]   ;;  %v4918_v13 = vld [vmem:[#allocation14 + $0x28c] ss:$16 sps:$4 sm:$0xff]  }
 0x6a3   :  { %v3130_v18 = vadd.f32 %v3129_v44, %v3128_v39  ;;  %v3176_v55 = vunpack.c.l.b16 %v3144_v34  ;;  %v3184_v35 = vunpack.c.l.b16 %v3152_v24  ;;  %v3177_v15 = vunpack.c.l.b16 %v3145_v19  ;;  %v4889_v39 = vld [vmem:[#allocation14 + $0x200] ss:$16 sps:$4 sm:$0xff]   ;;  %v4898_v44 = vld [vmem:[#allocation14 + $0x228] ss:$16 sps:$4 sm:$0xff]   ;;  %v4921_v34 = vld [vmem:[#allocation14 + $0x2a4] ss:$16 sps:$4 sm:$0xff]  }
 0x6a4   :  { %v3136_v8 = vrot.slane %v3135_v57, 2  ;;  %v3153_v47 = vpack.c.bf16 %v3125_v11, %v3125_v11  ;;  %v3195_v46 = vsel %vm1910_vm2, %v3181_v56, %v3180_v25  ;;  %v3189_v43 = vsel %vm1912_vm3, %v3174_v30, %v3188_v54  ;;  %v4916_v30 = vld [vmem:[#allocation14 + $0x288] ss:$16 sps:$4 sm:$0xff]   ;;  %v4924_v24 = vld [vmem:[#allocation14 + $0x2ac] ss:$16 sps:$4 sm:$0xff]   ;;  %v6559_v25 = vld [vmem:[#allocation28_spill] sm:$0xff] }
 0x6a5   :  { %v3131_v0 = vrot.slane %v3130_v18, 1  ;;  %v3178_v21 = vunpack.c.l.b16 %v3146_v40  ;;  %v3196_v52 = vsel %vm1912_vm3, %v3182_v2, %v3195_v46  ;;  %v3190_v6 = vsel %vm1914_vm4, %v3175_v5, %v3189_v43  ;;  %v4922_v19 = vld [vmem:[#allocation14 + $0x2a8] ss:$16 sps:$4 sm:$0xff]   ;;  %v4927_v56 = vld [vmem:[#allocation14 + $0x2c4] ss:$16 sps:$4 sm:$0xff]  }
 0x6a6   :  { %v3137_v10 = vadd.f32 %v3136_v8, %v3135_v57  ;;  %v3185_v63 = vunpack.c.l.b16 %v3153_v47  ;;  %v3179_v58 = vunpack.c.l.b16 %v3147_v36  ;;  %v3197_v33 = vsel %vm1914_vm4, %v3183_v23, %v3196_v52  ;;  %v4901_v57 = vld [vmem:[#allocation14 + $0x240] ss:$16 sps:$4 sm:$0xff]   ;;  %v4930_v47 = vld [vmem:[#allocation14 + $0x2cc] ss:$16 sps:$4 sm:$0xff]   ;;  %v4928_v5 = vld [vmem:[#allocation14 + $0x2c8] ss:$16 sps:$4 sm:$0xff]  }
 0x6a7   :  { %v3132_v51 = vadd.f32 %v3131_v0, %v3130_v18  ;;  %v3191_v12 = vsel %vm1916_vm5, %v3176_v55, %v3190_v6  ;;  %v3198_v3 = vsel %vm1916_vm5, %v3184_v35, %v3197_v33  ;;  %v6558_v11 = vmov 0   ;;  %v4907_v18 = vld [vmem:[#allocation14 + $0x260] ss:$16 sps:$4 sm:$0xff]   ;;  %v4933_v40 = vld [vmem:[#allocation14 + $0x2e4] ss:$16 sps:$4 sm:$0xff]  }
 0x6a8   :  { %v3138_v38 = vrot.slane %v3137_v10, 1  ;;  %v3192_v50 = vsel %vm1918_vm6, %v3177_v15, %v3191_v12  ;;  %v3199_v4 = vsel %vm1918_vm6, %v3185_v63, %v3198_v3  ;;  %v4913_v8 = vld [vmem:[#allocation14 + $0x280] ss:$16 sps:$4 sm:$0xff]   ;;  %v4936_v2 = vld [vmem:[#allocation14 + $0x2ec] ss:$16 sps:$4 sm:$0xff]  }
 0x6a9   :  { %v3154_v17 = vpack.c.bf16 %v3132_v51, %v3132_v51  ;;  %v3193_v42 = vsel %vm1920_vm7, %v3178_v21, %v3192_v50  ;;  %v4919_v0 = vld [vmem:[#allocation14 + $0x2a0] ss:$16 sps:$4 sm:$0xff]   ;;  %v4934_v36 = vld [vmem:[#allocation14 + $0x2e8] ss:$16 sps:$4 sm:$0xff]  }
 0x6aa   :  { %v3139_v27 = vadd.f32 %v3138_v38, %v3137_v10  ;;  %v3194_v48 = vsel %vm1922_vm8, %v3179_v58, %v3193_v42  ;;  %v4925_v10 = vld [vmem:[#allocation14 + $0x2c0] ss:$16 sps:$4 sm:$0xff]  }
 0x6ab   :  { %v3186_v9 = vunpack.c.l.b16 %v3154_v17  ;;  %v4931_v51 = vld [vmem:[#allocation14 + $0x2e0] ss:$16 sps:$4 sm:$0xff]  }
 0x6ac   :  { %v3155_v49 = vpack.c.bf16 %v3139_v27, %v3139_v27  ;;  %v3300_v23 = vld [vmem:[%s6500_s10] sm:$0xf] }
 0x6ad   :  { %v3200_v26 = vsel %vm1920_vm7, %v3186_v9, %v3199_v4  ;;  %v3305_v38 = vrot.slane %v3300_v23, %v5661_v20  ;;  %v3309_v54 = vrot.slane %v3300_v23, %v5666_v22  ;;  %v3317_v33 = vrot.slane %v3300_v23, %v5686_v31 }
 0x6ae   :  { %v3187_v60 = vunpack.c.l.b16 %v3155_v49  ;;  %v3313_v12 = vrot.slane %v3300_v23, %v5679_v28 }
 0x6b0   :  { %v3201_v62 = vsel %vm1922_vm8, %v3187_v60, %v3200_v26 }
 0x6b1   :  { %v3202_v7 = vpack.c.b16 %v3201_v62, %v3194_v48 }
 0x6b3   :  { %3835 = vmatmul.mubr.bf16.vlgmr.msra.gmra.mrb[4].mxu1 %v3202_v7  ;;  %3921 = vmatmul.mubr.bf16.vlgmr.msra.gmra.mrb[8].mxu0 %v3202_v7 }
 0x6b4   :  { %3846 = vmatpush1.bf16.msra.mxu1 %v4889_v39  ;;  %3932 = vmatpush1.bf16.msra.mxu0 %v4892_v32 }
 0x6b5   :  { %3847 = vmatprep.subr.bf16.mxu1 %v4897_v1  ;;  %3933 = vmatprep.subr.bf16.mxu0 %v4900_v14 }
 0x6b6   :  { %3877 = vmatprep.mubr.bf16.mxu1 %v6558_v11  ;;  %3963 = vmatprep.mubr.bf16.mxu0 %v6558_v11 }
 0x6b8   :  { %3848 = vmatpush1.bf16.msra.mxu1 %v4895_v29  ;;  %3934 = vmatpush1.bf16.msra.mxu0 %v4898_v44 }
 0x6b9   :  { %3849 = vmatprep.subr.bf16.mxu1 %v4903_v53  ;;  %3935 = vmatprep.subr.bf16.mxu0 %v4906_v61  ;;  %v4013_v53 = vld [vmem:[#allocation11 + $0x10] sm:$0xff] }
 0x6bc   :  { %3850 = vmatpush1.bf16.msra.mxu1 %v4901_v57  ;;  %3936 = vmatpush1.bf16.msra.mxu0 %v4904_v41 }
 0x6bd   :  { %3851 = vmatprep.subr.bf16.mxu1 %v4909_v37  ;;  %3937 = vmatprep.subr.bf16.mxu0 %v4912_v16 }
 0x6c0   :  { %3852 = vmatpush1.bf16.msra.mxu1 %v4907_v18  ;;  %3938 = vmatpush1.bf16.msra.mxu0 %v4910_v45  ;;  %v4014_v45 = vld [vmem:[#allocation11 + $0x18] sm:$0xff] }
 0x6c1   :  { %3853 = vmatprep.subr.bf16.mxu1 %v4915_v59  ;;  %3939 = vmatprep.subr.bf16.mxu0 %v4918_v13 }
 0x6c4   :  { %3854 = vmatpush1.bf16.msra.mxu1 %v4913_v8  ;;  %3940 = vmatpush1.bf16.msra.mxu0 %v4916_v30 }
 0x6c5   :  { %3855 = vmatprep.subr.bf16.mxu1 %v4921_v34  ;;  %3941 = vmatprep.subr.bf16.mxu0 %v4924_v24 }
 0x6c8   :  { %3856 = vmatpush1.bf16.msra.mxu1 %v4919_v0  ;;  %3942 = vmatpush1.bf16.msra.mxu0 %v4922_v19  ;;  %v4472_v0 = vld [vmem:[%s6496_s6] sm:$0xff]   ;;  %s5331_s6 = scalar_lea.vmem %s4061_s27, 512 }
 0x6c9   :  { %3857 = vmatprep.subr.bf16.mxu1 %v4927_v56  ;;  %3943 = vmatprep.subr.bf16.mxu0 %v4930_v47  ;;  %v4473_v56 = vunpack.c.l.bf16 %v4472_v0  ;;  %p5332_p2 = scmp.ne.s32.totalorder %s4061_s27, %s5331_s6  ;;  %p5337_p4 = scmp.lt.s32.totalorder %s5331_s6, %s5331_s6 }
 0x6cb   :  { %p5338_p5 = por %p5337_p4, %p5336_p3 }
 0x6cc   :  { %3858 = vmatpush1.bf16.msra.mxu1 %v4925_v10  ;;  %3944 = vmatpush1.bf16.msra.mxu0 %v4928_v5 }
 0x6cd   :  { %3859 = vmatprep.subr.bf16.mxu1 %v4933_v40  ;;  %3945 = vmatprep.subr.bf16.mxu0 %v4936_v2  ;;  %v4474_v40 = vunpack.c.h.bf16 %v4472_v0  ;;  %p5339_p6 = pnand %p5338_p5, %p5332_p2 }
 0x6d0   :  { %3860 = vmatpush1.bf16.msra.mxu1 %v4931_v51  ;;  %3946 = vmatpush1.bf16.msra.mxu0 %v4934_v36 }
 0x6d3   :  { %3878 = vmatmul.mubr.bf16.vlgmr.msra.gmra.mrb[4].mxu1 %v6559_v25  ;;  %3964 = vmatmul.mubr.bf16.vlgmr.msra.gmra.mrb[8].mxu0 %v6559_v25 }
 0x7a6   :  { %v3879_v55 = vpop.f32.mrb[4].mxu1  ;;  %v3965_v35 = vpop.f32.mrb[8].mxu0 }
 0x7a7   :  { %v4542_v17 = vadd.f32 %v3879_v55, %v3305_v38  ;;  %v3881_v15 = vpop.f32.mrb[5].mxu1  ;;  %v3967_v46 = vpop.f32.mrb[9].mxu0  ;;  %v4546_v60 = vadd.f32 %v3965_v35, %v3313_v12 }
 0x7a8   :  { %v4543_v63 = vadd.f32 %v3881_v15, %v3309_v54  ;;  %v3883_v27 = vpop.f32.mrb[6].mxu1  ;;  %v3969_v43 = vpop.f32.mrb[10].mxu0  ;;  %v4547_v3 = vadd.f32 %v3967_v46, %v3317_v33 }
 0x7a9   :  { %v4337_v21 = vmul.f32 -1.442695, %v4542_v17  ;;  %v4544_v52 = vadd.f32 %v3883_v27, %v3305_v38  ;;  %v3885_v9 = vpop.f32.mrb[7].mxu1  ;;  %v3971_v6 = vpop.f32.mrb[11].mxu0  ;;  %v4548_v42 = vadd.f32 %v3969_v43, %v3313_v12 }
 0x7aa   :  { %v4339_v58 = vmul.f32 -1.442695, %v4543_v63  ;;  %v4545_v49 = vadd.f32 %v3885_v9, %v3309_v54  ;;  %v4341_v50 = vmul.f32 -1.442695, %v4547_v3  ;;  %v4549_v4 = vadd.f32 %v3971_v6, %v3317_v33 }
 0x7ab   :  { %5101 = vpow2.f32 %v4337_v21  ;;  %v4338_v20 = vmul.f32 -1.442695, %v4544_v52 }
 0x7ac   :  { %5103 = vpow2.f32 %v4339_v58  ;;  %v4340_v22 = vmul.f32 -1.442695, %v4545_v49  ;;  %v4342_v31 = vmul.f32 -1.442695, %v4549_v4 }
 0x7ad   :  { %5105 = vpow2.f32 %v4338_v20 }
 0x7ae   :  { %5107 = vpow2.f32 %v4340_v22 }
 0x7af   :  { %5109 = vtanh.f32 %v4546_v60 }
 0x7b0   :  { %5111 = vpow2.f32 %v4341_v50 }
 0x7b1   :  { %5113 = vtanh.f32 %v4548_v42 }
 0x7b5   :  { %v5102_v26 = vpop.eup %5101 }
 0x7b6   :  { %v5104_v39 = vpop.eup %5103  ;;  %v3980_v32 = vadd.f32 1.0, %v5102_v26 }
 0x7b7   :  { %v3992_v48 = vadd.f32 1.0, %v5104_v39  ;;  %v5106_v62 = vpop.eup %5105 }
 0x7b8   :  { %5115 = vrcp.f32 %v3980_v32  ;;  %v3981_v7 = vadd.f32 1.0, %v5106_v62  ;;  %v5108_v28 = vpop.eup %5107 }
 0x7b9   :  { %5117 = vrcp.f32 %v3992_v48  ;;  %v3993_v1 = vadd.f32 1.0, %v5108_v28  ;;  %v5110_v14 = vpop.eup %5109 }
 0x7ba   :  { %5119 = vpow2.f32 %v4342_v31  ;;  %v5112_v29 = vpop.eup %5111 }
 0x7bb   :  { %5121 = vrcp.f32 %v3981_v7  ;;  %v5114_v44 = vpop.eup %5113  ;;  %v4006_v41 = vadd.f32 1.0, %v5112_v29 }
 0x7bc   :  { %5123 = vrcp.f32 %v3993_v1 }
 0x7bd   :  { %5125 = vrcp.f32 %v4006_v41 }
 0x7c2   :  { %v5116_v61 = vpop.eup %5115 }
 0x7c3   :  { %v5118_v11 = vpop.eup %5117  ;;  %v4017_v57 = vmul.f32 %v5116_v61, %v5110_v14 }
 0x7c4   :  { %v5120_v37 = vpop.eup %5119  ;;  %v4015_v16 = vmul.f32 %v5118_v11, %v4013_v53 }
 0x7c5   :  { %v5122_v18 = vpop.eup %5121  ;;  %v4007_v30 = vadd.f32 1.0, %v5120_v37 }
 0x7c6   :  { %v4019_v59 = vadd.f32 %v4017_v57, %v4015_v16  ;;  %v4018_v13 = vmul.f32 %v5122_v18, %v5114_v44  ;;  %v5124_v8 = vpop.eup %5123 }
 0x7c7   :  { %v4016_v34 = vmul.f32 %v5124_v8, %v4014_v45  ;;  %v5126_v19 = vpop.eup %5125 }
 0x7c8   :  { %5127 = vtanh.f32 %v4019_v59  ;;  %4041 = vst [vmem:[#allocation20 + $0x10] sm:$0xff] %v4019_v59 }
 0x7c9   :  { %v4020_v24 = vadd.f32 %v4018_v13, %v4016_v34  ;;  %5129 = vrcp.f32 %v4007_v30 }
 0x7cb   :  { %5131 = vtanh.f32 %v4020_v24  ;;  %4042 = vst [vmem:[#allocation20 + $0x18] sm:$0xff] %v4020_v24 }
 0x7d2   :  { %v5128_v47 = vpop.eup %5127 }
 0x7d3   :  { %v4023_v10 = vmul.f32 %v5128_v47, %v5126_v19  ;;  %v5130_v5 = vpop.eup %5129 }
 0x7d5   :  { %4036 = vst [vmem:[#allocation18 + $0x10] sm:$0xff] %v4023_v10  ;;  %v4029_v2 = vmul.f32 %v4473_v56, %v4023_v10  ;;  %v5132_v51 = vpop.eup %5131 }
 0x7d6   :  { %v4024_v36 = vmul.f32 %v5132_v51, %v5130_v5 }
 0x7d7   :  { %4031 = vst [vmem:[#allocation17] sm:$0xff] %v4029_v2 }
 0x7d8   :  { %4037 = vst [vmem:[#allocation18 + $0x18] sm:$0xff] %v4024_v36  ;;  %v4030_v25 = vmul.f32 %v4474_v40, %v4024_v36 }
 0x7d9   :  { %5342 = shalt.err (!%p5339_p6)
}
 0x7da   :  { %s5343_s30 = scalar_lea.hbm %s6505_s15, 512 }
 0x7db   :  { %p5344_p7 = scmp.ne.s32.totalorder %s6505_s15, %s5343_s30  ;;  %p5347_p8 = scmp.lt.u32.totalorder %s5343_s30, %s6505_s15 }
 0x7dd   :  { %p5349_p9 = pnand %p5347_p8, %p5344_p7 }
 0x7df   :  { %5352 = shalt.err (!%p5349_p9)
}
 0x7e0   :  { %4066 = dma.vmem_to_hbm [thread:$0]  %s4061_s27, 512, %s6505_s15, [#allocation19], %s5416_s22, %s5416_s22, %s5417_s18   ;;  %4032 = vst [vmem:[#allocation17 + $0x8] sm:$0xff] %v4030_v25 }
 0x7e1   :  { %s5353_s3 = scalar_lea.vmem %s6431_s23, 512  ;;  %p5358_p11 = scmp.lt.s32.totalorder %s6431_s23, %s6431_s23 }
 0x7e2   :  { %p5354_p10 = scmp.ne.s32.totalorder %s6431_s23, %s5353_s3  ;;  %p5359_p12 = scmp.lt.s32.totalorder %s5353_s3, %s5353_s3 }
 0x7e4   :  { %p5360_p13 = por %p5359_p12, %p5358_p11 }
 0x7e6   :  { %p5361_p0 = pnand %p5360_p13, %p5354_p10 }
 0x7e8   :  { %5364 = shalt.err (!%p5361_p0)
}
 0x7e9   :  { %s5365_s8 = scalar_lea.hbm %s6506_s16, 512 }
 0x7ea   :  { %p5366_p1 = scmp.ne.s32.totalorder %s6506_s16, %s5365_s8  ;;  %p5369_p2 = scmp.lt.u32.totalorder %s5365_s8, %s6506_s16 }
 0x7ec   :  { %p5371_p3 = pnand %p5369_p2, %p5366_p1 }
 0x7ee   :  { %5374 = shalt.err (!%p5371_p3)
}
 0x7ef   :  { %4078 = dma.vmem_to_hbm [thread:$0]  %s6431_s23, 512, %s6506_s16, [#allocation19], %s5416_s22, %s5416_s22, %s5417_s18  }
 0x7f0   :  { %s5375_s10 = scalar_lea.vmem %s6433_s29, 256  ;;  %p5380_p5 = scmp.lt.s32.totalorder %s6433_s29, %s6433_s29 }
 0x7f1   :  { %p5376_p4 = scmp.ne.s32.totalorder %s6433_s29, %s5375_s10  ;;  %p5381_p6 = scmp.lt.s32.totalorder %s5375_s10, %s5375_s10 }
 0x7f3   :  { %p5382_p7 = por %p5381_p6, %p5380_p5 }
 0x7f5   :  { %p5383_p8 = pnand %p5382_p7, %p5376_p4 }
 0x7f7   :  { %5386 = shalt.err (!%p5383_p8)
}
 0x7f8   :  { %s6560_s27 = sld [smem:[#allocation45_spill]] }
 0x7fe   :  { %s5387_s4 = scalar_lea.hbm %s6560_s27, 256 }
 0x7ff   :  { %p5388_p9 = scmp.ne.s32.totalorder %s6560_s27, %s5387_s4  ;;  %p5391_p10 = scmp.lt.u32.totalorder %s5387_s4, %s6560_s27 }
 0x801   :  { %p5393_p11 = pnand %p5391_p10, %p5388_p9 }
 0x803   :  { %5396 = shalt.err (!%p5393_p11)
}
 0x804   :  { %4054 = dma.vmem_to_hbm [thread:$0]  %s6433_s29, 256, %s6560_s27, [#allocation4], %s5416_s22, %s5416_s22, %s5417_s18  }
 0x805   :  { %5407 = dma.done.wait [#allocation4], 256  }
 0x806   :  { %5408 = vsyncadd [#allocation4], 4294967040 }
 0x807   :  { %5409 = dma.done.wait [#allocation19], 1024  }
 0x808   :  { %5410 = vsyncadd [#allocation19], 4294966272 }
 0x809   :  { %4088 = vsyncpa [#allocation3], 1 }
 0x80a   :  { %4089 = vsyncpa [#allocation6], 1 }
 0x80b   :  { %4090 = vsyncpa [#allocation9], 1 }
 0x80c   :  { %4091 = vsyncpa [#allocation12], 1 }
 0x80d   :  { %4092 = vsyncpa [#allocation15], 1 }
 0x80e   :  { %4093 = vsyncpa [#allocation4], 1 }
 0x80f   :  { %4094 = vsyncpa [#allocation19], 1 }

</bundles_post_ra>
